<compile_context>
chip_gen: v7x
topology: tpu7x:2x2x1
jax: 0.10.0
libtpu: 0.0.40
codegen_flags: <defaults>
</compile_context>

<pallas_src>
import functools

import jax
import jax.numpy as jnp
from jax import lax
from jax.experimental import pallas as pl
from jax.experimental.pallas import tpu as pltpu


def _basic_block_kernel(x_ref, w1_ref, b1_ref, w2_ref, b2_ref, o_ref,
                        xpad_ref, hpad_ref, *, H, W):
    # x_ref : (1, C, H*W)   one image, NCHW with spatial flattened (lane-dense)
    # w*_ref: (9, C, C)     3x3 weights, tap-major, BN scale folded in
    # b*_ref: (1, C)        folded BN bias
    # o_ref : (1, C, H*W)   output, same layout as input
    # xpad_ref / hpad_ref: (H+2, W+2, C) VMEM scratch for the 1-px halo
    C = x_ref.shape[1]
    HW = H * W

    x_flat = x_ref[0].astype(jnp.float32)            # (C, HW), lane-dense
    x_hwc = x_flat.T.reshape(H, W, C)                # (H, W, C), channel-minor

    def conv3x3(pad_ref, w_ref, b_ref):
        # 9 shifted (HW, C) x (C, C) matmuls accumulated in f32.
        acc = jnp.zeros((HW, C), jnp.float32)
        for k in range(9):
            dy, dx = k // 3, k % 3
            patch = pad_ref[dy:dy + H, dx:dx + W, :].reshape(HW, C)
            acc += jnp.dot(patch, w_ref[k], preferred_element_type=jnp.float32)
        return acc + b_ref[...].astype(jnp.float32)  # folded-BN bias

    # ---- conv1 -> bn1 -> relu   (dropout = identity at inference) ----
    xpad_ref[...] = jnp.zeros_like(xpad_ref)
    xpad_ref[1:H + 1, 1:W + 1, :] = x_hwc
    h = jnp.maximum(conv3x3(xpad_ref, w1_ref, b1_ref), 0.0)        # (HW, C)

    # ---- conv2 -> bn2 -> (+ identity) -> relu ----
    hpad_ref[...] = jnp.zeros_like(hpad_ref)
    hpad_ref[1:H + 1, 1:W + 1, :] = h.reshape(H, W, C)
    out = conv3x3(hpad_ref, w2_ref, b2_ref)                        # (HW, C)
    out = out.T + x_flat                                           # (C, HW) lane-dense
    o_ref[0] = jnp.maximum(out, 0.0).astype(o_ref.dtype)


def _fold_conv_bn(w_oihw, gamma, beta, mean, var, eps=1e-5):
    """Fold inference BatchNorm into conv weights (scale) + per-channel bias."""
    scale = gamma / jnp.sqrt(var + eps)                            # (Cout,)
    bias = beta - mean * scale                                     # (Cout,)
    cout, cin = w_oihw.shape[0], w_oihw.shape[1]
    # PyTorch conv2d is cross-correlation: out[h,w] += xpad[h+dy, w+dx] @ W[:,:,dy,dx]^T
    w9 = jnp.transpose(w_oihw, (2, 3, 1, 0)).reshape(9, cin, cout)
    w9 = (w9 * scale[None, None, :]).astype(jnp.float32)
    return w9, bias.reshape(1, cout).astype(jnp.float32)


def basic_block_forward(x_nchw, params):
    """Pallas implementation of BasicBlock.forward (inference semantics).

    x_nchw: (N, C, H, W) float32 (PyTorch NCHW layout). Returns (N, C, H, W).
    """
    N, C, H, W = x_nchw.shape
    HW = H * W
    assert params["conv1_w"].shape[0] == C, "downsample=None requires Cin == Cout"

    w1, b1 = _fold_conv_bn(params["conv1_w"], params["bn1_gamma"], params["bn1_beta"],
                           params["bn1_mean"], params["bn1_var"])
    w2, b2 = _fold_conv_bn(params["conv2_w"], params["bn2_gamma"], params["bn2_beta"],
                           params["bn2_mean"], params["bn2_var"])

    x_flat = x_nchw.reshape(N, C, HW)  # free reshape (contiguous), no transpose

    out_flat = pl.pallas_call(
        functools.partial(_basic_block_kernel, H=H, W=W),
        out_shape=jax.ShapeDtypeStruct((N, C, HW), x_nchw.dtype),
        grid_spec=pltpu.PrefetchScalarGridSpec(
            num_scalar_prefetch=0,
            grid=(N,),
            in_specs=[
                pl.BlockSpec((1, C, HW), lambda n: (n, 0, 0)),   # x (one image)
                pl.BlockSpec((9, C, C), lambda n: (0, 0, 0)),    # w1 (folded)
                pl.BlockSpec((1, C), lambda n: (0, 0)),          # b1
                pl.BlockSpec((9, C, C), lambda n: (0, 0, 0)),    # w2 (folded)
                pl.BlockSpec((1, C), lambda n: (0, 0)),          # b2
            ],
            out_specs=pl.BlockSpec((1, C, HW), lambda n: (n, 0, 0)),
            scratch_shapes=[
                pltpu.VMEM((H + 2, W + 2, C), jnp.float32),      # padded input
                pltpu.VMEM((H + 2, W + 2, C), jnp.float32),      # padded hidden
            ],
        ),
        compiler_params=pltpu.CompilerParams(dimension_semantics=("parallel",)),
    )(x_flat, w1, b1, w2, b2)

    return out_flat.reshape(N, C, H, W)  # free reshape back to NCHW


def _reference_forward(x_nchw, params):
    """Pure-JAX reference using lax.conv, for correctness checking."""
    def conv(x, w):
        return lax.conv_general_dilated(
            x, w, window_strides=(1, 1), padding=((1, 1), (1, 1)),
            dimension_numbers=("NCHW", "OIHW", "NCHW"))

    def bn(x, g, b, m, v, eps=1e-5):
        g = g.reshape(1, -1, 1, 1); b = b.reshape(1, -1, 1, 1)
        m = m.reshape(1, -1, 1, 1); v = v.reshape(1, -1, 1, 1)
        return (x - m) / jnp.sqrt(v + eps) * g + b

    identity = x_nchw
    out = bn(conv(x_nchw, params["conv1_w"]), params["bn1_gamma"], params["bn1_beta"],
             params["bn1_mean"], params["bn1_var"])
    out = jnp.maximum(out, 0.0)
    out = bn(conv(out, params["conv2_w"]), params["bn2_gamma"], params["bn2_beta"],
             params["bn2_mean"], params["bn2_var"])
    out = out + identity
    return jnp.maximum(out, 0.0)


def _init_params(key, in_channels, out_channels):
    ks = jax.random.split(key, 6)
    return {
        "conv1_w": 0.1 * jax.random.normal(ks[0], (out_channels, in_channels, 3, 3), jnp.float32),
        "conv2_w": 0.1 * jax.random.normal(ks[1], (out_channels, out_channels, 3, 3), jnp.float32),
        "bn1_gamma": 1.0 + 0.1 * jax.random.normal(ks[2], (out_channels,), jnp.float32),
        "bn1_beta": 0.1 * jax.random.normal(ks[3], (out_channels,), jnp.float32),
        "bn1_mean": 0.05 * jnp.arange(out_channels, dtype=jnp.float32),
        "bn1_var": 1.0 + 0.1 * jnp.arange(out_channels, dtype=jnp.float32),
        "bn2_gamma": 1.0 + 0.1 * jax.random.normal(ks[4], (out_channels,), jnp.float32),
        "bn2_beta": 0.1 * jax.random.normal(ks[5], (out_channels,), jnp.float32),
        "bn2_mean": -0.03 * jnp.arange(out_channels, dtype=jnp.float32),
        "bn2_var": 1.0 + 0.05 * jnp.arange(out_channels, dtype=jnp.float32),
    }


if __name__ == "__main__":
    N, C, H, W = 2, 4, 16, 16  # in_channels == out_channels, stride=1, downsample=None
    key = jax.random.PRNGKey(0)
    k_x, k_p = jax.random.split(key)
    x = jax.random.normal(k_x, (N, C, H, W), jnp.float32)
    params = _init_params(k_p, C, C)

    out = jax.block_until_ready(basic_block_forward(x, params))
    ref = jax.block_until_ready(_reference_forward(x, params))

    assert out.shape == (N, C, H, W), out.shape
    err = float(jnp.max(jnp.abs(out - ref)))
    assert err < 1e-4, f"max abs err {err}"
    print("KERNEL_OK")
</pallas_src>

<mosaic_0001>
module attributes {stable_mosaic.version = 11 : i64} {
  func.func @_basic_block_kernel(%arg0: i32, %arg1: memref<1x4x256xf32, #tpu.memory_space<vmem>>, %arg2: memref<9x4x4xf32, #tpu.memory_space<vmem>>, %arg3: memref<1x4xf32, #tpu.memory_space<vmem>>, %arg4: memref<9x4x4xf32, #tpu.memory_space<vmem>>, %arg5: memref<1x4xf32, #tpu.memory_space<vmem>>, %arg6: memref<1x4x256xf32, #tpu.memory_space<vmem>>, %arg7: memref<18x18x4xf32, #tpu.memory_space<vmem>>, %arg8: memref<18x18x4xf32, #tpu.memory_space<vmem>>) attributes {dimension_semantics = [#tpu.dimension_semantics<parallel>], iteration_bounds = array<i64: 2>, scalar_prefetch = 0 : i64, scratch_operands = 2 : i64, tpu.core_type = #tpu.core_type<tc>, window_params = [{transform_indices = @transform_0, window_bounds = array<i64: 1, 4, 256>}, {pipeline_mode = #tpu.pipeline_mode<synchronous>, transform_indices = @transform_1, window_bounds = array<i64: 9, 4, 4>}, {pipeline_mode = #tpu.pipeline_mode<synchronous>, transform_indices = @transform_2, window_bounds = array<i64: 1, 4>}, {pipeline_mode = #tpu.pipeline_mode<synchronous>, transform_indices = @transform_3, window_bounds = array<i64: 9, 4, 4>}, {pipeline_mode = #tpu.pipeline_mode<synchronous>, transform_indices = @transform_4, window_bounds = array<i64: 1, 4>}, {transform_indices = @transform_5, window_bounds = array<i64: 1, 4, 256>}]} {
    %c0 = arith.constant 0 : index
    %c0_0 = arith.constant 0 : index
    %c0_1 = arith.constant 0 : index
    %0 = vector.load %arg1[%c0, %c0_0, %c0_1] : memref<1x4x256xf32, #tpu.memory_space<vmem>>, vector<1x4x256xf32>
    %1 = vector.shape_cast %0 : vector<1x4x256xf32> to vector<4x256xf32>
    %2 = tpu.transpose %1, [1, 0] : vector<4x256xf32> -> vector<256x4xf32>
    %3 = vector.shape_cast %2 : vector<256x4xf32> to vector<16x16x4xf32>
    %cst = arith.constant 0.000000e+00 : f32
    %4 = vector.broadcast %cst : f32 to vector<18x18x4xf32>
    %c0_2 = arith.constant 0 : index
    %c0_3 = arith.constant 0 : index
    %c0_4 = arith.constant 0 : index
    %5 = vector.load %arg7[%c0_2, %c0_3, %c0_4] : memref<18x18x4xf32, #tpu.memory_space<vmem>>, vector<18x18x4xf32>
    tpu.vector_store %arg7[%c0_2, %c0_3, %c0_4], %4 {strides = array<i32>} : memref<18x18x4xf32, #tpu.memory_space<vmem>>, vector<18x18x4xf32>,
    %c1 = arith.constant 1 : index
    %c1_5 = arith.constant 1 : index
    %c0_6 = arith.constant 0 : index
    %6 = vector.load %arg7[%c1, %c1_5, %c0_6] : memref<18x18x4xf32, #tpu.memory_space<vmem>>, vector<16x16x4xf32>
    tpu.vector_store %arg7[%c1, %c1_5, %c0_6], %3 {strides = array<i32>} : memref<18x18x4xf32, #tpu.memory_space<vmem>>, vector<16x16x4xf32>,
    %cst_7 = arith.constant 0.000000e+00 : f32
    %7 = vector.broadcast %cst_7 : f32 to vector<256x4xf32>
    %c0_8 = arith.constant 0 : index
    %c0_9 = arith.constant 0 : index
    %c0_10 = arith.constant 0 : index
    %8 = vector.load %arg7[%c0_8, %c0_9, %c0_10] : memref<18x18x4xf32, #tpu.memory_space<vmem>>, vector<16x16x4xf32>
    %9 = vector.shape_cast %8 : vector<16x16x4xf32> to vector<256x4xf32>
    %c0_11 = arith.constant 0 : index
    %c0_12 = arith.constant 0 : index
    %c0_13 = arith.constant 0 : index
    %10 = vector.load %arg2[%c0_11, %c0_12, %c0_13] : memref<9x4x4xf32, #tpu.memory_space<vmem>>, vector<1x4x4xf32>
    %11 = vector.shape_cast %10 : vector<1x4x4xf32> to vector<4x4xf32>
    %cst_14 = arith.constant dense<0.000000e+00> : vector<256x4xf32>
    %12 = tpu.matmul %9, %11, %cst_14 {dimension_numbers = #tpu.dot_dimension_numbers<[1], [0], [0], [1], [0, 0, 1, 1], [], []>} : vector<256x4xf32>, vector<4x4xf32>, vector<256x4xf32> -> vector<256x4xf32>
    %13 = arith.addf %7, %12 : vector<256x4xf32>
    %c0_15 = arith.constant 0 : index
    %c1_16 = arith.constant 1 : index
    %c0_17 = arith.constant 0 : index
    %14 = vector.load %arg7[%c0_15, %c1_16, %c0_17] : memref<18x18x4xf32, #tpu.memory_space<vmem>>, vector<16x16x4xf32>
    %15 = vector.shape_cast %14 : vector<16x16x4xf32> to vector<256x4xf32>
    %c1_18 = arith.constant 1 : index
    %c0_19 = arith.constant 0 : index
    %c0_20 = arith.constant 0 : index
    %16 = vector.load %arg2[%c1_18, %c0_19, %c0_20] : memref<9x4x4xf32, #tpu.memory_space<vmem>>, vector<1x4x4xf32>
    %17 = vector.shape_cast %16 : vector<1x4x4xf32> to vector<4x4xf32>
    %cst_21 = arith.constant dense<0.000000e+00> : vector<256x4xf32>
    %18 = tpu.matmul %15, %17, %cst_21 {dimension_numbers = #tpu.dot_dimension_numbers<[1], [0], [0], [1], [0, 0, 1, 1], [], []>} : vector<256x4xf32>, vector<4x4xf32>, vector<256x4xf32> -> vector<256x4xf32>
    %19 = arith.addf %13, %18 : vector<256x4xf32>
    %c0_22 = arith.constant 0 : index
    %c2 = arith.constant 2 : index
    %c0_23 = arith.constant 0 : index
    %20 = vector.load %arg7[%c0_22, %c2, %c0_23] : memref<18x18x4xf32, #tpu.memory_space<vmem>>, vector<16x16x4xf32>
    %21 = vector.shape_cast %20 : vector<16x16x4xf32> to vector<256x4xf32>
    %c2_24 = arith.constant 2 : index
    %c0_25 = arith.constant 0 : index
    %c0_26 = arith.constant 0 : index
    %22 = vector.load %arg2[%c2_24, %c0_25, %c0_26] : memref<9x4x4xf32, #tpu.memory_space<vmem>>, vector<1x4x4xf32>
    %23 = vector.shape_cast %22 : vector<1x4x4xf32> to vector<4x4xf32>
    %cst_27 = arith.constant dense<0.000000e+00> : vector<256x4xf32>
    %24 = tpu.matmul %21, %23, %cst_27 {dimension_numbers = #tpu.dot_dimension_numbers<[1], [0], [0], [1], [0, 0, 1, 1], [], []>} : vector<256x4xf32>, vector<4x4xf32>, vector<256x4xf32> -> vector<256x4xf32>
    %25 = arith.addf %19, %24 : vector<256x4xf32>
    %c1_28 = arith.constant 1 : index
    %c0_29 = arith.constant 0 : index
    %c0_30 = arith.constant 0 : index
    %26 = vector.load %arg7[%c1_28, %c0_29, %c0_30] : memref<18x18x4xf32, #tpu.memory_space<vmem>>, vector<16x16x4xf32>
    %27 = vector.shape_cast %26 : vector<16x16x4xf32> to vector<256x4xf32>
    %c3 = arith.constant 3 : index
    %c0_31 = arith.constant 0 : index
    %c0_32 = arith.constant 0 : index
    %28 = vector.load %arg2[%c3, %c0_31, %c0_32] : memref<9x4x4xf32, #tpu.memory_space<vmem>>, vector<1x4x4xf32>
    %29 = vector.shape_cast %28 : vector<1x4x4xf32> to vector<4x4xf32>
    %cst_33 = arith.constant dense<0.000000e+00> : vector<256x4xf32>
    %30 = tpu.matmul %27, %29, %cst_33 {dimension_numbers = #tpu.dot_dimension_numbers<[1], [0], [0], [1], [0, 0, 1, 1], [], []>} : vector<256x4xf32>, vector<4x4xf32>, vector<256x4xf32> -> vector<256x4xf32>
    %31 = arith.addf %25, %30 : vector<256x4xf32>
    %c1_34 = arith.constant 1 : index
    %c1_35 = arith.constant 1 : index
    %c0_36 = arith.constant 0 : index
    %32 = vector.load %arg7[%c1_34, %c1_35, %c0_36] : memref<18x18x4xf32, #tpu.memory_space<vmem>>, vector<16x16x4xf32>
    %33 = vector.shape_cast %32 : vector<16x16x4xf32> to vector<256x4xf32>
    %c4 = arith.constant 4 : index
    %c0_37 = arith.constant 0 : index
    %c0_38 = arith.constant 0 : index
    %34 = vector.load %arg2[%c4, %c0_37, %c0_38] : memref<9x4x4xf32, #tpu.memory_space<vmem>>, vector<1x4x4xf32>
    %35 = vector.shape_cast %34 : vector<1x4x4xf32> to vector<4x4xf32>
    %cst_39 = arith.constant dense<0.000000e+00> : vector<256x4xf32>
    %36 = tpu.matmul %33, %35, %cst_39 {dimension_numbers = #tpu.dot_dimension_numbers<[1], [0], [0], [1], [0, 0, 1, 1], [], []>} : vector<256x4xf32>, vector<4x4xf32>, vector<256x4xf32> -> vector<256x4xf32>
    %37 = arith.addf %31, %36 : vector<256x4xf32>
    %c1_40 = arith.constant 1 : index
    %c2_41 = arith.constant 2 : index
    %c0_42 = arith.constant 0 : index
    %38 = vector.load %arg7[%c1_40, %c2_41, %c0_42] : memref<18x18x4xf32, #tpu.memory_space<vmem>>, vector<16x16x4xf32>
    %39 = vector.shape_cast %38 : vector<16x16x4xf32> to vector<256x4xf32>
    %c5 = arith.constant 5 : index
    %c0_43 = arith.constant 0 : index
    %c0_44 = arith.constant 0 : index
    %40 = vector.load %arg2[%c5, %c0_43, %c0_44] : memref<9x4x4xf32, #tpu.memory_space<vmem>>, vector<1x4x4xf32>
    %41 = vector.shape_cast %40 : vector<1x4x4xf32> to vector<4x4xf32>
    %cst_45 = arith.constant dense<0.000000e+00> : vector<256x4xf32>
    %42 = tpu.matmul %39, %41, %cst_45 {dimension_numbers = #tpu.dot_dimension_numbers<[1], [0], [0], [1], [0, 0, 1, 1], [], []>} : vector<256x4xf32>, vector<4x4xf32>, vector<256x4xf32> -> vector<256x4xf32>
    %43 = arith.addf %37, %42 : vector<256x4xf32>
    %c2_46 = arith.constant 2 : index
    %c0_47 = arith.constant 0 : index
    %c0_48 = arith.constant 0 : index
    %44 = vector.load %arg7[%c2_46, %c0_47, %c0_48] : memref<18x18x4xf32, #tpu.memory_space<vmem>>, vector<16x16x4xf32>
    %45 = vector.shape_cast %44 : vector<16x16x4xf32> to vector<256x4xf32>
    %c6 = arith.constant 6 : index
    %c0_49 = arith.constant 0 : index
    %c0_50 = arith.constant 0 : index
    %46 = vector.load %arg2[%c6, %c0_49, %c0_50] : memref<9x4x4xf32, #tpu.memory_space<vmem>>, vector<1x4x4xf32>
    %47 = vector.shape_cast %46 : vector<1x4x4xf32> to vector<4x4xf32>
    %cst_51 = arith.constant dense<0.000000e+00> : vector<256x4xf32>
    %48 = tpu.matmul %45, %47, %cst_51 {dimension_numbers = #tpu.dot_dimension_numbers<[1], [0], [0], [1], [0, 0, 1, 1], [], []>} : vector<256x4xf32>, vector<4x4xf32>, vector<256x4xf32> -> vector<256x4xf32>
    %49 = arith.addf %43, %48 : vector<256x4xf32>
    %c2_52 = arith.constant 2 : index
    %c1_53 = arith.constant 1 : index
    %c0_54 = arith.constant 0 : index
    %50 = vector.load %arg7[%c2_52, %c1_53, %c0_54] : memref<18x18x4xf32, #tpu.memory_space<vmem>>, vector<16x16x4xf32>
    %51 = vector.shape_cast %50 : vector<16x16x4xf32> to vector<256x4xf32>
    %c7 = arith.constant 7 : index
    %c0_55 = arith.constant 0 : index
    %c0_56 = arith.constant 0 : index
    %52 = vector.load %arg2[%c7, %c0_55, %c0_56] : memref<9x4x4xf32, #tpu.memory_space<vmem>>, vector<1x4x4xf32>
    %53 = vector.shape_cast %52 : vector<1x4x4xf32> to vector<4x4xf32>
    %cst_57 = arith.constant dense<0.000000e+00> : vector<256x4xf32>
    %54 = tpu.matmul %51, %53, %cst_57 {dimension_numbers = #tpu.dot_dimension_numbers<[1], [0], [0], [1], [0, 0, 1, 1], [], []>} : vector<256x4xf32>, vector<4x4xf32>, vector<256x4xf32> -> vector<256x4xf32>
    %55 = arith.addf %49, %54 : vector<256x4xf32>
    %c2_58 = arith.constant 2 : index
    %c2_59 = arith.constant 2 : index
    %c0_60 = arith.constant 0 : index
    %56 = vector.load %arg7[%c2_58, %c2_59, %c0_60] : memref<18x18x4xf32, #tpu.memory_space<vmem>>, vector<16x16x4xf32>
    %57 = vector.shape_cast %56 : vector<16x16x4xf32> to vector<256x4xf32>
    %c8 = arith.constant 8 : index
    %c0_61 = arith.constant 0 : index
    %c0_62 = arith.constant 0 : index
    %58 = vector.load %arg2[%c8, %c0_61, %c0_62] : memref<9x4x4xf32, #tpu.memory_space<vmem>>, vector<1x4x4xf32>
    %59 = vector.shape_cast %58 : vector<1x4x4xf32> to vector<4x4xf32>
    %cst_63 = arith.constant dense<0.000000e+00> : vector<256x4xf32>
    %60 = tpu.matmul %57, %59, %cst_63 {dimension_numbers = #tpu.dot_dimension_numbers<[1], [0], [0], [1], [0, 0, 1, 1], [], []>} : vector<256x4xf32>, vector<4x4xf32>, vector<256x4xf32> -> vector<256x4xf32>
    %61 = arith.addf %55, %60 : vector<256x4xf32>
    %c0_64 = arith.constant 0 : index
    %c0_65 = arith.constant 0 : index
    %62 = vector.load %arg3[%c0_64, %c0_65] : memref<1x4xf32, #tpu.memory_space<vmem>>, vector<1x4xf32>
    %63 = vector.broadcast %62 : vector<1x4xf32> to vector<256x4xf32>
    %64 = arith.addf %61, %63 : vector<256x4xf32>
    %cst_66 = arith.constant 0.000000e+00 : f32
    %65 = vector.broadcast %cst_66 : f32 to vector<256x4xf32>
    %66 = arith.maximumf %64, %65 : vector<256x4xf32>
    %cst_67 = arith.constant 0.000000e+00 : f32
    %67 = vector.broadcast %cst_67 : f32 to vector<18x18x4xf32>
    %c0_68 = arith.constant 0 : index
    %c0_69 = arith.constant 0 : index
    %c0_70 = arith.constant 0 : index
    %68 = vector.load %arg8[%c0_68, %c0_69, %c0_70] : memref<18x18x4xf32, #tpu.memory_space<vmem>>, vector<18x18x4xf32>
    tpu.vector_store %arg8[%c0_68, %c0_69, %c0_70], %67 {strides = array<i32>} : memref<18x18x4xf32, #tpu.memory_space<vmem>>, vector<18x18x4xf32>,
    %69 = vector.shape_cast %66 : vector<256x4xf32> to vector<16x16x4xf32>
    %c1_71 = arith.constant 1 : index
    %c1_72 = arith.constant 1 : index
    %c0_73 = arith.constant 0 : index
    %70 = vector.load %arg8[%c1_71, %c1_72, %c0_73] : memref<18x18x4xf32, #tpu.memory_space<vmem>>, vector<16x16x4xf32>
    tpu.vector_store %arg8[%c1_71, %c1_72, %c0_73], %69 {strides = array<i32>} : memref<18x18x4xf32, #tpu.memory_space<vmem>>, vector<16x16x4xf32>,
    %cst_74 = arith.constant 0.000000e+00 : f32
    %71 = vector.broadcast %cst_74 : f32 to vector<256x4xf32>
    %c0_75 = arith.constant 0 : index
    %c0_76 = arith.constant 0 : index
    %c0_77 = arith.constant 0 : index
    %72 = vector.load %arg8[%c0_75, %c0_76, %c0_77] : memref<18x18x4xf32, #tpu.memory_space<vmem>>, vector<16x16x4xf32>
    %73 = vector.shape_cast %72 : vector<16x16x4xf32> to vector<256x4xf32>
    %c0_78 = arith.constant 0 : index
    %c0_79 = arith.constant 0 : index
    %c0_80 = arith.constant 0 : index
    %74 = vector.load %arg4[%c0_78, %c0_79, %c0_80] : memref<9x4x4xf32, #tpu.memory_space<vmem>>, vector<1x4x4xf32>
    %75 = vector.shape_cast %74 : vector<1x4x4xf32> to vector<4x4xf32>
    %cst_81 = arith.constant dense<0.000000e+00> : vector<256x4xf32>
    %76 = tpu.matmul %73, %75, %cst_81 {dimension_numbers = #tpu.dot_dimension_numbers<[1], [0], [0], [1], [0, 0, 1, 1], [], []>} : vector<256x4xf32>, vector<4x4xf32>, vector<256x4xf32> -> vector<256x4xf32>
    %77 = arith.addf %71, %76 : vector<256x4xf32>
    %c0_82 = arith.constant 0 : index
    %c1_83 = arith.constant 1 : index
    %c0_84 = arith.constant 0 : index
    %78 = vector.load %arg8[%c0_82, %c1_83, %c0_84] : memref<18x18x4xf32, #tpu.memory_space<vmem>>, vector<16x16x4xf32>
    %79 = vector.shape_cast %78 : vector<16x16x4xf32> to vector<256x4xf32>
    %c1_85 = arith.constant 1 : index
    %c0_86 = arith.constant 0 : index
    %c0_87 = arith.constant 0 : index
    %80 = vector.load %arg4[%c1_85, %c0_86, %c0_87] : memref<9x4x4xf32, #tpu.memory_space<vmem>>, vector<1x4x4xf32>
    %81 = vector.shape_cast %80 : vector<1x4x4xf32> to vector<4x4xf32>
    %cst_88 = arith.constant dense<0.000000e+00> : vector<256x4xf32>
    %82 = tpu.matmul %79, %81, %cst_88 {dimension_numbers = #tpu.dot_dimension_numbers<[1], [0], [0], [1], [0, 0, 1, 1], [], []>} : vector<256x4xf32>, vector<4x4xf32>, vector<256x4xf32> -> vector<256x4xf32>
    %83 = arith.addf %77, %82 : vector<256x4xf32>
    %c0_89 = arith.constant 0 : index
    %c2_90 = arith.constant 2 : index
    %c0_91 = arith.constant 0 : index
    %84 = vector.load %arg8[%c0_89, %c2_90, %c0_91] : memref<18x18x4xf32, #tpu.memory_space<vmem>>, vector<16x16x4xf32>
    %85 = vector.shape_cast %84 : vector<16x16x4xf32> to vector<256x4xf32>
    %c2_92 = arith.constant 2 : index
    %c0_93 = arith.constant 0 : index
    %c0_94 = arith.constant 0 : index
    %86 = vector.load %arg4[%c2_92, %c0_93, %c0_94] : memref<9x4x4xf32, #tpu.memory_space<vmem>>, vector<1x4x4xf32>
    %87 = vector.shape_cast %86 : vector<1x4x4xf32> to vector<4x4xf32>
    %cst_95 = arith.constant dense<0.000000e+00> : vector<256x4xf32>
    %88 = tpu.matmul %85, %87, %cst_95 {dimension_numbers = #tpu.dot_dimension_numbers<[1], [0], [0], [1], [0, 0, 1, 1], [], []>} : vector<256x4xf32>, vector<4x4xf32>, vector<256x4xf32> -> vector<256x4xf32>
    %89 = arith.addf %83, %88 : vector<256x4xf32>
    %c1_96 = arith.constant 1 : index
    %c0_97 = arith.constant 0 : index
    %c0_98 = arith.constant 0 : index
    %90 = vector.load %arg8[%c1_96, %c0_97, %c0_98] : memref<18x18x4xf32, #tpu.memory_space<vmem>>, vector<16x16x4xf32>
    %91 = vector.shape_cast %90 : vector<16x16x4xf32> to vector<256x4xf32>
    %c3_99 = arith.constant 3 : index
    %c0_100 = arith.constant 0 : index
    %c0_101 = arith.constant 0 : index
    %92 = vector.load %arg4[%c3_99, %c0_100, %c0_101] : memref<9x4x4xf32, #tpu.memory_space<vmem>>, vector<1x4x4xf32>
    %93 = vector.shape_cast %92 : vector<1x4x4xf32> to vector<4x4xf32>
    %cst_102 = arith.constant dense<0.000000e+00> : vector<256x4xf32>
    %94 = tpu.matmul %91, %93, %cst_102 {dimension_numbers = #tpu.dot_dimension_numbers<[1], [0], [0], [1], [0, 0, 1, 1], [], []>} : vector<256x4xf32>, vector<4x4xf32>, vector<256x4xf32> -> vector<256x4xf32>
    %95 = arith.addf %89, %94 : vector<256x4xf32>
    %c1_103 = arith.constant 1 : index
    %c1_104 = arith.constant 1 : index
    %c0_105 = arith.constant 0 : index
    %96 = vector.load %arg8[%c1_103, %c1_104, %c0_105] : memref<18x18x4xf32, #tpu.memory_space<vmem>>, vector<16x16x4xf32>
    %97 = vector.shape_cast %96 : vector<16x16x4xf32> to vector<256x4xf32>
    %c4_106 = arith.constant 4 : index
    %c0_107 = arith.constant 0 : index
    %c0_108 = arith.constant 0 : index
    %98 = vector.load %arg4[%c4_106, %c0_107, %c0_108] : memref<9x4x4xf32, #tpu.memory_space<vmem>>, vector<1x4x4xf32>
    %99 = vector.shape_cast %98 : vector<1x4x4xf32> to vector<4x4xf32>
    %cst_109 = arith.constant dense<0.000000e+00> : vector<256x4xf32>
    %100 = tpu.matmul %97, %99, %cst_109 {dimension_numbers = #tpu.dot_dimension_numbers<[1], [0], [0], [1], [0, 0, 1, 1], [], []>} : vector<256x4xf32>, vector<4x4xf32>, vector<256x4xf32> -> vector<256x4xf32>
    %101 = arith.addf %95, %100 : vector<256x4xf32>
    %c1_110 = arith.constant 1 : index
    %c2_111 = arith.constant 2 : index
    %c0_112 = arith.constant 0 : index
    %102 = vector.load %arg8[%c1_110, %c2_111, %c0_112] : memref<18x18x4xf32, #tpu.memory_space<vmem>>, vector<16x16x4xf32>
    %103 = vector.shape_cast %102 : vector<16x16x4xf32> to vector<256x4xf32>
    %c5_113 = arith.constant 5 : index
    %c0_114 = arith.constant 0 : index
    %c0_115 = arith.constant 0 : index
    %104 = vector.load %arg4[%c5_113, %c0_114, %c0_115] : memref<9x4x4xf32, #tpu.memory_space<vmem>>, vector<1x4x4xf32>
    %105 = vector.shape_cast %104 : vector<1x4x4xf32> to vector<4x4xf32>
    %cst_116 = arith.constant dense<0.000000e+00> : vector<256x4xf32>
    %106 = tpu.matmul %103, %105, %cst_116 {dimension_numbers = #tpu.dot_dimension_numbers<[1], [0], [0], [1], [0, 0, 1, 1], [], []>} : vector<256x4xf32>, vector<4x4xf32>, vector<256x4xf32> -> vector<256x4xf32>
    %107 = arith.addf %101, %106 : vector<256x4xf32>
    %c2_117 = arith.constant 2 : index
    %c0_118 = arith.constant 0 : index
    %c0_119 = arith.constant 0 : index
    %108 = vector.load %arg8[%c2_117, %c0_118, %c0_119] : memref<18x18x4xf32, #tpu.memory_space<vmem>>, vector<16x16x4xf32>
    %109 = vector.shape_cast %108 : vector<16x16x4xf32> to vector<256x4xf32>
    %c6_120 = arith.constant 6 : index
    %c0_121 = arith.constant 0 : index
    %c0_122 = arith.constant 0 : index
    %110 = vector.load %arg4[%c6_120, %c0_121, %c0_122] : memref<9x4x4xf32, #tpu.memory_space<vmem>>, vector<1x4x4xf32>
    %111 = vector.shape_cast %110 : vector<1x4x4xf32> to vector<4x4xf32>
    %cst_123 = arith.constant dense<0.000000e+00> : vector<256x4xf32>
    %112 = tpu.matmul %109, %111, %cst_123 {dimension_numbers = #tpu.dot_dimension_numbers<[1], [0], [0], [1], [0, 0, 1, 1], [], []>} : vector<256x4xf32>, vector<4x4xf32>, vector<256x4xf32> -> vector<256x4xf32>
    %113 = arith.addf %107, %112 : vector<256x4xf32>
    %c2_124 = arith.constant 2 : index
    %c1_125 = arith.constant 1 : index
    %c0_126 = arith.constant 0 : index
    %114 = vector.load %arg8[%c2_124, %c1_125, %c0_126] : memref<18x18x4xf32, #tpu.memory_space<vmem>>, vector<16x16x4xf32>
    %115 = vector.shape_cast %114 : vector<16x16x4xf32> to vector<256x4xf32>
    %c7_127 = arith.constant 7 : index
    %c0_128 = arith.constant 0 : index
    %c0_129 = arith.constant 0 : index
    %116 = vector.load %arg4[%c7_127, %c0_128, %c0_129] : memref<9x4x4xf32, #tpu.memory_space<vmem>>, vector<1x4x4xf32>
    %117 = vector.shape_cast %116 : vector<1x4x4xf32> to vector<4x4xf32>
    %cst_130 = arith.constant dense<0.000000e+00> : vector<256x4xf32>
    %118 = tpu.matmul %115, %117, %cst_130 {dimension_numbers = #tpu.dot_dimension_numbers<[1], [0], [0], [1], [0, 0, 1, 1], [], []>} : vector<256x4xf32>, vector<4x4xf32>, vector<256x4xf32> -> vector<256x4xf32>
    %119 = arith.addf %113, %118 : vector<256x4xf32>
    %c2_131 = arith.constant 2 : index
    %c2_132 = arith.constant 2 : index
    %c0_133 = arith.constant 0 : index
    %120 = vector.load %arg8[%c2_131, %c2_132, %c0_133] : memref<18x18x4xf32, #tpu.memory_space<vmem>>, vector<16x16x4xf32>
    %121 = vector.shape_cast %120 : vector<16x16x4xf32> to vector<256x4xf32>
    %c8_134 = arith.constant 8 : index
    %c0_135 = arith.constant 0 : index
    %c0_136 = arith.constant 0 : index
    %122 = vector.load %arg4[%c8_134, %c0_135, %c0_136] : memref<9x4x4xf32, #tpu.memory_space<vmem>>, vector<1x4x4xf32>
    %123 = vector.shape_cast %122 : vector<1x4x4xf32> to vector<4x4xf32>
    %cst_137 = arith.constant dense<0.000000e+00> : vector<256x4xf32>
    %124 = tpu.matmul %121, %123, %cst_137 {dimension_numbers = #tpu.dot_dimension_numbers<[1], [0], [0], [1], [0, 0, 1, 1], [], []>} : vector<256x4xf32>, vector<4x4xf32>, vector<256x4xf32> -> vector<256x4xf32>
    %125 = arith.addf %119, %124 : vector<256x4xf32>
    %c0_138 = arith.constant 0 : index
    %c0_139 = arith.constant 0 : index
    %126 = vector.load %arg5[%c0_138, %c0_139] : memref<1x4xf32, #tpu.memory_space<vmem>>, vector<1x4xf32>
    %127 = vector.broadcast %126 : vector<1x4xf32> to vector<256x4xf32>
    %128 = arith.addf %125, %127 : vector<256x4xf32>
    %129 = tpu.transpose %128, [1, 0] : vector<256x4xf32> -> vector<4x256xf32>
    %130 = arith.addf %129, %1 : vector<4x256xf32>
    %cst_140 = arith.constant 0.000000e+00 : f32
    %131 = vector.broadcast %cst_140 : f32 to vector<4x256xf32>
    %132 = arith.maximumf %130, %131 : vector<4x256xf32>
    %c0_141 = arith.constant 0 : index
    %c0_142 = arith.constant 0 : index
    %c0_143 = arith.constant 0 : index
    %133 = vector.load %arg6[%c0_141, %c0_142, %c0_143] : memref<1x4x256xf32, #tpu.memory_space<vmem>>, vector<1x4x256xf32>
    %134 = vector.shape_cast %133 : vector<1x4x256xf32> to vector<4x256xf32>
    %135 = vector.shape_cast %132 : vector<4x256xf32> to vector<1x4x256xf32>
    tpu.vector_store %arg6[%c0_141, %c0_142, %c0_143], %135 {strides = array<i32>} : memref<1x4x256xf32, #tpu.memory_space<vmem>>, vector<1x4x256xf32>,
    return
  }
  func.func @transform_0(%arg0: i32) -> (i32, i32, i32) {
    %c0_i32 = arith.constant 0 : i32
    %c0_i32_0 = arith.constant 0 : i32
    %c0_i32_1 = arith.constant 0 : i32
    return %arg0, %c0_i32, %c0_i32_0 : i32, i32, i32
  }
  func.func @transform_1(%arg0: i32) -> (i32, i32, i32) {
    %c0_i32 = arith.constant 0 : i32
    %c0_i32_0 = arith.constant 0 : i32
    %c0_i32_1 = arith.constant 0 : i32
    %c0_i32_2 = arith.constant 0 : i32
    return %c0_i32, %c0_i32_0, %c0_i32_1 : i32, i32, i32
  }
  func.func @transform_2(%arg0: i32) -> (i32, i32) {
    %c0_i32 = arith.constant 0 : i32
    %c0_i32_0 = arith.constant 0 : i32
    %c0_i32_1 = arith.constant 0 : i32
    return %c0_i32, %c0_i32_0 : i32, i32
  }
  func.func @transform_3(%arg0: i32) -> (i32, i32, i32) {
    %c0_i32 = arith.constant 0 : i32
    %c0_i32_0 = arith.constant 0 : i32
    %c0_i32_1 = arith.constant 0 : i32
    %c0_i32_2 = arith.constant 0 : i32
    return %c0_i32, %c0_i32_0, %c0_i32_1 : i32, i32, i32
  }
  func.func @transform_4(%arg0: i32) -> (i32, i32) {
    %c0_i32 = arith.constant 0 : i32
    %c0_i32_0 = arith.constant 0 : i32
    %c0_i32_1 = arith.constant 0 : i32
    return %c0_i32, %c0_i32_0 : i32, i32
  }
  func.func @transform_5(%arg0: i32) -> (i32, i32, i32) {
    %c0_i32 = arith.constant 0 : i32
    %c0_i32_0 = arith.constant 0 : i32
    %c0_i32_1 = arith.constant 0 : i32
    return %arg0, %c0_i32, %c0_i32_0 : i32, i32, i32
  }
}

</mosaic_0001>

<bundles_post_ra>
// kernel: tpu_custom_call.1
= control target key start
LH: loop header
LB: loop body
LE: loop exit
PB: predicated region body
PF: predicated region fallthrough
CT: control target
= control target key end

     0   :  { %10 = vsyncpa [#allocation5], 0  ;;  %s12464_s0 = inlined_call_operand.vmem [shape: f32[2,4,256], index: 0, kind: input, shape index: {}]   ;;  %s12465_s1 = inlined_call_operand.vmem [shape: f32[9,4,4], index: 1, kind: input, shape index: {}]   ;;  %s12466_s2 = inlined_call_operand.vmem [shape: f32[1,4], index: 2, kind: input, shape index: {}]   ;;  %s12467_s3 = inlined_call_operand.vmem [shape: f32[9,4,4], index: 3, kind: input, shape index: {}]   ;;  %s12468_s4 = inlined_call_operand.vmem [shape: f32[1,4], index: 4, kind: input, shape index: {}]   ;;  %s12469_s5 = inlined_call_operand.hbm [shape: f32[2,4,256], index: 5, kind: output, shape index: {}]  }
   0x1   :  { %12 = vsyncpa [#allocation5 + $0x1], 0  ;;  %s10387_s18 = smov 0   ;;  %s10389_s19 = smov 0  }
   0x2   :  { %s10391_s20 = smov 0   ;;  %s10393_s21 = smov 0  }
   0x3 LB: > { %s10408_s22 = sadd.s32 4294967295, %s10353_s21   ;;  %s7617_s23 = sadd.s32 4294967294, %s10353_s21   ;;  %s10353_s21 = sphi %s10393_s21, %s12753_s21   ;;  %s10349_s20 = sphi %s10391_s20, %s12752_s20   ;;  %s10345_s19 = sphi %s10389_s19, %s12751_s19   ;;  %s10341_s18 = sphi %s10387_s18, %s12750_s18  }
   0x4   : > { %s10412_s24 = sadd.s32 1, %s10353_s21   ;;  %s135_s25 = sadd.s32 1, %s10349_s20 }
   0x5   : > { %s132_s26 = ssub.s32 %s10353_s21, %s10412_s24  ;;  %p145_p0 = scmp.ne.s32.totalorder %s10349_s20, %s10345_s19 }
   0x6   : > { %p133_p1 = scmp.eq.s32.totalorder %s132_s26, 0  ;;  %p146_p2 = scmp.eq.s32.totalorder %s10408_s22, 1 }
   0x7   : > { %p151_p3 = scmp.ne.s32.totalorder %s10345_s19, %s10341_s18  ;;  %p152_p4 = scmp.eq.s32.totalorder %s7617_s23, 1 }
   0x8   : > { %s10423_s27 = scalar_select %p133_p1, %s10349_s20, %s135_s25  }
   0x9   : > { %p10425_p5 = por %p146_p2, %p145_p0  ;;  %p10429_p6 = por %p152_p4, %p151_p3 }
   0xa   : > { %p7620_p7 = scmp.ge.s32.totalorder %s10353_s21, 1  ;;  %p190_p8 = scmp.lt.s32.totalorder %s10353_s21, 3 }
   0xc   : > { %p191_p9 = pnand %p7620_p7, %p190_p8 }
   0xe   : > { %194 = sbr.rel (%p191_p9) target bundleno = 1895 (0x767), region = 40 }
  0x15   : > { %p218_p10 = scmp.lt.s32.totalorder %s10408_s22, 1  ;;  %vm291_vm0 = vcmask 31744   ;;  %v10355_v0 = vmov 0.0   ;;  %vm294_vm1 = vcmask 25600   ;;  %v7624_v2 = vld [vmem:[%s12465_s1 + $0x4] sm:$0xf] }
  0x16   : > { %296 = vst.msk [vmem:[#allocation2 + $0x18] sm:$0xff] %vm291_vm0, %v10355_v0  ;;  %297 = vst.msk [vmem:[#allocation2 + $0x20] sm:$0xff] %vm291_vm0, %v10355_v0  ;;  %vm543_vm2 = vcmask 1043456   ;;  %v412_v6 = vld [vmem:[%s12465_s1] sm:$0xf]  ;;  %s215_s26 = sand.u32 1, %s10345_s19  }
  0x17   : > { %292 = vst.msk [vmem:[#allocation2] sm:$0xff] %vm291_vm0, %v10355_v0  ;;  %293 = vst.msk [vmem:[#allocation2 + $0x8] sm:$0xff] %vm291_vm0, %v10355_v0  ;;  %s219_s30 = scalar_select %p218_p10, %s10408_s22, 1  ;;  %8837 = vmatprep.subr.msk.mxu0 %vm543_vm2, %v7624_v2  ;;  %v10679_v7 = vld [vmem:[%s12465_s1 + $0x8] sm:$0xf] }
  0x18   : > { %299 = vst.msk [vmem:[#allocation2 + $0x30] sm:$0xff] %vm291_vm0, %v10355_v0  ;;  %300 = vst.msk [vmem:[#allocation2 + $0x38] sm:$0xff] %vm291_vm0, %v10355_v0  ;;  %8838 = vmatpush3.msk.msra.mxu0 %vm543_vm2, %v7624_v2 }
  0x19   : > { %302 = vst.msk [vmem:[#allocation2 + $0x48] sm:$0xff] %vm291_vm0, %v10355_v0  ;;  %303 = vst.msk [vmem:[#allocation2 + $0x50] sm:$0xff] %vm291_vm0, %v10355_v0  ;;  %s8241_s6 = sshll.u32 %s219_s30, 3  ;;  %8887 = vmatprep.subr.msk.mxu0 %vm543_vm2, %v412_v6  ;;  %s7621_s30 = sshll.u32 %s215_s26, 3 }
  0x1a   : > { %305 = vst.msk [vmem:[#allocation2 + $0x60] sm:$0xff] %vm291_vm0, %v10355_v0  ;;  %306 = vst.msk [vmem:[#allocation2 + $0x68] sm:$0xff] %vm291_vm0, %v10355_v0  ;;  %s10586_s9 = scalar_lea.vmem %s12464_s0, %s8241_s6  ;;  %s8242_s6 = sshll.u32 %s10408_s22, 7 }
  0x1b   : > { %308 = vst.msk [vmem:[#allocation2 + $0x78] sm:$0xff] %vm291_vm0, %v10355_v0  ;;  %309 = vst.msk [vmem:[#allocation2 + $0x80] sm:$0xff] %vm291_vm0, %v10355_v0  ;;  %v223_v1 = vld [vmem:[%s10586_s9] sm:$0xff]  ;;  %s217_s7 = scalar_lea.vmem [#allocation4], %s7621_s30  ;;  %s12422_s12 = scalar_lea.hbm %s12469_s5, %s8242_s6 }
  0x1c   : > { %311 = vst.msk [vmem:[#allocation2 + $0x90] sm:$0xff] %vm291_vm0, %v10355_v0  ;;  %312 = vst.msk [vmem:[#allocation2 + $0x98] sm:$0xff] %vm291_vm0, %v10355_v0  ;;  %227 = vxpose.xlu0.b32.start.end [1/1] (short) %v223_v1, 128  ;;  %v10668_v5 = vcombine.high %v223_v1, %v223_v1  ;;  %s7558_s8 = sshll.u32 %s217_s7, 4  ;;  %s10356_s22 = smov [#allocation4]   ;;  %s12424_s8 = int_to_ptr.vmem [resolvable:$true] %s7558_s8 }
  0x1d   : > { %314 = vst.msk [vmem:[#allocation2 + $0xa8] sm:$0xff] %vm291_vm0, %v10355_v0  ;;  %315 = vst.msk [vmem:[#allocation2 + $0xb0] sm:$0xff] %vm291_vm0, %v10355_v0  ;;  %s10291_s13 = scalar_lea.vmem %s12424_s8, 128  ;;  %s10295_s14 = sshll.u32 %s10356_s22, 4  ;;  %s10296_s14 = int_to_ptr.vmem [resolvable:$false] %s10295_s14 }
  0x1e   : > { %317 = vst.msk [vmem:[#allocation2 + $0xc0] sm:$0xff] %vm291_vm0, %v10355_v0  ;;  %318 = vst.msk [vmem:[#allocation2 + $0xc8] sm:$0xff] %vm291_vm0, %v10355_v0  ;;  %v413_v3 = vld [vmem:[#allocation2 + $0x1] sm:$0xff]  ;;  %p10292_p11 = scmp.ne.s32.totalorder %s12424_s8, %s10291_s13  ;;  %s10297_s15 = scalar_lea.vmem %s10296_s14, 256 }
  0x1f   : > { %320 = vst.msk [vmem:[#allocation2 + $0xd8] sm:$0xff] %vm291_vm0, %v10355_v0  ;;  %321 = vst.msk [vmem:[#allocation2 + $0xe0] sm:$0xff] %vm291_vm0, %v10355_v0  ;;  %8839 = vmatprep.mubr.msk.f32.mxu0 %vm291_vm0, %v413_v3  ;;  %v380_v3 = vld [vmem:[#allocation2] sm:$0xff]  ;;  %p10298_p0 = scmp.lt.s32.totalorder %s12424_s8, %s10296_s14  ;;  %p10299_p1 = scmp.lt.s32.totalorder %s10297_s15, %s10291_s13 }
  0x20   : > { %323 = vst.msk [vmem:[#allocation2 + $0xf0] sm:$0xff] %vm291_vm0, %v10355_v0  ;;  %324 = vst.msk [vmem:[#allocation2 + $0xf8] sm:$0xff] %vm291_vm0, %v10355_v0  ;;  %p10293_p12 = pnand %p10292_p11, %p10425_p5 }
  0x21   : > { %326 = vst.msk [vmem:[#allocation2 + $0x108] sm:$0xff] %vm291_vm0, %v10355_v0  ;;  %327 = vst.msk [vmem:[#allocation2 + $0x110] sm:$0xff] %vm291_vm0, %v10355_v0  ;;  %p10300_p2 = por %p10299_p1, %p10298_p0 }
  0x22   : > { %329 = vst.msk [vmem:[#allocation2 + $0x120] sm:$0xff] %vm291_vm0, %v10355_v0  ;;  %330 = vst.msk [vmem:[#allocation2 + $0x128] sm:$0xff] %vm291_vm0, %v10355_v0  ;;  %p10294_p13 = pneg %p10293_p12 }
  0x23   : > { %332 = vst.msk [vmem:[#allocation2 + $0x138] sm:$0xff] %vm291_vm0, %v10355_v0  ;;  %333 = vst.msk [vmem:[#allocation2 + $0x140] sm:$0xff] %vm291_vm0, %v10355_v0 }
  0x24   : > { %335 = vst.msk [vmem:[#allocation2 + $0x150] sm:$0xff] %vm291_vm0, %v10355_v0  ;;  %336 = vst.msk [vmem:[#allocation2 + $0x158] sm:$0xff] %vm291_vm0, %v10355_v0  ;;  %p10301_p3 = pnand %p10300_p2, %p10294_p13 }
  0x25   : > { %338 = vst.msk [vmem:[#allocation2 + $0x168] sm:$0xff] %vm291_vm0, %v10355_v0  ;;  %339 = vst.msk [vmem:[#allocation2 + $0x170] sm:$0xff] %vm291_vm0, %v10355_v0 }
  0x26   : > { %341 = vst.msk [vmem:[#allocation2 + $0x180] sm:$0xff] %vm291_vm0, %v10355_v0  ;;  %342 = vst.msk [vmem:[#allocation2 + $0x188] sm:$0xff] %vm291_vm0, %v10355_v0 }
  0x27   : > { %344 = vst.msk [vmem:[#allocation2 + $0x198] sm:$0xff] %vm291_vm0, %v10355_v0  ;;  %345 = vst.msk [vmem:[#allocation2 + $0x1a0] sm:$0xff] %vm291_vm0, %v10355_v0 }
  0x28   : > { %3898 = vst.msk [vmem:[#allocation3] sm:$0xff] %vm291_vm0, %v10355_v0  ;;  %3899 = vst.msk [vmem:[#allocation3 + $0x8] sm:$0xff] %vm291_vm0, %v10355_v0 }
  0x29   : > { %3901 = vst.msk [vmem:[#allocation3 + $0x18] sm:$0xff] %vm291_vm0, %v10355_v0  ;;  %3902 = vst.msk [vmem:[#allocation3 + $0x20] sm:$0xff] %vm291_vm0, %v10355_v0 }
  0x2a   : > { %3904 = vst.msk [vmem:[#allocation3 + $0x30] sm:$0xff] %vm291_vm0, %v10355_v0  ;;  %3905 = vst.msk [vmem:[#allocation3 + $0x38] sm:$0xff] %vm291_vm0, %v10355_v0 }
  0x2b   : > { %3907 = vst.msk [vmem:[#allocation3 + $0x48] sm:$0xff] %vm291_vm0, %v10355_v0  ;;  %3908 = vst.msk [vmem:[#allocation3 + $0x50] sm:$0xff] %vm291_vm0, %v10355_v0 }
  0x2c   : > { %3910 = vst.msk [vmem:[#allocation3 + $0x60] sm:$0xff] %vm291_vm0, %v10355_v0  ;;  %3911 = vst.msk [vmem:[#allocation3 + $0x68] sm:$0xff] %vm291_vm0, %v10355_v0 }
  0x2d   : > { %3913 = vst.msk [vmem:[#allocation3 + $0x78] sm:$0xff] %vm291_vm0, %v10355_v0  ;;  %3914 = vst.msk [vmem:[#allocation3 + $0x80] sm:$0xff] %vm291_vm0, %v10355_v0 }
  0x2e   : > { %3916 = vst.msk [vmem:[#allocation3 + $0x90] sm:$0xff] %vm291_vm0, %v10355_v0  ;;  %3917 = vst.msk [vmem:[#allocation3 + $0x98] sm:$0xff] %vm291_vm0, %v10355_v0 }
  0x2f   : > { %3919 = vst.msk [vmem:[#allocation3 + $0xa8] sm:$0xff] %vm291_vm0, %v10355_v0  ;;  %3920 = vst.msk [vmem:[#allocation3 + $0xb0] sm:$0xff] %vm291_vm0, %v10355_v0 }
  0x30   : > { %3922 = vst.msk [vmem:[#allocation3 + $0xc0] sm:$0xff] %vm291_vm0, %v10355_v0  ;;  %3923 = vst.msk [vmem:[#allocation3 + $0xc8] sm:$0xff] %vm291_vm0, %v10355_v0 }
  0x31   : > { %3925 = vst.msk [vmem:[#allocation3 + $0xd8] sm:$0xff] %vm291_vm0, %v10355_v0  ;;  %3926 = vst.msk [vmem:[#allocation3 + $0xe0] sm:$0xff] %vm291_vm0, %v10355_v0 }
  0x32   : > { %3928 = vst.msk [vmem:[#allocation3 + $0xf0] sm:$0xff] %vm291_vm0, %v10355_v0  ;;  %3929 = vst.msk [vmem:[#allocation3 + $0xf8] sm:$0xff] %vm291_vm0, %v10355_v0 }
  0x33   : > { %3931 = vst.msk [vmem:[#allocation3 + $0x108] sm:$0xff] %vm291_vm0, %v10355_v0  ;;  %3932 = vst.msk [vmem:[#allocation3 + $0x110] sm:$0xff] %vm291_vm0, %v10355_v0 }
  0x34   : > { %3934 = vst.msk [vmem:[#allocation3 + $0x120] sm:$0xff] %vm291_vm0, %v10355_v0  ;;  %3935 = vst.msk [vmem:[#allocation3 + $0x128] sm:$0xff] %vm291_vm0, %v10355_v0 }
  0x35   : > { %3937 = vst.msk [vmem:[#allocation3 + $0x138] sm:$0xff] %vm291_vm0, %v10355_v0  ;;  %3938 = vst.msk [vmem:[#allocation3 + $0x140] sm:$0xff] %vm291_vm0, %v10355_v0 }
  0x36   : > { %3940 = vst.msk [vmem:[#allocation3 + $0x150] sm:$0xff] %vm291_vm0, %v10355_v0  ;;  %3941 = vst.msk [vmem:[#allocation3 + $0x158] sm:$0xff] %vm291_vm0, %v10355_v0 }
  0x37   : > { %3943 = vst.msk [vmem:[#allocation3 + $0x168] sm:$0xff] %vm291_vm0, %v10355_v0  ;;  %3944 = vst.msk [vmem:[#allocation3 + $0x170] sm:$0xff] %vm291_vm0, %v10355_v0 }
  0x38   : > { %3946 = vst.msk [vmem:[#allocation3 + $0x180] sm:$0xff] %vm291_vm0, %v10355_v0  ;;  %3947 = vst.msk [vmem:[#allocation3 + $0x188] sm:$0xff] %vm291_vm0, %v10355_v0 }
  0x39   : > { %3949 = vst.msk [vmem:[#allocation3 + $0x198] sm:$0xff] %vm291_vm0, %v10355_v0  ;;  %3950 = vst.msk [vmem:[#allocation3 + $0x1a0] sm:$0xff] %vm291_vm0, %v10355_v0 }
  0x3a   : > { %298 = vst.msk [vmem:[#allocation2 + $0x28] sm:$0x3] %vm294_vm1, %v10355_v0  ;;  %295 = vst.msk [vmem:[#allocation2 + $0x10] sm:$0x3] %vm294_vm1, %v10355_v0 }
  0x3b   : > { %301 = vst.msk [vmem:[#allocation2 + $0x40] sm:$0x3] %vm294_vm1, %v10355_v0  ;;  %304 = vst.msk [vmem:[#allocation2 + $0x58] sm:$0x3] %vm294_vm1, %v10355_v0 }
  0x3c   : > { %307 = vst.msk [vmem:[#allocation2 + $0x70] sm:$0x3] %vm294_vm1, %v10355_v0  ;;  %310 = vst.msk [vmem:[#allocation2 + $0x88] sm:$0x3] %vm294_vm1, %v10355_v0 }
  0x3d   : > { %313 = vst.msk [vmem:[#allocation2 + $0xa0] sm:$0x3] %vm294_vm1, %v10355_v0  ;;  %316 = vst.msk [vmem:[#allocation2 + $0xb8] sm:$0x3] %vm294_vm1, %v10355_v0 }
  0x3e   : > { %319 = vst.msk [vmem:[#allocation2 + $0xd0] sm:$0x3] %vm294_vm1, %v10355_v0  ;;  %322 = vst.msk [vmem:[#allocation2 + $0xe8] sm:$0x3] %vm294_vm1, %v10355_v0 }
  0x3f   : > { %325 = vst.msk [vmem:[#allocation2 + $0x100] sm:$0x3] %vm294_vm1, %v10355_v0  ;;  %328 = vst.msk [vmem:[#allocation2 + $0x118] sm:$0x3] %vm294_vm1, %v10355_v0 }
  0x40   : > { %331 = vst.msk [vmem:[#allocation2 + $0x130] sm:$0x3] %vm294_vm1, %v10355_v0  ;;  %334 = vst.msk [vmem:[#allocation2 + $0x148] sm:$0x3] %vm294_vm1, %v10355_v0 }
  0x41   : > { %337 = vst.msk [vmem:[#allocation2 + $0x160] sm:$0x3] %vm294_vm1, %v10355_v0  ;;  %340 = vst.msk [vmem:[#allocation2 + $0x178] sm:$0x3] %vm294_vm1, %v10355_v0  ;;  %v414_v4 = vld [vmem:[#allocation2 + $0x9] sm:$0xff] }
  0x42   : > { %343 = vst.msk [vmem:[#allocation2 + $0x190] sm:$0x3] %vm294_vm1, %v10355_v0  ;;  %346 = vst.msk [vmem:[#allocation2 + $0x1a8] sm:$0x3] %vm294_vm1, %v10355_v0  ;;  %8840 = vmatmul.mubr.msk.f32.vlgmr.msra.gmra.mrb[0].mxu0 %vm291_vm0, %v414_v4 }
  0x43   : > { %3900 = vst.msk [vmem:[#allocation3 + $0x10] sm:$0x3] %vm294_vm1, %v10355_v0  ;;  %3903 = vst.msk [vmem:[#allocation3 + $0x28] sm:$0x3] %vm294_vm1, %v10355_v0  ;;  %8888 = vmatpush3.msk.msra.mxu0 %vm543_vm2, %v412_v6  ;;  %v381_v6 = vld [vmem:[#allocation2 + $0x8] sm:$0xff] }
  0x44   : > { %3906 = vst.msk [vmem:[#allocation3 + $0x40] sm:$0x3] %vm294_vm1, %v10355_v0  ;;  %3909 = vst.msk [vmem:[#allocation3 + $0x58] sm:$0x3] %vm294_vm1, %v10355_v0  ;;  %8937 = vmatprep.subr.msk.mxu0 %vm543_vm2, %v10679_v7 }
  0x45   : > { %3912 = vst.msk [vmem:[#allocation3 + $0x70] sm:$0x3] %vm294_vm1, %v10355_v0  ;;  %3915 = vst.msk [vmem:[#allocation3 + $0x88] sm:$0x3] %vm294_vm1, %v10355_v0 }
  0x46   : > { %3918 = vst.msk [vmem:[#allocation3 + $0xa0] sm:$0x3] %vm294_vm1, %v10355_v0  ;;  %3921 = vst.msk [vmem:[#allocation3 + $0xb8] sm:$0x3] %vm294_vm1, %v10355_v0 }
  0x47   : > { %3924 = vst.msk [vmem:[#allocation3 + $0xd0] sm:$0x3] %vm294_vm1, %v10355_v0  ;;  %3927 = vst.msk [vmem:[#allocation3 + $0xe8] sm:$0x3] %vm294_vm1, %v10355_v0 }
  0x48   : > { %3930 = vst.msk [vmem:[#allocation3 + $0x100] sm:$0x3] %vm294_vm1, %v10355_v0  ;;  %3933 = vst.msk [vmem:[#allocation3 + $0x118] sm:$0x3] %vm294_vm1, %v10355_v0 }
  0x49   : > { %3936 = vst.msk [vmem:[#allocation3 + $0x130] sm:$0x3] %vm294_vm1, %v10355_v0  ;;  %3939 = vst.msk [vmem:[#allocation3 + $0x148] sm:$0x3] %vm294_vm1, %v10355_v0 }
  0x4a   : > { %3942 = vst.msk [vmem:[#allocation3 + $0x160] sm:$0x3] %vm294_vm1, %v10355_v0  ;;  %3945 = vst.msk [vmem:[#allocation3 + $0x178] sm:$0x3] %vm294_vm1, %v10355_v0 }
  0x4b   : > { %3948 = vst.msk [vmem:[#allocation3 + $0x190] sm:$0x3] %vm294_vm1, %v10355_v0  ;;  %3951 = vst.msk [vmem:[#allocation3 + $0x1a8] sm:$0x3] %vm294_vm1, %v10355_v0 }
  0x4c   : > { %12587 = vst [vmem:[#allocation7_spill] sm:$0xff] %v10668_v5 }
  0x59   : > { %259 = vxpose.xlu0.b32.start.end [1/1] (short) %v10668_v5, 128  ;;  %v10970_v5 = vld [vmem:[%s12465_s1 + $0x10] sm:$0xf] }
  0x9c   : > { %v243_v8 = vpop.trf.xlu0 }
  0x9d   : > { %348 = vst.msk [vmem:[#allocation2 + $0x19] sm:$0xff] %vm291_vm0, %v243_v8  ;;  %v10837_v8 = vld [vmem:[%s12465_s1 + $0xc] sm:$0xf] }
  0xa0   : > { %v244_v9 = vpop.trf.xlu0 }
  0xa1   : > { %349 = vst.msk [vmem:[#allocation2 + $0x21] sm:$0xff] %vm291_vm0, %v244_v9 }
  0xa4   : > { %v245_v10 = vpop.trf.xlu0  ;;  %v10685_v11 = vld [vmem:[#allocation2 + $0x19] sm:$0xff] }
  0xa5   : > { %350 = vst.msk [vmem:[#allocation2 + $0x31] sm:$0xff] %vm291_vm0, %v245_v10  ;;  %8842 = vmatprep.mubr.msk.f32.mxu0 %vm291_vm0, %v10685_v11  ;;  %v10840_v9 = vld [vmem:[#allocation2 + $0x18] sm:$0xff] }
  0xa8   : > { %v246_v12 = vpop.trf.xlu0  ;;  %v10690_v13 = vld [vmem:[#allocation2 + $0x21] sm:$0xff] }
  0xa9   : > { %351 = vst.msk [vmem:[#allocation2 + $0x39] sm:$0xff] %vm291_vm0, %v246_v12  ;;  %8843 = vmatmul.mubr.msk.f32.gmra.mrb[2].mxu0 %vm291_vm0, %v10690_v13  ;;  %v10848_v10 = vld [vmem:[#allocation2 + $0x20] sm:$0xff] }
  0xac   : > { %v247_v14 = vpop.trf.xlu0  ;;  %v10695_v15 = vld [vmem:[#allocation2 + $0x31] sm:$0xff] }
  0xad   : > { %352 = vst.msk [vmem:[#allocation2 + $0x49] sm:$0xff] %vm291_vm0, %v247_v14  ;;  %8845 = vmatprep.mubr.msk.f32.mxu0 %vm291_vm0, %v10695_v15  ;;  %v10852_v12 = vld [vmem:[#allocation2 + $0x30] sm:$0xff] }
  0xb0   : > { %v248_v16 = vpop.trf.xlu0  ;;  %v10700_v17 = vld [vmem:[#allocation2 + $0x39] sm:$0xff] }
  0xb1   : > { %353 = vst.msk [vmem:[#allocation2 + $0x51] sm:$0xff] %vm291_vm0, %v248_v16  ;;  %8846 = vmatmul.mubr.msk.f32.gmra.mrb[4].mxu0 %vm291_vm0, %v10700_v17  ;;  %v10856_v14 = vld [vmem:[#allocation2 + $0x38] sm:$0xff] }
  0xb4   : > { %v249_v18 = vpop.trf.xlu0  ;;  %v10705_v19 = vld [vmem:[#allocation2 + $0x49] sm:$0xff] }
  0xb5   : > { %354 = vst.msk [vmem:[#allocation2 + $0x61] sm:$0xff] %vm291_vm0, %v249_v18  ;;  %8848 = vmatprep.mubr.msk.f32.mxu0 %vm291_vm0, %v10705_v19 }
  0xb8   : > { %v250_v20 = vpop.trf.xlu0  ;;  %v10710_v21 = vld [vmem:[#allocation2 + $0x51] sm:$0xff] }
  0xb9   : > { %355 = vst.msk [vmem:[#allocation2 + $0x69] sm:$0xff] %vm291_vm0, %v250_v20  ;;  %8849 = vmatmul.mubr.msk.f32.gmra.mrb[6].mxu0 %vm291_vm0, %v10710_v21  ;;  %v10864_v16 = vld [vmem:[#allocation2 + $0x50] sm:$0xff] }
  0xbc   : > { %v251_v22 = vpop.trf.xlu0  ;;  %v10715_v23 = vld [vmem:[#allocation2 + $0x61] sm:$0xff] }
  0xbd   : > { %356 = vst.msk [vmem:[#allocation2 + $0x79] sm:$0xff] %vm291_vm0, %v251_v22  ;;  %8851 = vmatprep.mubr.msk.f32.mxu0 %vm291_vm0, %v10715_v23  ;;  %v10868_v18 = vld [vmem:[#allocation2 + $0x60] sm:$0xff] }
  0xc0   : > { %v252_v24 = vpop.trf.xlu0  ;;  %v10720_v25 = vld [vmem:[#allocation2 + $0x69] sm:$0xff] }
  0xc1   : > { %357 = vst.msk [vmem:[#allocation2 + $0x81] sm:$0xff] %vm291_vm0, %v252_v24  ;;  %8852 = vmatmul.mubr.msk.f32.gmra.mrb[8].mxu0 %vm291_vm0, %v10720_v25  ;;  %v10872_v20 = vld [vmem:[#allocation2 + $0x68] sm:$0xff] }
  0xc4   : > { %v253_v26 = vpop.trf.xlu0  ;;  %v10725_v27 = vld [vmem:[#allocation2 + $0x79] sm:$0xff] }
  0xc5   : > { %358 = vst.msk [vmem:[#allocation2 + $0x91] sm:$0xff] %vm291_vm0, %v253_v26  ;;  %8854 = vmatprep.mubr.msk.f32.mxu0 %vm291_vm0, %v10725_v27  ;;  %v10876_v22 = vld [vmem:[#allocation2 + $0x78] sm:$0xff] }
  0xc8   : > { %v254_v28 = vpop.trf.xlu0  ;;  %v10730_v29 = vld [vmem:[#allocation2 + $0x81] sm:$0xff] }
  0xc9   : > { %359 = vst.msk [vmem:[#allocation2 + $0x99] sm:$0xff] %vm291_vm0, %v254_v28  ;;  %8855 = vmatmul.mubr.msk.f32.gmra.mrb[10].mxu0 %vm291_vm0, %v10730_v29  ;;  %v10880_v24 = vld [vmem:[#allocation2 + $0x80] sm:$0xff] }
  0xcc   : > { %v255_v30 = vpop.trf.xlu0  ;;  %v10735_v31 = vld [vmem:[#allocation2 + $0x91] sm:$0xff] }
  0xcd   : > { %360 = vst.msk [vmem:[#allocation2 + $0xa9] sm:$0xff] %vm291_vm0, %v255_v30  ;;  %8857 = vmatprep.mubr.msk.f32.mxu0 %vm291_vm0, %v10735_v31  ;;  %v10884_v26 = vld [vmem:[#allocation2 + $0x90] sm:$0xff] }
  0xd0   : > { %v256_v32 = vpop.trf.xlu0  ;;  %v10740_v33 = vld [vmem:[#allocation2 + $0x99] sm:$0xff] }
  0xd1   : > { %361 = vst.msk [vmem:[#allocation2 + $0xb1] sm:$0xff] %vm291_vm0, %v256_v32  ;;  %8858 = vmatmul.mubr.msk.f32.gmra.mrb[12].mxu0 %vm291_vm0, %v10740_v33  ;;  %v10888_v28 = vld [vmem:[#allocation2 + $0x98] sm:$0xff] }
  0xd4   : > { %v257_v34 = vpop.trf.xlu0  ;;  %v10745_v35 = vld [vmem:[#allocation2 + $0xa9] sm:$0xff] }
  0xd5   : > { %362 = vst.msk [vmem:[#allocation2 + $0xc1] sm:$0xff] %vm291_vm0, %v257_v34  ;;  %8860 = vmatprep.mubr.msk.f32.mxu0 %vm291_vm0, %v10745_v35  ;;  %v10892_v30 = vld [vmem:[#allocation2 + $0xa8] sm:$0xff] }
  0xd8   : > { %v258_v36 = vpop.trf.xlu0  ;;  %v10750_v37 = vld [vmem:[#allocation2 + $0xb1] sm:$0xff] }
  0xd9   : > { %363 = vst.msk [vmem:[#allocation2 + $0xc9] sm:$0xff] %vm291_vm0, %v258_v36  ;;  %8861 = vmatmul.mubr.msk.f32.gmra.mrb[14].mxu0 %vm291_vm0, %v10750_v37  ;;  %v10896_v32 = vld [vmem:[#allocation2 + $0xb0] sm:$0xff] }
  0xdc   : > { %v275_v38 = vpop.trf.xlu0  ;;  %v10755_v39 = vld [vmem:[#allocation2 + $0xc1] sm:$0xff] }
  0xdd   : > { %364 = vst.msk [vmem:[#allocation2 + $0xd9] sm:$0xff] %vm291_vm0, %v275_v38  ;;  %8863 = vmatprep.mubr.msk.f32.mxu0 %vm291_vm0, %v10755_v39  ;;  %v10900_v34 = vld [vmem:[#allocation2 + $0xc0] sm:$0xff] }
  0xe0   : > { %v276_v40 = vpop.trf.xlu0  ;;  %v10760_v41 = vld [vmem:[#allocation2 + $0xc9] sm:$0xff] }
  0xe1   : > { %365 = vst.msk [vmem:[#allocation2 + $0xe1] sm:$0xff] %vm291_vm0, %v276_v40  ;;  %8864 = vmatmul.mubr.msk.f32.gmra.mrb[16].mxu0 %vm291_vm0, %v10760_v41  ;;  %v10904_v36 = vld [vmem:[#allocation2 + $0xc8] sm:$0xff] }
  0xe4   : > { %v277_v42 = vpop.trf.xlu0  ;;  %v10765_v43 = vld [vmem:[#allocation2 + $0xd9] sm:$0xff] }
  0xe5   : > { %366 = vst.msk [vmem:[#allocation2 + $0xf1] sm:$0xff] %vm291_vm0, %v277_v42  ;;  %8866 = vmatprep.mubr.msk.f32.mxu0 %vm291_vm0, %v10765_v43  ;;  %v10908_v38 = vld [vmem:[#allocation2 + $0xd8] sm:$0xff] }
  0xe8   : > { %v278_v44 = vpop.trf.xlu0  ;;  %v10770_v45 = vld [vmem:[#allocation2 + $0xe1] sm:$0xff] }
  0xe9   : > { %367 = vst.msk [vmem:[#allocation2 + $0xf9] sm:$0xff] %vm291_vm0, %v278_v44  ;;  %8867 = vmatmul.mubr.msk.f32.gmra.mrb[18].mxu0 %vm291_vm0, %v10770_v45  ;;  %v10912_v40 = vld [vmem:[#allocation2 + $0xe0] sm:$0xff] }
  0xec   : > { %v279_v46 = vpop.trf.xlu0  ;;  %v10775_v47 = vld [vmem:[#allocation2 + $0xf1] sm:$0xff] }
  0xed   : > { %368 = vst.msk [vmem:[#allocation2 + $0x109] sm:$0xff] %vm291_vm0, %v279_v46  ;;  %8869 = vmatprep.mubr.msk.f32.mxu0 %vm291_vm0, %v10775_v47  ;;  %v10916_v42 = vld [vmem:[#allocation2 + $0xf0] sm:$0xff] }
  0xf0   : > { %v280_v48 = vpop.trf.xlu0  ;;  %v10780_v49 = vld [vmem:[#allocation2 + $0xf9] sm:$0xff] }
  0xf1   : > { %369 = vst.msk [vmem:[#allocation2 + $0x111] sm:$0xff] %vm291_vm0, %v280_v48  ;;  %8870 = vmatmul.mubr.msk.f32.gmra.mrb[20].mxu0 %vm291_vm0, %v10780_v49  ;;  %v10920_v44 = vld [vmem:[#allocation2 + $0xf8] sm:$0xff] }
  0xf4   : > { %v281_v50 = vpop.trf.xlu0  ;;  %v10785_v51 = vld [vmem:[#allocation2 + $0x109] sm:$0xff] }
  0xf5   : > { %370 = vst.msk [vmem:[#allocation2 + $0x121] sm:$0xff] %vm291_vm0, %v281_v50  ;;  %8872 = vmatprep.mubr.msk.f32.mxu0 %vm291_vm0, %v10785_v51  ;;  %v10924_v46 = vld [vmem:[#allocation2 + $0x108] sm:$0xff] }
  0xf8   : > { %v282_v52 = vpop.trf.xlu0  ;;  %v10790_v53 = vld [vmem:[#allocation2 + $0x111] sm:$0xff] }
  0xf9   : > { %371 = vst.msk [vmem:[#allocation2 + $0x129] sm:$0xff] %vm291_vm0, %v282_v52  ;;  %8873 = vmatmul.mubr.msk.f32.gmra.mrb[22].mxu0 %vm291_vm0, %v10790_v53  ;;  %v10929_v50 = vld [vmem:[#allocation2 + $0x110] sm:$0xff] }
  0xfc   : > { %v283_v54 = vpop.trf.xlu0  ;;  %v10795_v55 = vld [vmem:[#allocation2 + $0x121] sm:$0xff] }
  0xfd   : > { %372 = vst.msk [vmem:[#allocation2 + $0x139] sm:$0xff] %vm291_vm0, %v283_v54  ;;  %8875 = vmatprep.mubr.msk.f32.mxu0 %vm291_vm0, %v10795_v55  ;;  %v10933_v52 = vld [vmem:[#allocation2 + $0x120] sm:$0xff] }
 0x100   : > { %v284_v56 = vpop.trf.xlu0  ;;  %v10800_v57 = vld [vmem:[#allocation2 + $0x129] sm:$0xff] }
 0x101   : > { %373 = vst.msk [vmem:[#allocation2 + $0x141] sm:$0xff] %vm291_vm0, %v284_v56  ;;  %8876 = vmatmul.mubr.msk.f32.gmra.mrb[24].mxu0 %vm291_vm0, %v10800_v57  ;;  %v10938_v56 = vld [vmem:[#allocation2 + $0x128] sm:$0xff] }
 0x104   : > { %v285_v58 = vpop.trf.xlu0  ;;  %v10805_v59 = vld [vmem:[#allocation2 + $0x139] sm:$0xff] }
 0x105   : > { %374 = vst.msk [vmem:[#allocation2 + $0x151] sm:$0xff] %vm291_vm0, %v285_v58  ;;  %8878 = vmatprep.mubr.msk.f32.mxu0 %vm291_vm0, %v10805_v59  ;;  %v10942_v58 = vld [vmem:[#allocation2 + $0x138] sm:$0xff] }
 0x108   : > { %v286_v60 = vpop.trf.xlu0  ;;  %v10810_v61 = vld [vmem:[#allocation2 + $0x141] sm:$0xff] }
 0x109   : > { %375 = vst.msk [vmem:[#allocation2 + $0x159] sm:$0xff] %vm291_vm0, %v286_v60  ;;  %8879 = vmatmul.mubr.msk.f32.gmra.mrb[26].mxu0 %vm291_vm0, %v10810_v61  ;;  %v10946_v60 = vld [vmem:[#allocation2 + $0x140] sm:$0xff] }
 0x10c   : > { %v287_v62 = vpop.trf.xlu0  ;;  %v10815_v63 = vld [vmem:[#allocation2 + $0x151] sm:$0xff] }
 0x10d   : > { %12588 = vst [vmem:[#allocation8_spill] sm:$0xff] %v10815_v63  ;;  %376 = vst.msk [vmem:[#allocation2 + $0x169] sm:$0xff] %vm291_vm0, %v287_v62  ;;  %8881 = vmatprep.mubr.msk.f32.mxu0 %vm291_vm0, %v10815_v63  ;;  %v10950_v62 = vld [vmem:[#allocation2 + $0x150] sm:$0xff] }
 0x110   : > { %v288_v0 = vpop.trf.xlu0  ;;  %v10820_v1 = vld [vmem:[#allocation2 + $0x159] sm:$0xff] }
 0x111   : > { %12589 = vst [vmem:[#allocation9_spill] sm:$0xff] %v10820_v1  ;;  %377 = vst.msk [vmem:[#allocation2 + $0x171] sm:$0xff] %vm291_vm0, %v288_v0  ;;  %8882 = vmatmul.mubr.msk.f32.gmra.mrb[28].mxu0 %vm291_vm0, %v10820_v1  ;;  %v10954_v0 = vld [vmem:[#allocation2 + $0x158] sm:$0xff] }
 0x114   : > { %v10825_v2 = vld [vmem:[#allocation2 + $0x169] sm:$0xff]  ;;  %v289_v48 = vpop.trf.xlu0 }
 0x115   : > { %12590 = vst [vmem:[#allocation10_spill] sm:$0xff] %v10825_v2  ;;  %8884 = vmatprep.mubr.msk.f32.mxu0 %vm291_vm0, %v10825_v2  ;;  %378 = vst.msk [vmem:[#allocation2 + $0x181] sm:$0xff] %vm291_vm0, %v289_v48  ;;  %v10985_v2 = vld [vmem:[#allocation2 + $0x32] sm:$0xff] }
 0x116   : > { %12594 = vst [vmem:[#allocation14_spill] sm:$0xff] %v10985_v2 }
 0x118   : > { %v10829_v4 = vld [vmem:[#allocation2 + $0x171] sm:$0xff]  ;;  %v290_v54 = vpop.trf.xlu0 }
 0x119   : > { %12591 = vst [vmem:[#allocation11_spill] sm:$0xff] %v10829_v4  ;;  %8885 = vmatmul.mubr.msk.f32.gmra.mrb[30].mxu0 %vm291_vm0, %v10829_v4  ;;  %379 = vst.msk [vmem:[#allocation2 + $0x189] sm:$0xff] %vm291_vm0, %v290_v54  ;;  %v10962_v48 = vld [vmem:[#allocation2 + $0x170] sm:$0xff]  ;;  %v10973_v4 = vld [vmem:[#allocation2 + $0x1a] sm:$0xff] }
 0x11a   : > { %8889 = vmatprep.mubr.msk.f32.mxu0 %vm291_vm0, %v380_v3  ;;  %v10958_v3 = vld [vmem:[#allocation2 + $0x168] sm:$0xff]  ;;  %12592 = vst [vmem:[#allocation12_spill] sm:$0xff] %v10973_v4 }
 0x11b   : > { %v1097_v54 = vld [vmem:[#allocation2 + $0xa] sm:$0xff] }
 0x11d   : > { %8890 = vmatmul.mubr.msk.f32.vlgmr.msra.gmra.mrb[0].mxu0 %vm291_vm0, %v381_v6  ;;  %v1096_v6 = vld [vmem:[#allocation2 + $0x2] sm:$0xff] }
 0x11e   : > { %8938 = vmatpush3.msk.msra.mxu0 %vm543_vm2, %v10679_v7  ;;  %8892 = vmatprep.mubr.msk.f32.mxu0 %vm291_vm0, %v10840_v9  ;;  %v10860_v7 = vld [vmem:[#allocation2 + $0x48] sm:$0xff] }
 0x11f   : > { %8987 = vmatprep.subr.msk.mxu0 %vm543_vm2, %v10837_v8 }
 0x121   : > { %8893 = vmatmul.mubr.msk.f32.gmra.mrb[2].mxu0 %vm291_vm0, %v10848_v10 }
 0x122   : > { %8895 = vmatprep.mubr.msk.f32.mxu0 %vm291_vm0, %v10852_v12 }
 0x125   : > { %8896 = vmatmul.mubr.msk.f32.gmra.mrb[4].mxu0 %vm291_vm0, %v10856_v14 }
 0x126   : > { %8898 = vmatprep.mubr.msk.f32.mxu0 %vm291_vm0, %v10860_v7 }
 0x129   : > { %8899 = vmatmul.mubr.msk.f32.gmra.mrb[6].mxu0 %vm291_vm0, %v10864_v16 }
 0x12a   : > { %8901 = vmatprep.mubr.msk.f32.mxu0 %vm291_vm0, %v10868_v18 }
 0x12d   : > { %8902 = vmatmul.mubr.msk.f32.gmra.mrb[8].mxu0 %vm291_vm0, %v10872_v20 }
 0x12e   : > { %8904 = vmatprep.mubr.msk.f32.mxu0 %vm291_vm0, %v10876_v22 }
 0x131   : > { %8905 = vmatmul.mubr.msk.f32.gmra.mrb[10].mxu0 %vm291_vm0, %v10880_v24 }
 0x132   : > { %8907 = vmatprep.mubr.msk.f32.mxu0 %vm291_vm0, %v10884_v26 }
 0x135   : > { %8908 = vmatmul.mubr.msk.f32.gmra.mrb[12].mxu0 %vm291_vm0, %v10888_v28 }
 0x136   : > { %8910 = vmatprep.mubr.msk.f32.mxu0 %vm291_vm0, %v10892_v30 }
 0x139   : > { %8911 = vmatmul.mubr.msk.f32.gmra.mrb[14].mxu0 %vm291_vm0, %v10896_v32 }
 0x13a   : > { %8913 = vmatprep.mubr.msk.f32.mxu0 %vm291_vm0, %v10900_v34 }
 0x13d   : > { %8914 = vmatmul.mubr.msk.f32.gmra.mrb[16].mxu0 %vm291_vm0, %v10904_v36 }
 0x13e   : > { %8916 = vmatprep.mubr.msk.f32.mxu0 %vm291_vm0, %v10908_v38 }
 0x141   : > { %8917 = vmatmul.mubr.msk.f32.gmra.mrb[18].mxu0 %vm291_vm0, %v10912_v40 }
 0x142   : > { %8919 = vmatprep.mubr.msk.f32.mxu0 %vm291_vm0, %v10916_v42 }
 0x145   : > { %8920 = vmatmul.mubr.msk.f32.gmra.mrb[20].mxu0 %vm291_vm0, %v10920_v44 }
 0x146   : > { %8922 = vmatprep.mubr.msk.f32.mxu0 %vm291_vm0, %v10924_v46 }
 0x149   : > { %8923 = vmatmul.mubr.msk.f32.gmra.mrb[22].mxu0 %vm291_vm0, %v10929_v50 }
 0x14a   : > { %8925 = vmatprep.mubr.msk.f32.mxu0 %vm291_vm0, %v10933_v52 }
 0x14d   : > { %8926 = vmatmul.mubr.msk.f32.gmra.mrb[24].mxu0 %vm291_vm0, %v10938_v56 }
 0x14e   : > { %8928 = vmatprep.mubr.msk.f32.mxu0 %vm291_vm0, %v10942_v58 }
 0x151   : > { %8929 = vmatmul.mubr.msk.f32.gmra.mrb[26].mxu0 %vm291_vm0, %v10946_v60 }
 0x152   : > { %8931 = vmatprep.mubr.msk.f32.mxu0 %vm291_vm0, %v10950_v62 }
 0x155   : > { %8932 = vmatmul.mubr.msk.f32.gmra.mrb[28].mxu0 %vm291_vm0, %v10954_v0 }
 0x156   : > { %8934 = vmatprep.mubr.msk.f32.mxu0 %vm291_vm0, %v10958_v3 }
 0x159   : > { %8935 = vmatmul.mubr.msk.f32.gmra.mrb[30].mxu0 %vm291_vm0, %v10962_v48 }
 0x15a   : > { %8939 = vmatprep.mubr.msk.f32.mxu0 %vm291_vm0, %v1096_v6  ;;  %v10981_v6 = vld [vmem:[#allocation2 + $0x22] sm:$0xff] }
 0x15b   : > { %12593 = vst [vmem:[#allocation13_spill] sm:$0xff] %v10981_v6 }
 0x15d   : > { %8940 = vmatmul.mubr.msk.f32.vlgmr.msra.gmra.mrb[0].mxu0 %vm291_vm0, %v1097_v54  ;;  %v10989_v54 = vld [vmem:[#allocation2 + $0x3a] sm:$0xff] }
 0x15e   : > { %8988 = vmatpush3.msk.msra.mxu0 %vm543_vm2, %v10837_v8  ;;  %8942 = vmatprep.mubr.msk.f32.mxu0 %vm291_vm0, %v10973_v4  ;;  %12595 = vst [vmem:[#allocation15_spill] sm:$0xff] %v10989_v54  ;;  %v10993_v8 = vld [vmem:[#allocation2 + $0x4a] sm:$0xff]  ;;  %v10997_v4 = vld [vmem:[#allocation2 + $0x52] sm:$0xff] }
 0x15f   : > { %9037 = vmatprep.subr.msk.mxu0 %vm543_vm2, %v10970_v5  ;;  %12596 = vst [vmem:[#allocation16_spill] sm:$0xff] %v10993_v8  ;;  %12597 = vst [vmem:[#allocation17_spill] sm:$0xff] %v10997_v4 }
 0x161   : > { %8943 = vmatmul.mubr.msk.f32.gmra.mrb[2].mxu0 %vm291_vm0, %v10981_v6  ;;  %v11001_v6 = vld [vmem:[#allocation2 + $0x62] sm:$0xff] }
 0x162   : > { %8945 = vmatprep.mubr.msk.f32.mxu0 %vm291_vm0, %v10985_v2  ;;  %12598 = vst [vmem:[#allocation18_spill] sm:$0xff] %v11001_v6  ;;  %v11005_v2 = vld [vmem:[#allocation2 + $0x6a] sm:$0xff] }
 0x163   : > { %12599 = vst [vmem:[#allocation19_spill] sm:$0xff] %v11005_v2 }
 0x165   : > { %8946 = vmatmul.mubr.msk.f32.gmra.mrb[4].mxu0 %vm291_vm0, %v10989_v54  ;;  %v11009_v54 = vld [vmem:[#allocation2 + $0x7a] sm:$0xff] }
 0x166   : > { %8948 = vmatprep.mubr.msk.f32.mxu0 %vm291_vm0, %v10993_v8  ;;  %12600 = vst [vmem:[#allocation20_spill] sm:$0xff] %v11009_v54  ;;  %v11013_v8 = vld [vmem:[#allocation2 + $0x82] sm:$0xff] }
 0x167   : > { %12601 = vst [vmem:[#allocation21_spill] sm:$0xff] %v11013_v8 }
 0x169   : > { %8949 = vmatmul.mubr.msk.f32.gmra.mrb[6].mxu0 %vm291_vm0, %v10997_v4  ;;  %v11017_v4 = vld [vmem:[#allocation2 + $0x92] sm:$0xff] }
 0x16a   : > { %8951 = vmatprep.mubr.msk.f32.mxu0 %vm291_vm0, %v11001_v6  ;;  %12602 = vst [vmem:[#allocation22_spill] sm:$0xff] %v11017_v4  ;;  %v11021_v6 = vld [vmem:[#allocation2 + $0x9a] sm:$0xff] }
 0x16b   : > { %12603 = vst [vmem:[#allocation23_spill] sm:$0xff] %v11021_v6 }
 0x16d   : > { %8952 = vmatmul.mubr.msk.f32.gmra.mrb[8].mxu0 %vm291_vm0, %v11005_v2  ;;  %v11025_v2 = vld [vmem:[#allocation2 + $0xaa] sm:$0xff] }
 0x16e   : > { %8954 = vmatprep.mubr.msk.f32.mxu0 %vm291_vm0, %v11009_v54  ;;  %12604 = vst [vmem:[#allocation24_spill] sm:$0xff] %v11025_v2  ;;  %v11029_v54 = vld [vmem:[#allocation2 + $0xb2] sm:$0xff] }
 0x16f   : > { %12605 = vst [vmem:[#allocation25_spill] sm:$0xff] %v11029_v54 }
 0x171   : > { %8955 = vmatmul.mubr.msk.f32.gmra.mrb[10].mxu0 %vm291_vm0, %v11013_v8  ;;  %v11033_v8 = vld [vmem:[#allocation2 + $0xc2] sm:$0xff] }
 0x172   : > { %8957 = vmatprep.mubr.msk.f32.mxu0 %vm291_vm0, %v11017_v4  ;;  %12606 = vst [vmem:[#allocation26_spill] sm:$0xff] %v11033_v8  ;;  %v11037_v4 = vld [vmem:[#allocation2 + $0xca] sm:$0xff] }
 0x173   : > { %12607 = vst [vmem:[#allocation27_spill] sm:$0xff] %v11037_v4 }
 0x175   : > { %8958 = vmatmul.mubr.msk.f32.gmra.mrb[12].mxu0 %vm291_vm0, %v11021_v6  ;;  %v11041_v6 = vld [vmem:[#allocation2 + $0xda] sm:$0xff] }
 0x176   : > { %8960 = vmatprep.mubr.msk.f32.mxu0 %vm291_vm0, %v11025_v2  ;;  %12608 = vst [vmem:[#allocation28_spill] sm:$0xff] %v11041_v6  ;;  %v11045_v2 = vld [vmem:[#allocation2 + $0xe2] sm:$0xff] }
 0x177   : > { %12609 = vst [vmem:[#allocation29_spill] sm:$0xff] %v11045_v2 }
 0x179   : > { %8961 = vmatmul.mubr.msk.f32.gmra.mrb[14].mxu0 %vm291_vm0, %v11029_v54  ;;  %v11049_v54 = vld [vmem:[#allocation2 + $0xf2] sm:$0xff] }
 0x17a   : > { %8963 = vmatprep.mubr.msk.f32.mxu0 %vm291_vm0, %v11033_v8  ;;  %12610 = vst [vmem:[#allocation30_spill] sm:$0xff] %v11049_v54  ;;  %v11053_v8 = vld [vmem:[#allocation2 + $0xfa] sm:$0xff] }
 0x17b   : > { %12611 = vst [vmem:[#allocation31_spill] sm:$0xff] %v11053_v8 }
 0x17d   : > { %8964 = vmatmul.mubr.msk.f32.gmra.mrb[16].mxu0 %vm291_vm0, %v11037_v4  ;;  %v11057_v4 = vld [vmem:[#allocation2 + $0x10a] sm:$0xff] }
 0x17e   : > { %8966 = vmatprep.mubr.msk.f32.mxu0 %vm291_vm0, %v11041_v6  ;;  %12612 = vst [vmem:[#allocation32_spill] sm:$0xff] %v11057_v4  ;;  %v11061_v6 = vld [vmem:[#allocation2 + $0x112] sm:$0xff] }
 0x17f   : > { %12613 = vst [vmem:[#allocation33_spill] sm:$0xff] %v11061_v6 }
 0x181   : > { %8967 = vmatmul.mubr.msk.f32.gmra.mrb[18].mxu0 %vm291_vm0, %v11045_v2  ;;  %v11065_v2 = vld [vmem:[#allocation2 + $0x122] sm:$0xff] }
 0x182   : > { %8969 = vmatprep.mubr.msk.f32.mxu0 %vm291_vm0, %v11049_v54  ;;  %12614 = vst [vmem:[#allocation34_spill] sm:$0xff] %v11065_v2  ;;  %v11069_v54 = vld [vmem:[#allocation2 + $0x12a] sm:$0xff] }
 0x183   : > { %12615 = vst [vmem:[#allocation35_spill] sm:$0xff] %v11069_v54 }
 0x185   : > { %8970 = vmatmul.mubr.msk.f32.gmra.mrb[20].mxu0 %vm291_vm0, %v11053_v8  ;;  %v11073_v8 = vld [vmem:[#allocation2 + $0x13a] sm:$0xff] }
 0x186   : > { %8972 = vmatprep.mubr.msk.f32.mxu0 %vm291_vm0, %v11057_v4  ;;  %12616 = vst [vmem:[#allocation36_spill] sm:$0xff] %v11073_v8  ;;  %v11077_v4 = vld [vmem:[#allocation2 + $0x142] sm:$0xff] }
 0x189   : > { %8973 = vmatmul.mubr.msk.f32.gmra.mrb[22].mxu0 %vm291_vm0, %v11061_v6  ;;  %v11081_v6 = vld [vmem:[#allocation2 + $0x152] sm:$0xff] }
 0x18a   : > { %8975 = vmatprep.mubr.msk.f32.mxu0 %vm291_vm0, %v11065_v2  ;;  %12617 = vst [vmem:[#allocation37_spill] sm:$0xff] %v11081_v6  ;;  %v11085_v2 = vld [vmem:[#allocation2 + $0x15a] sm:$0xff] }
 0x18d   : > { %8976 = vmatmul.mubr.msk.f32.gmra.mrb[24].mxu0 %vm291_vm0, %v11069_v54  ;;  %v11089_v54 = vld [vmem:[#allocation2 + $0x16a] sm:$0xff] }
 0x18e   : > { %8978 = vmatprep.mubr.msk.f32.mxu0 %vm291_vm0, %v11073_v8  ;;  %12618 = vst [vmem:[#allocation38_spill] sm:$0xff] %v11089_v54  ;;  %v11093_v8 = vld [vmem:[#allocation2 + $0x172] sm:$0xff] }
 0x191   : > { %8979 = vmatmul.mubr.msk.f32.gmra.mrb[26].mxu0 %vm291_vm0, %v11077_v4 }
 0x192   : > { %8981 = vmatprep.mubr.msk.f32.mxu0 %vm291_vm0, %v11081_v6  ;;  %v7793_v6 = vld [vmem:[%s12465_s1 + $0x14] sm:$0xf] }
 0x195   : > { %8982 = vmatmul.mubr.msk.f32.gmra.mrb[28].mxu0 %vm291_vm0, %v11085_v2 }
 0x196   : > { %8984 = vmatprep.mubr.msk.f32.mxu0 %vm291_vm0, %v11089_v54 }
 0x199   : > { %8985 = vmatmul.mubr.msk.f32.gmra.mrb[30].mxu0 %vm291_vm0, %v11093_v8 }
 0x19a   : > { %8989 = vmatprep.mubr.msk.f32.mxu0 %vm291_vm0, %v10840_v9  ;;  %v11167_v9 = vld [vmem:[#allocation2 + $0x188] sm:$0xff] }
 0x19d   : > { %8990 = vmatmul.mubr.msk.f32.vlgmr.msra.gmra.mrb[0].mxu0 %vm291_vm0, %v10848_v10  ;;  %v7827_v10 = vld [vmem:[%s12465_s1 + $0x18] sm:$0xf] }
 0x19e   : > { %9038 = vmatpush3.msk.msra.mxu0 %vm543_vm2, %v10970_v5  ;;  %8992 = vmatprep.mubr.msk.f32.mxu0 %vm291_vm0, %v10852_v12  ;;  %v11161_v5 = vld [vmem:[#allocation2 + $0x180] sm:$0xff] }
 0x19f   : > { %9087 = vmatprep.subr.msk.mxu0 %vm543_vm2, %v7793_v6 }
 0x1a1   : > { %8993 = vmatmul.mubr.msk.f32.gmra.mrb[2].mxu0 %vm291_vm0, %v10856_v14 }
 0x1a2   : > { %8995 = vmatprep.mubr.msk.f32.mxu0 %vm291_vm0, %v10860_v7 }
 0x1a5   : > { %8996 = vmatmul.mubr.msk.f32.gmra.mrb[4].mxu0 %vm291_vm0, %v10864_v16 }
 0x1a6   : > { %8998 = vmatprep.mubr.msk.f32.mxu0 %vm291_vm0, %v10868_v18 }
 0x1a9   : > { %8999 = vmatmul.mubr.msk.f32.gmra.mrb[6].mxu0 %vm291_vm0, %v10872_v20 }
 0x1aa   : > { %9001 = vmatprep.mubr.msk.f32.mxu0 %vm291_vm0, %v10876_v22 }
 0x1ad   : > { %9002 = vmatmul.mubr.msk.f32.gmra.mrb[8].mxu0 %vm291_vm0, %v10880_v24 }
 0x1ae   : > { %9004 = vmatprep.mubr.msk.f32.mxu0 %vm291_vm0, %v10884_v26 }
 0x1b1   : > { %9005 = vmatmul.mubr.msk.f32.gmra.mrb[10].mxu0 %vm291_vm0, %v10888_v28 }
 0x1b2   : > { %9007 = vmatprep.mubr.msk.f32.mxu0 %vm291_vm0, %v10892_v30 }
 0x1b5   : > { %9008 = vmatmul.mubr.msk.f32.gmra.mrb[12].mxu0 %vm291_vm0, %v10896_v32 }
 0x1b6   : > { %9010 = vmatprep.mubr.msk.f32.mxu0 %vm291_vm0, %v10900_v34 }
 0x1b9   : > { %9011 = vmatmul.mubr.msk.f32.gmra.mrb[14].mxu0 %vm291_vm0, %v10904_v36 }
 0x1ba   : > { %9013 = vmatprep.mubr.msk.f32.mxu0 %vm291_vm0, %v10908_v38 }
 0x1bd   : > { %9014 = vmatmul.mubr.msk.f32.gmra.mrb[16].mxu0 %vm291_vm0, %v10912_v40 }
 0x1be   : > { %9016 = vmatprep.mubr.msk.f32.mxu0 %vm291_vm0, %v10916_v42 }
 0x1c1   : > { %9017 = vmatmul.mubr.msk.f32.gmra.mrb[18].mxu0 %vm291_vm0, %v10920_v44 }
 0x1c2   : > { %9019 = vmatprep.mubr.msk.f32.mxu0 %vm291_vm0, %v10924_v46 }
 0x1c5   : > { %9020 = vmatmul.mubr.msk.f32.gmra.mrb[20].mxu0 %vm291_vm0, %v10929_v50 }
 0x1c6   : > { %9022 = vmatprep.mubr.msk.f32.mxu0 %vm291_vm0, %v10933_v52 }
 0x1c9   : > { %9023 = vmatmul.mubr.msk.f32.gmra.mrb[22].mxu0 %vm291_vm0, %v10938_v56 }
 0x1ca   : > { %9025 = vmatprep.mubr.msk.f32.mxu0 %vm291_vm0, %v10942_v58 }
 0x1cd   : > { %9026 = vmatmul.mubr.msk.f32.gmra.mrb[24].mxu0 %vm291_vm0, %v10946_v60 }
 0x1ce   : > { %9028 = vmatprep.mubr.msk.f32.mxu0 %vm291_vm0, %v10950_v62 }
 0x1d1   : > { %9029 = vmatmul.mubr.msk.f32.gmra.mrb[26].mxu0 %vm291_vm0, %v10954_v0 }
 0x1d2   : > { %9031 = vmatprep.mubr.msk.f32.mxu0 %vm291_vm0, %v10958_v3 }
 0x1d5   : > { %9032 = vmatmul.mubr.msk.f32.gmra.mrb[28].mxu0 %vm291_vm0, %v10962_v48 }
 0x1d6   : > { %9034 = vmatprep.mubr.msk.f32.mxu0 %vm291_vm0, %v11161_v5 }
 0x1d9   : > { %9035 = vmatmul.mubr.msk.f32.gmra.mrb[30].mxu0 %vm291_vm0, %v11167_v9 }
 0x1da   : > { %9039 = vmatprep.mubr.msk.f32.mxu0 %vm291_vm0, %v10685_v11  ;;  %v12619_v11 = vld [vmem:[#allocation10_spill] sm:$0xff] }
 0x1dd   : > { %9040 = vmatmul.mubr.msk.f32.vlgmr.msra.gmra.mrb[0].mxu0 %vm291_vm0, %v10690_v13  ;;  %v12620_v13 = vld [vmem:[#allocation11_spill] sm:$0xff] }
 0x1de   : > { %9088 = vmatpush3.msk.msra.mxu0 %vm543_vm2, %v7793_v6  ;;  %9042 = vmatprep.mubr.msk.f32.mxu0 %vm291_vm0, %v10695_v15  ;;  %v11236_v15 = vld [vmem:[#allocation2 + $0x181] sm:$0xff]  ;;  %v7861_v6 = vld [vmem:[%s12465_s1 + $0x1c] sm:$0xf] }
 0x1df   : > { %9137 = vmatprep.subr.msk.mxu0 %vm543_vm2, %v7827_v10  ;;  %12621 = vst [vmem:[#allocation39_spill] sm:$0xff] %v11236_v15 }
 0x1e1   : > { %9043 = vmatmul.mubr.msk.f32.gmra.mrb[2].mxu0 %vm291_vm0, %v10700_v17  ;;  %v11240_v17 = vld [vmem:[#allocation2 + $0x189] sm:$0xff] }
 0x1e2   : > { %9045 = vmatprep.mubr.msk.f32.mxu0 %vm291_vm0, %v10705_v19  ;;  %12622 = vst [vmem:[#allocation40_spill] sm:$0xff] %v11240_v17  ;;  %v12623_v19 = vld [vmem:[#allocation12_spill] sm:$0xff] }
 0x1e5   : > { %9046 = vmatmul.mubr.msk.f32.gmra.mrb[4].mxu0 %vm291_vm0, %v10710_v21 }
 0x1e6   : > { %9048 = vmatprep.mubr.msk.f32.mxu0 %vm291_vm0, %v10715_v23 }
 0x1e9   : > { %9049 = vmatmul.mubr.msk.f32.gmra.mrb[6].mxu0 %vm291_vm0, %v10720_v25 }
 0x1ea   : > { %9051 = vmatprep.mubr.msk.f32.mxu0 %vm291_vm0, %v10725_v27 }
 0x1ed   : > { %9052 = vmatmul.mubr.msk.f32.gmra.mrb[8].mxu0 %vm291_vm0, %v10730_v29 }
 0x1ee   : > { %9054 = vmatprep.mubr.msk.f32.mxu0 %vm291_vm0, %v10735_v31 }
 0x1f1   : > { %9055 = vmatmul.mubr.msk.f32.gmra.mrb[10].mxu0 %vm291_vm0, %v10740_v33 }
 0x1f2   : > { %9057 = vmatprep.mubr.msk.f32.mxu0 %vm291_vm0, %v10745_v35 }
 0x1f5   : > { %9058 = vmatmul.mubr.msk.f32.gmra.mrb[12].mxu0 %vm291_vm0, %v10750_v37 }
 0x1f6   : > { %9060 = vmatprep.mubr.msk.f32.mxu0 %vm291_vm0, %v10755_v39 }
 0x1f9   : > { %9061 = vmatmul.mubr.msk.f32.gmra.mrb[14].mxu0 %vm291_vm0, %v10760_v41 }
 0x1fa   : > { %9063 = vmatprep.mubr.msk.f32.mxu0 %vm291_vm0, %v10765_v43 }
 0x1fd   : > { %9064 = vmatmul.mubr.msk.f32.gmra.mrb[16].mxu0 %vm291_vm0, %v10770_v45 }
 0x1fe   : > { %9066 = vmatprep.mubr.msk.f32.mxu0 %vm291_vm0, %v10775_v47 }
 0x201   : > { %9067 = vmatmul.mubr.msk.f32.gmra.mrb[18].mxu0 %vm291_vm0, %v10780_v49 }
 0x202   : > { %9069 = vmatprep.mubr.msk.f32.mxu0 %vm291_vm0, %v10785_v51 }
 0x205   : > { %9070 = vmatmul.mubr.msk.f32.gmra.mrb[20].mxu0 %vm291_vm0, %v10790_v53 }
 0x206   : > { %9072 = vmatprep.mubr.msk.f32.mxu0 %vm291_vm0, %v10795_v55 }
 0x209   : > { %9073 = vmatmul.mubr.msk.f32.gmra.mrb[22].mxu0 %vm291_vm0, %v10800_v57 }
 0x20a   : > { %9075 = vmatprep.mubr.msk.f32.mxu0 %vm291_vm0, %v10805_v59 }
 0x20d   : > { %9076 = vmatmul.mubr.msk.f32.gmra.mrb[24].mxu0 %vm291_vm0, %v10810_v61 }
 0x20e   : > { %9078 = vmatprep.mubr.msk.f32.mxu0 %vm291_vm0, %v10815_v63  ;;  %v12633_v63 = vld [vmem:[#allocation22_spill] sm:$0xff] }
 0x211   : > { %9079 = vmatmul.mubr.msk.f32.gmra.mrb[26].mxu0 %vm291_vm0, %v10820_v1  ;;  %v12629_v1 = vld [vmem:[#allocation18_spill] sm:$0xff] }
 0x212   : > { %9081 = vmatprep.mubr.msk.f32.mxu0 %vm291_vm0, %v12619_v11  ;;  %v12624_v11 = vld [vmem:[#allocation13_spill] sm:$0xff] }
 0x215   : > { %9082 = vmatmul.mubr.msk.f32.gmra.mrb[28].mxu0 %vm291_vm0, %v12620_v13  ;;  %v12625_v13 = vld [vmem:[#allocation14_spill] sm:$0xff] }
 0x216   : > { %9084 = vmatprep.mubr.msk.f32.mxu0 %vm291_vm0, %v11236_v15  ;;  %v12626_v15 = vld [vmem:[#allocation15_spill] sm:$0xff] }
 0x219   : > { %9085 = vmatmul.mubr.msk.f32.gmra.mrb[30].mxu0 %vm291_vm0, %v11240_v17  ;;  %v12627_v17 = vld [vmem:[#allocation16_spill] sm:$0xff] }
 0x21a   : > { %9089 = vmatprep.mubr.msk.f32.mxu0 %vm291_vm0, %v12623_v19  ;;  %v12628_v19 = vld [vmem:[#allocation17_spill] sm:$0xff] }
 0x21d   : > { %9090 = vmatmul.mubr.msk.f32.vlgmr.msra.gmra.mrb[0].mxu0 %vm291_vm0, %v12624_v11  ;;  %v12630_v11 = vld [vmem:[#allocation19_spill] sm:$0xff] }
 0x21e   : > { %9138 = vmatpush3.msk.msra.mxu0 %vm543_vm2, %v7827_v10  ;;  %9092 = vmatprep.mubr.msk.f32.mxu0 %vm291_vm0, %v12625_v13  ;;  %v12631_v10 = vld [vmem:[#allocation20_spill] sm:$0xff]  ;;  %v12632_v13 = vld [vmem:[#allocation21_spill] sm:$0xff] }
 0x21f   : > { %9187 = vmatprep.subr.msk.mxu0 %vm543_vm2, %v7861_v6 }
 0x221   : > { %9093 = vmatmul.mubr.msk.f32.gmra.mrb[2].mxu0 %vm291_vm0, %v12626_v15  ;;  %v12634_v15 = vld [vmem:[#allocation23_spill] sm:$0xff] }
 0x222   : > { %9095 = vmatprep.mubr.msk.f32.mxu0 %vm291_vm0, %v12627_v17  ;;  %v12635_v17 = vld [vmem:[#allocation24_spill] sm:$0xff] }
 0x225   : > { %9096 = vmatmul.mubr.msk.f32.gmra.mrb[4].mxu0 %vm291_vm0, %v12628_v19  ;;  %v12636_v19 = vld [vmem:[#allocation25_spill] sm:$0xff] }
 0x226   : > { %9098 = vmatprep.mubr.msk.f32.mxu0 %vm291_vm0, %v12629_v1  ;;  %v12637_v1 = vld [vmem:[#allocation26_spill] sm:$0xff] }
 0x229   : > { %9099 = vmatmul.mubr.msk.f32.gmra.mrb[6].mxu0 %vm291_vm0, %v12630_v11  ;;  %v12638_v11 = vld [vmem:[#allocation27_spill] sm:$0xff] }
 0x22a   : > { %9101 = vmatprep.mubr.msk.f32.mxu0 %vm291_vm0, %v12631_v10  ;;  %v12639_v10 = vld [vmem:[#allocation28_spill] sm:$0xff] }
 0x22d   : > { %9102 = vmatmul.mubr.msk.f32.gmra.mrb[8].mxu0 %vm291_vm0, %v12632_v13  ;;  %v12640_v13 = vld [vmem:[#allocation29_spill] sm:$0xff] }
 0x22e   : > { %9104 = vmatprep.mubr.msk.f32.mxu0 %vm291_vm0, %v12633_v63  ;;  %v12641_v63 = vld [vmem:[#allocation30_spill] sm:$0xff] }
 0x231   : > { %9105 = vmatmul.mubr.msk.f32.gmra.mrb[10].mxu0 %vm291_vm0, %v12634_v15  ;;  %v12642_v15 = vld [vmem:[#allocation31_spill] sm:$0xff] }
 0x232   : > { %9107 = vmatprep.mubr.msk.f32.mxu0 %vm291_vm0, %v12635_v17  ;;  %v12643_v17 = vld [vmem:[#allocation32_spill] sm:$0xff] }
 0x235   : > { %9108 = vmatmul.mubr.msk.f32.gmra.mrb[12].mxu0 %vm291_vm0, %v12636_v19  ;;  %v12644_v19 = vld [vmem:[#allocation33_spill] sm:$0xff] }
 0x236   : > { %9110 = vmatprep.mubr.msk.f32.mxu0 %vm291_vm0, %v12637_v1  ;;  %v12645_v1 = vld [vmem:[#allocation34_spill] sm:$0xff] }
 0x239   : > { %9111 = vmatmul.mubr.msk.f32.gmra.mrb[14].mxu0 %vm291_vm0, %v12638_v11  ;;  %v12646_v11 = vld [vmem:[#allocation35_spill] sm:$0xff] }
 0x23a   : > { %9113 = vmatprep.mubr.msk.f32.mxu0 %vm291_vm0, %v12639_v10  ;;  %v12647_v10 = vld [vmem:[#allocation36_spill] sm:$0xff] }
 0x23d   : > { %9114 = vmatmul.mubr.msk.f32.gmra.mrb[16].mxu0 %vm291_vm0, %v12640_v13 }
 0x23e   : > { %9116 = vmatprep.mubr.msk.f32.mxu0 %vm291_vm0, %v12641_v63  ;;  %v12648_v63 = vld [vmem:[#allocation37_spill] sm:$0xff] }
 0x241   : > { %9117 = vmatmul.mubr.msk.f32.gmra.mrb[18].mxu0 %vm291_vm0, %v12642_v15 }
 0x242   : > { %9119 = vmatprep.mubr.msk.f32.mxu0 %vm291_vm0, %v12643_v17 }
 0x245   : > { %9120 = vmatmul.mubr.msk.f32.gmra.mrb[20].mxu0 %vm291_vm0, %v12644_v19 }
 0x246   : > { %9122 = vmatprep.mubr.msk.f32.mxu0 %vm291_vm0, %v12645_v1  ;;  %v11309_v1 = vld [vmem:[#allocation2 + $0x182] sm:$0xff] }
 0x249   : > { %9123 = vmatmul.mubr.msk.f32.gmra.mrb[22].mxu0 %vm291_vm0, %v12646_v11 }
 0x24a   : > { %9125 = vmatprep.mubr.msk.f32.mxu0 %vm291_vm0, %v12647_v10  ;;  %v11313_v10 = vld [vmem:[#allocation2 + $0x18a] sm:$0xff] }
 0x24d   : > { %9126 = vmatmul.mubr.msk.f32.gmra.mrb[24].mxu0 %vm291_vm0, %v11077_v4 }
 0x24e   : > { %9128 = vmatprep.mubr.msk.f32.mxu0 %vm291_vm0, %v12648_v63 }
 0x251   : > { %9129 = vmatmul.mubr.msk.f32.gmra.mrb[26].mxu0 %vm291_vm0, %v11085_v2 }
 0x252   : > { %9131 = vmatprep.mubr.msk.f32.mxu0 %vm291_vm0, %v11089_v54  ;;  %v7895_v54 = vld [vmem:[%s12465_s1 + $0x20] sm:$0xf] }
 0x255   : > { %9132 = vmatmul.mubr.msk.f32.gmra.mrb[28].mxu0 %vm291_vm0, %v11093_v8 }
 0x256   : > { %9134 = vmatprep.mubr.msk.f32.mxu0 %vm291_vm0, %v11309_v1 }
 0x259   : > { %9135 = vmatmul.mubr.msk.f32.gmra.mrb[30].mxu0 %vm291_vm0, %v11313_v10 }
 0x25a   : > { %9139 = vmatprep.mubr.msk.f32.mxu0 %vm291_vm0, %v10852_v12  ;;  %v2687_v12 = vld [vmem:[#allocation2 + $0x198] sm:$0xff] }
 0x25d   : > { %9140 = vmatmul.mubr.msk.f32.vlgmr.msra.gmra.mrb[0].mxu0 %vm291_vm0, %v10856_v14  ;;  %v2688_v14 = vld [vmem:[#allocation2 + $0x1a0] sm:$0xff] }
 0x25e   : > { %9188 = vmatpush3.msk.msra.mxu0 %vm543_vm2, %v7861_v6  ;;  %9142 = vmatprep.mubr.msk.f32.mxu0 %vm291_vm0, %v10860_v7  ;;  %v3047_v7 = vld [vmem:[#allocation2 + $0x31] sm:$0xff] }
 0x25f   : > { %9237 = vmatprep.subr.msk.mxu0 %vm543_vm2, %v7895_v54 }
 0x261   : > { %9143 = vmatmul.mubr.msk.f32.gmra.mrb[2].mxu0 %vm291_vm0, %v10864_v16  ;;  %v3048_v16 = vld [vmem:[#allocation2 + $0x39] sm:$0xff] }
 0x262   : > { %9145 = vmatprep.mubr.msk.f32.mxu0 %vm291_vm0, %v10868_v18  ;;  %v3049_v18 = vld [vmem:[#allocation2 + $0x49] sm:$0xff] }
 0x265   : > { %9146 = vmatmul.mubr.msk.f32.gmra.mrb[4].mxu0 %vm291_vm0, %v10872_v20  ;;  %v12668_v20 = vld [vmem:[#allocation27_spill] sm:$0xff] }
 0x266   : > { %9148 = vmatprep.mubr.msk.f32.mxu0 %vm291_vm0, %v10876_v22  ;;  %v12669_v22 = vld [vmem:[#allocation28_spill] sm:$0xff] }
 0x269   : > { %9149 = vmatmul.mubr.msk.f32.gmra.mrb[6].mxu0 %vm291_vm0, %v10880_v24  ;;  %v12670_v24 = vld [vmem:[#allocation30_spill] sm:$0xff] }
 0x26a   : > { %9151 = vmatprep.mubr.msk.f32.mxu0 %vm291_vm0, %v10884_v26  ;;  %v12671_v26 = vld [vmem:[#allocation34_spill] sm:$0xff] }
 0x26d   : > { %9152 = vmatmul.mubr.msk.f32.gmra.mrb[8].mxu0 %vm291_vm0, %v10888_v28  ;;  %v12672_v28 = vld [vmem:[#allocation36_spill] sm:$0xff] }
 0x26e   : > { %9154 = vmatprep.mubr.msk.f32.mxu0 %vm291_vm0, %v10892_v30  ;;  %v12673_v30 = vld [vmem:[#allocation38_spill] sm:$0xff] }
 0x271   : > { %9155 = vmatmul.mubr.msk.f32.gmra.mrb[10].mxu0 %vm291_vm0, %v10896_v32  ;;  %v3467_v32 = vld [vmem:[#allocation2 + $0x19a] sm:$0xff] }
 0x272   : > { %9157 = vmatprep.mubr.msk.f32.mxu0 %vm291_vm0, %v10900_v34  ;;  %v4017_v34 = vld [vmem:[%s12467_s3] sm:$0xf] }
 0x275   : > { %9158 = vmatmul.mubr.msk.f32.gmra.mrb[12].mxu0 %vm291_vm0, %v10904_v36  ;;  %v11521_v36 = vld [vmem:[%s12467_s3 + $0x8] sm:$0xf] }
 0x276   : > { %9160 = vmatprep.mubr.msk.f32.mxu0 %vm291_vm0, %v10908_v38  ;;  %v11528_v38 = vld [vmem:[%s12466_s2] ss:$0 sm:$0xff] }
 0x279   : > { %9161 = vmatmul.mubr.msk.f32.gmra.mrb[14].mxu0 %vm291_vm0, %v10912_v40 }
 0x27a   : > { %9163 = vmatprep.mubr.msk.f32.mxu0 %vm291_vm0, %v10916_v42 }
 0x27d   : > { %9164 = vmatmul.mubr.msk.f32.gmra.mrb[16].mxu0 %vm291_vm0, %v10920_v44 }
 0x27e   : > { %9166 = vmatprep.mubr.msk.f32.mxu0 %vm291_vm0, %v10924_v46 }
 0x281   : > { %9167 = vmatmul.mubr.msk.f32.gmra.mrb[18].mxu0 %vm291_vm0, %v10929_v50 }
 0x282   : > { %9169 = vmatprep.mubr.msk.f32.mxu0 %vm291_vm0, %v10933_v52 }
 0x285   : > { %9170 = vmatmul.mubr.msk.f32.gmra.mrb[20].mxu0 %vm291_vm0, %v10938_v56 }
 0x286   : > { %9172 = vmatprep.mubr.msk.f32.mxu0 %vm291_vm0, %v10942_v58 }
 0x289   : > { %9173 = vmatmul.mubr.msk.f32.gmra.mrb[22].mxu0 %vm291_vm0, %v10946_v60 }
 0x28a   : > { %9175 = vmatprep.mubr.msk.f32.mxu0 %vm291_vm0, %v10950_v62 }
 0x28d   : > { %9176 = vmatmul.mubr.msk.f32.gmra.mrb[24].mxu0 %vm291_vm0, %v10954_v0 }
 0x28e   : > { %9178 = vmatprep.mubr.msk.f32.mxu0 %vm291_vm0, %v10958_v3 }
 0x291   : > { %9179 = vmatmul.mubr.msk.f32.gmra.mrb[26].mxu0 %vm291_vm0, %v10962_v48 }
 0x292   : > { %9181 = vmatprep.mubr.msk.f32.mxu0 %vm291_vm0, %v11161_v5 }
 0x295   : > { %9182 = vmatmul.mubr.msk.f32.gmra.mrb[28].mxu0 %vm291_vm0, %v11167_v9 }
 0x296   : > { %9184 = vmatprep.mubr.msk.f32.mxu0 %vm291_vm0, %v2687_v12 }
 0x299   : > { %9185 = vmatmul.mubr.msk.f32.gmra.mrb[30].mxu0 %vm291_vm0, %v2688_v14 }
 0x29a   : > { %9189 = vmatprep.mubr.msk.f32.mxu0 %vm291_vm0, %v3047_v7 }
 0x29d   : > { %9190 = vmatmul.mubr.msk.f32.vlgmr.msra.gmra.mrb[0].mxu0 %vm291_vm0, %v3048_v16 }
 0x29e   : > { %9238 = vmatpush3.msk.msra.mxu0 %vm543_vm2, %v7895_v54  ;;  %9192 = vmatprep.mubr.msk.f32.mxu0 %vm291_vm0, %v3049_v18 }
 0x2a1   : > { %9193 = vmatmul.mubr.msk.f32.gmra.mrb[2].mxu0 %vm291_vm0, %v10710_v21  ;;  %v12649_v21 = vld [vmem:[#allocation8_spill] sm:$0xff] }
 0x2a2   : > { %9195 = vmatprep.mubr.msk.f32.mxu0 %vm291_vm0, %v10715_v23  ;;  %v12650_v23 = vld [vmem:[#allocation9_spill] sm:$0xff] }
 0x2a5   : > { %9196 = vmatmul.mubr.msk.f32.gmra.mrb[4].mxu0 %vm291_vm0, %v10720_v25  ;;  %v12651_v25 = vld [vmem:[#allocation10_spill] sm:$0xff] }
 0x2a6   : > { %9198 = vmatprep.mubr.msk.f32.mxu0 %vm291_vm0, %v10725_v27  ;;  %v12652_v27 = vld [vmem:[#allocation11_spill] sm:$0xff] }
 0x2a9   : > { %9199 = vmatmul.mubr.msk.f32.gmra.mrb[6].mxu0 %vm291_vm0, %v10730_v29  ;;  %v12653_v29 = vld [vmem:[#allocation39_spill] sm:$0xff] }
 0x2aa   : > { %9201 = vmatprep.mubr.msk.f32.mxu0 %vm291_vm0, %v10735_v31  ;;  %v3077_v31 = vld [vmem:[#allocation2 + $0x199] sm:$0xff] }
 0x2ad   : > { %9202 = vmatmul.mubr.msk.f32.gmra.mrb[8].mxu0 %vm291_vm0, %v10740_v33  ;;  %v12654_v33 = vld [vmem:[#allocation40_spill] sm:$0xff] }
 0x2ae   : > { %9204 = vmatprep.mubr.msk.f32.mxu0 %vm291_vm0, %v10745_v35  ;;  %v3078_v35 = vld [vmem:[#allocation2 + $0x1a1] sm:$0xff] }
 0x2b1   : > { %9205 = vmatmul.mubr.msk.f32.gmra.mrb[10].mxu0 %vm291_vm0, %v10750_v37  ;;  %v12655_v37 = vld [vmem:[#allocation14_spill] sm:$0xff] }
 0x2b2   : > { %9207 = vmatprep.mubr.msk.f32.mxu0 %vm291_vm0, %v10755_v39  ;;  %v12656_v39 = vld [vmem:[#allocation15_spill] sm:$0xff] }
 0x2b5   : > { %9208 = vmatmul.mubr.msk.f32.gmra.mrb[12].mxu0 %vm291_vm0, %v10760_v41  ;;  %v12657_v41 = vld [vmem:[#allocation16_spill] sm:$0xff] }
 0x2b6   : > { %9210 = vmatprep.mubr.msk.f32.mxu0 %vm291_vm0, %v10765_v43  ;;  %v12658_v43 = vld [vmem:[#allocation17_spill] sm:$0xff] }
 0x2b9   : > { %9211 = vmatmul.mubr.msk.f32.gmra.mrb[14].mxu0 %vm291_vm0, %v10770_v45  ;;  %v12659_v45 = vld [vmem:[#allocation18_spill] sm:$0xff] }
 0x2ba   : > { %9213 = vmatprep.mubr.msk.f32.mxu0 %vm291_vm0, %v10775_v47  ;;  %v12660_v47 = vld [vmem:[#allocation19_spill] sm:$0xff] }
 0x2bd   : > { %9214 = vmatmul.mubr.msk.f32.gmra.mrb[16].mxu0 %vm291_vm0, %v10780_v49  ;;  %v12661_v49 = vld [vmem:[#allocation20_spill] sm:$0xff] }
 0x2be   : > { %9216 = vmatprep.mubr.msk.f32.mxu0 %vm291_vm0, %v10785_v51  ;;  %v12662_v51 = vld [vmem:[#allocation21_spill] sm:$0xff] }
 0x2c1   : > { %9217 = vmatmul.mubr.msk.f32.gmra.mrb[18].mxu0 %vm291_vm0, %v10790_v53  ;;  %v12663_v53 = vld [vmem:[#allocation22_spill] sm:$0xff] }
 0x2c2   : > { %9219 = vmatprep.mubr.msk.f32.mxu0 %vm291_vm0, %v10795_v55  ;;  %v12664_v55 = vld [vmem:[#allocation23_spill] sm:$0xff] }
 0x2c5   : > { %9220 = vmatmul.mubr.msk.f32.gmra.mrb[20].mxu0 %vm291_vm0, %v10800_v57  ;;  %v12665_v57 = vld [vmem:[#allocation24_spill] sm:$0xff] }
 0x2c6   : > { %9222 = vmatprep.mubr.msk.f32.mxu0 %vm291_vm0, %v10805_v59  ;;  %v12666_v59 = vld [vmem:[#allocation25_spill] sm:$0xff] }
 0x2c9   : > { %9223 = vmatmul.mubr.msk.f32.gmra.mrb[22].mxu0 %vm291_vm0, %v10810_v61  ;;  %v12667_v61 = vld [vmem:[#allocation26_spill] sm:$0xff] }
 0x2ca   : > { %9225 = vmatprep.mubr.msk.f32.mxu0 %vm291_vm0, %v12649_v21 }
 0x2cd   : > { %9226 = vmatmul.mubr.msk.f32.gmra.mrb[24].mxu0 %vm291_vm0, %v12650_v23 }
 0x2ce   : > { %9228 = vmatprep.mubr.msk.f32.mxu0 %vm291_vm0, %v12651_v25 }
 0x2d1   : > { %9229 = vmatmul.mubr.msk.f32.gmra.mrb[26].mxu0 %vm291_vm0, %v12652_v27 }
 0x2d2   : > { %9231 = vmatprep.mubr.msk.f32.mxu0 %vm291_vm0, %v12653_v29 }
 0x2d5   : > { %9232 = vmatmul.mubr.msk.f32.gmra.mrb[28].mxu0 %vm291_vm0, %v12654_v33 }
 0x2d6   : > { %9234 = vmatprep.mubr.msk.f32.mxu0 %vm291_vm0, %v3077_v31 }
 0x2d9   : > { %9235 = vmatmul.mubr.msk.f32.gmra.mrb[30].mxu0 %vm291_vm0, %v3078_v35 }
 0x2da   : > { %9239 = vmatprep.mubr.msk.f32.mxu0 %vm291_vm0, %v12655_v37 }
 0x2dd   : > { %9240 = vmatmul.mubr.msk.f32.vlgmr.msra.gmra.mrb[0].mxu0 %vm291_vm0, %v12656_v39 }
 0x2de   : > { %9242 = vmatprep.mubr.msk.f32.mxu0 %vm291_vm0, %v12657_v41 }
 0x2e1   : > { %9243 = vmatmul.mubr.msk.f32.gmra.mrb[2].mxu0 %vm291_vm0, %v12658_v43 }
 0x2e2   : > { %9245 = vmatprep.mubr.msk.f32.mxu0 %vm291_vm0, %v12659_v45 }
 0x2e5   : > { %9246 = vmatmul.mubr.msk.f32.gmra.mrb[4].mxu0 %vm291_vm0, %v12660_v47 }
 0x2e6   : > { %9248 = vmatprep.mubr.msk.f32.mxu0 %vm291_vm0, %v12661_v49 }
 0x2e9   : > { %9249 = vmatmul.mubr.msk.f32.gmra.mrb[6].mxu0 %vm291_vm0, %v12662_v51 }
 0x2ea   : > { %9251 = vmatprep.mubr.msk.f32.mxu0 %vm291_vm0, %v12663_v53 }
 0x2ed   : > { %9252 = vmatmul.mubr.msk.f32.gmra.mrb[8].mxu0 %vm291_vm0, %v12664_v55 }
 0x2ee   : > { %9254 = vmatprep.mubr.msk.f32.mxu0 %vm291_vm0, %v12665_v57 }
 0x2f1   : > { %9255 = vmatmul.mubr.msk.f32.gmra.mrb[10].mxu0 %vm291_vm0, %v12666_v59 }
 0x2f2   : > { %9257 = vmatprep.mubr.msk.f32.mxu0 %vm291_vm0, %v12667_v61 }
 0x2f5   : > { %9258 = vmatmul.mubr.msk.f32.gmra.mrb[12].mxu0 %vm291_vm0, %v12668_v20 }
 0x2f6   : > { %9260 = vmatprep.mubr.msk.f32.mxu0 %vm291_vm0, %v12669_v22 }
 0x2f9   : > { %9261 = vmatmul.mubr.msk.f32.gmra.mrb[14].mxu0 %vm291_vm0, %v12640_v13 }
 0x2fa   : > { %9263 = vmatprep.mubr.msk.f32.mxu0 %vm291_vm0, %v12670_v24 }
 0x2fd   : > { %9264 = vmatmul.mubr.msk.f32.gmra.mrb[16].mxu0 %vm291_vm0, %v12642_v15 }
 0x2fe   : > { %9266 = vmatprep.mubr.msk.f32.mxu0 %vm291_vm0, %v12643_v17 }
 0x301   : > { %9267 = vmatmul.mubr.msk.f32.gmra.mrb[18].mxu0 %vm291_vm0, %v12644_v19 }
 0x302   : > { %9269 = vmatprep.mubr.msk.f32.mxu0 %vm291_vm0, %v12671_v26 }
 0x305   : > { %9270 = vmatmul.mubr.msk.f32.gmra.mrb[20].mxu0 %vm291_vm0, %v12646_v11 }
 0x306   : > { %9272 = vmatprep.mubr.msk.f32.mxu0 %vm291_vm0, %v12672_v28 }
 0x309   : > { %9273 = vmatmul.mubr.msk.f32.gmra.mrb[22].mxu0 %vm291_vm0, %v11077_v4  ;;  %v3468_v4 = vld [vmem:[#allocation2 + $0x1a2] sm:$0xff] }
 0x30a   : > { %9275 = vmatprep.mubr.msk.f32.mxu0 %vm291_vm0, %v12648_v63  ;;  %v7930_v63 = vld [vmem:[%s12467_s3 + $0x4] sm:$0xf] }
 0x30b   : > { %9287 = vmatprep.subr.msk.mxu1 %vm543_vm2, %v7930_v63 }
 0x30c   : > { %9288 = vmatpush3.msk.msra.mxu1 %vm543_vm2, %v7930_v63 }
 0x30d   : > { %9276 = vmatmul.mubr.msk.f32.gmra.mrb[24].mxu0 %vm291_vm0, %v11085_v2  ;;  %v4018_v2 = vld [vmem:[#allocation3 + $0x1] sm:$0xff]  ;;  %9337 = vmatprep.subr.msk.mxu1 %vm543_vm2, %v4017_v34 }
 0x30e   : > { %9278 = vmatprep.mubr.msk.f32.mxu0 %vm291_vm0, %v12673_v30  ;;  %9289 = vmatprep.mubr.msk.f32.mxu1 %vm291_vm0, %v4018_v2 }
 0x311   : > { %9279 = vmatmul.mubr.msk.f32.gmra.mrb[26].mxu0 %vm291_vm0, %v11093_v8 }
 0x312   : > { %9281 = vmatprep.mubr.msk.f32.mxu0 %vm291_vm0, %v11309_v1  ;;  %v4019_v1 = vld [vmem:[#allocation3 + $0x9] sm:$0xff] }
 0x313   : > { %9290 = vmatmul.mubr.msk.f32.vlgmr.msra.gmra.mrb[0].mxu1 %vm291_vm0, %v4019_v1 }
 0x314   : > { %9338 = vmatpush3.msk.msra.mxu1 %vm543_vm2, %v4017_v34 }
 0x315   : > { %9282 = vmatmul.mubr.msk.f32.gmra.mrb[28].mxu0 %vm291_vm0, %v11313_v10  ;;  %9387 = vmatprep.subr.msk.mxu1 %vm543_vm2, %v11521_v36 }
 0x316   : > { %9284 = vmatprep.mubr.msk.f32.mxu0 %vm291_vm0, %v3467_v32 }
 0x319   : > { %9285 = vmatmul.mubr.msk.f32.gmra.mrb[30].mxu0 %vm291_vm0, %v3468_v4 }
 0x3b0   : > { %v9241_v40 = vpop.f32.mrb[0].mxu0 }
 0x3b1   : > { %v3835_v42 = vadd.f32 %v9241_v40, %v11528_v38  ;;  %v3636_v44 = vpop.f32.mrb[1].mxu0 }
 0x3b2   : > { %v3834_v46 = vadd.f32 %v11528_v38, %v3636_v44 }
 0x3b3   : > { %v3867_v50 = vmax.f32 %v3835_v42, 0.0 }
 0x3b4   : > { %v3866_v52 = vmax.f32 %v3834_v46, 0.0  ;;  %v9244_v56 = vpop.f32.mrb[2].mxu0 }
 0x3b5   : > { %3954 = vst.msk [vmem:[#allocation3 + $0x21] sm:$0xff] %vm291_vm0, %v3867_v50  ;;  %v3837_v58 = vadd.f32 %v9244_v56, %v11528_v38  ;;  %v3646_v60 = vpop.f32.mrb[3].mxu0 }
 0x3b6   : > { %3953 = vst.msk [vmem:[#allocation3 + $0x19] sm:$0xff] %vm291_vm0, %v3866_v52  ;;  %v3836_v62 = vadd.f32 %v11528_v38, %v3646_v60 }
 0x3b7   : > { %v3869_v0 = vmax.f32 %v3837_v58, 0.0 }
 0x3b8   : > { %v3868_v3 = vmax.f32 %v3836_v62, 0.0  ;;  %v9247_v48 = vpop.f32.mrb[4].mxu0 }
 0x3b9   : > { %3956 = vst.msk [vmem:[#allocation3 + $0x39] sm:$0xff] %vm291_vm0, %v3869_v0  ;;  %v3839_v54 = vadd.f32 %v9247_v48, %v11528_v38  ;;  %v3656_v8 = vpop.f32.mrb[5].mxu0 }
 0x3ba   : > { %3955 = vst.msk [vmem:[#allocation3 + $0x31] sm:$0xff] %vm291_vm0, %v3868_v3  ;;  %v3838_v5 = vadd.f32 %v11528_v38, %v3656_v8 }
 0x3bb   : > { %v3871_v9 = vmax.f32 %v3839_v54, 0.0 }
 0x3bc   : > { %v3870_v13 = vmax.f32 %v3838_v5, 0.0  ;;  %v9250_v15 = vpop.f32.mrb[6].mxu0  ;;  %v11548_v10 = vld [vmem:[#allocation3 + $0x21] sm:$0xff] }
 0x3bd   : > { %3958 = vst.msk [vmem:[#allocation3 + $0x51] sm:$0xff] %vm291_vm0, %v3871_v9  ;;  %v3841_v17 = vadd.f32 %v9250_v15, %v11528_v38  ;;  %v3666_v6 = vpop.f32.mrb[7].mxu0  ;;  %v11542_v19 = vld [vmem:[#allocation3 + $0x19] sm:$0xff] }
 0x3be   : > { %3957 = vst.msk [vmem:[#allocation3 + $0x49] sm:$0xff] %vm291_vm0, %v3870_v13  ;;  %v3840_v11 = vadd.f32 %v11528_v38, %v3666_v6  ;;  %9292 = vmatprep.mubr.msk.f32.mxu1 %vm291_vm0, %v11542_v19 }
 0x3bf   : > { %v3873_v12 = vmax.f32 %v3841_v17, 0.0  ;;  %9293 = vmatmul.mubr.msk.f32.gmra.mrb[2].mxu1 %vm291_vm0, %v11548_v10 }
 0x3c0   : > { %v3872_v14 = vmax.f32 %v3840_v11, 0.0  ;;  %v9253_v7 = vpop.f32.mrb[8].mxu0  ;;  %v11560_v25 = vld [vmem:[#allocation3 + $0x39] sm:$0xff] }
 0x3c1   : > { %3960 = vst.msk [vmem:[#allocation3 + $0x69] sm:$0xff] %vm291_vm0, %v3873_v12  ;;  %v3843_v16 = vadd.f32 %v9253_v7, %v11528_v38  ;;  %v3676_v18 = vpop.f32.mrb[9].mxu0  ;;  %v11554_v21 = vld [vmem:[#allocation3 + $0x31] sm:$0xff] }
 0x3c2   : > { %3959 = vst.msk [vmem:[#allocation3 + $0x61] sm:$0xff] %vm291_vm0, %v3872_v14  ;;  %v3842_v23 = vadd.f32 %v11528_v38, %v3676_v18  ;;  %9295 = vmatprep.mubr.msk.f32.mxu1 %vm291_vm0, %v11554_v21 }
 0x3c3   : > { %v3875_v27 = vmax.f32 %v3843_v16, 0.0  ;;  %9296 = vmatmul.mubr.msk.f32.gmra.mrb[4].mxu1 %vm291_vm0, %v11560_v25 }
 0x3c4   : > { %v3874_v29 = vmax.f32 %v3842_v23, 0.0  ;;  %v9256_v31 = vpop.f32.mrb[10].mxu0  ;;  %v11572_v41 = vld [vmem:[#allocation3 + $0x51] sm:$0xff] }
 0x3c5   : > { %3962 = vst.msk [vmem:[#allocation3 + $0x81] sm:$0xff] %vm291_vm0, %v3875_v27  ;;  %v3845_v33 = vadd.f32 %v9256_v31, %v11528_v38  ;;  %v3686_v35 = vpop.f32.mrb[11].mxu0  ;;  %v11566_v37 = vld [vmem:[#allocation3 + $0x49] sm:$0xff] }
 0x3c6   : > { %3961 = vst.msk [vmem:[#allocation3 + $0x79] sm:$0xff] %vm291_vm0, %v3874_v29  ;;  %v3844_v39 = vadd.f32 %v11528_v38, %v3686_v35  ;;  %9298 = vmatprep.mubr.msk.f32.mxu1 %vm291_vm0, %v11566_v37 }
 0x3c7   : > { %v3877_v43 = vmax.f32 %v3845_v33, 0.0  ;;  %9299 = vmatmul.mubr.msk.f32.gmra.mrb[6].mxu1 %vm291_vm0, %v11572_v41 }
 0x3c8   : > { %v3876_v45 = vmax.f32 %v3844_v39, 0.0  ;;  %v9259_v47 = vpop.f32.mrb[12].mxu0  ;;  %v11584_v57 = vld [vmem:[#allocation3 + $0x69] sm:$0xff] }
 0x3c9   : > { %3964 = vst.msk [vmem:[#allocation3 + $0x99] sm:$0xff] %vm291_vm0, %v3877_v43  ;;  %v3847_v49 = vadd.f32 %v9259_v47, %v11528_v38  ;;  %v3696_v51 = vpop.f32.mrb[13].mxu0  ;;  %v11578_v53 = vld [vmem:[#allocation3 + $0x61] sm:$0xff] }
 0x3ca   : > { %3963 = vst.msk [vmem:[#allocation3 + $0x91] sm:$0xff] %vm291_vm0, %v3876_v45  ;;  %v3846_v55 = vadd.f32 %v11528_v38, %v3696_v51  ;;  %9301 = vmatprep.mubr.msk.f32.mxu1 %vm291_vm0, %v11578_v53 }
 0x3cb   : > { %v3879_v59 = vmax.f32 %v3847_v49, 0.0  ;;  %9302 = vmatmul.mubr.msk.f32.gmra.mrb[8].mxu1 %vm291_vm0, %v11584_v57 }
 0x3cc   : > { %v3878_v61 = vmax.f32 %v3846_v55, 0.0  ;;  %v9262_v20 = vpop.f32.mrb[14].mxu0  ;;  %v11596_v30 = vld [vmem:[#allocation3 + $0x81] sm:$0xff] }
 0x3cd   : > { %3966 = vst.msk [vmem:[#allocation3 + $0xb1] sm:$0xff] %vm291_vm0, %v3879_v59  ;;  %v3849_v22 = vadd.f32 %v9262_v20, %v11528_v38  ;;  %v3706_v24 = vpop.f32.mrb[15].mxu0  ;;  %v11590_v26 = vld [vmem:[#allocation3 + $0x79] sm:$0xff] }
 0x3ce   : > { %3965 = vst.msk [vmem:[#allocation3 + $0xa9] sm:$0xff] %vm291_vm0, %v3878_v61  ;;  %v3848_v28 = vadd.f32 %v11528_v38, %v3706_v24  ;;  %9304 = vmatprep.mubr.msk.f32.mxu1 %vm291_vm0, %v11590_v26 }
 0x3cf   : > { %v3881_v32 = vmax.f32 %v3849_v22, 0.0  ;;  %9305 = vmatmul.mubr.msk.f32.gmra.mrb[10].mxu1 %vm291_vm0, %v11596_v30 }
 0x3d0   : > { %v3880_v4 = vmax.f32 %v3848_v28, 0.0  ;;  %v9265_v63 = vpop.f32.mrb[16].mxu0  ;;  %v11608_v42 = vld [vmem:[#allocation3 + $0x99] sm:$0xff] }
 0x3d1   : > { %3968 = vst.msk [vmem:[#allocation3 + $0xc9] sm:$0xff] %vm291_vm0, %v3881_v32  ;;  %v3851_v2 = vadd.f32 %v9265_v63, %v11528_v38  ;;  %v3716_v1 = vpop.f32.mrb[17].mxu0  ;;  %v11602_v34 = vld [vmem:[#allocation3 + $0x91] sm:$0xff] }
 0x3d2   : > { %3967 = vst.msk [vmem:[#allocation3 + $0xc1] sm:$0xff] %vm291_vm0, %v3880_v4  ;;  %v3850_v40 = vadd.f32 %v11528_v38, %v3716_v1  ;;  %9307 = vmatprep.mubr.msk.f32.mxu1 %vm291_vm0, %v11602_v34 }
 0x3d3   : > { %v3883_v44 = vmax.f32 %v3851_v2, 0.0  ;;  %9308 = vmatmul.mubr.msk.f32.gmra.mrb[12].mxu1 %vm291_vm0, %v11608_v42 }
 0x3d4   : > { %v3882_v46 = vmax.f32 %v3850_v40, 0.0  ;;  %v9268_v50 = vpop.f32.mrb[18].mxu0  ;;  %v11620_v62 = vld [vmem:[#allocation3 + $0xb1] sm:$0xff] }
 0x3d5   : > { %3970 = vst.msk [vmem:[#allocation3 + $0xe1] sm:$0xff] %vm291_vm0, %v3883_v44  ;;  %v3853_v52 = vadd.f32 %v9268_v50, %v11528_v38  ;;  %v3726_v56 = vpop.f32.mrb[19].mxu0  ;;  %v11614_v58 = vld [vmem:[#allocation3 + $0xa9] sm:$0xff] }
 0x3d6   : > { %3969 = vst.msk [vmem:[#allocation3 + $0xd9] sm:$0xff] %vm291_vm0, %v3882_v46  ;;  %v3852_v60 = vadd.f32 %v11528_v38, %v3726_v56  ;;  %9310 = vmatprep.mubr.msk.f32.mxu1 %vm291_vm0, %v11614_v58 }
 0x3d7   : > { %v3885_v0 = vmax.f32 %v3853_v52, 0.0  ;;  %9311 = vmatmul.mubr.msk.f32.gmra.mrb[14].mxu1 %vm291_vm0, %v11620_v62 }
 0x3d8   : > { %v3884_v3 = vmax.f32 %v3852_v60, 0.0  ;;  %v9271_v48 = vpop.f32.mrb[20].mxu0  ;;  %v11632_v13 = vld [vmem:[#allocation3 + $0xc9] sm:$0xff] }
 0x3d9   : > { %3972 = vst.msk [vmem:[#allocation3 + $0xf9] sm:$0xff] %vm291_vm0, %v3885_v0  ;;  %v3855_v54 = vadd.f32 %v9271_v48, %v11528_v38  ;;  %v3736_v8 = vpop.f32.mrb[21].mxu0  ;;  %v11626_v5 = vld [vmem:[#allocation3 + $0xc1] sm:$0xff] }
 0x3da   : > { %3971 = vst.msk [vmem:[#allocation3 + $0xf1] sm:$0xff] %vm291_vm0, %v3884_v3  ;;  %v3854_v9 = vadd.f32 %v11528_v38, %v3736_v8  ;;  %9313 = vmatprep.mubr.msk.f32.mxu1 %vm291_vm0, %v11626_v5  ;;  %v3985_v8 = vld [vmem:[#allocation3] sm:$0xff] }
 0x3db   : > { %v3887_v15 = vmax.f32 %v3855_v54, 0.0  ;;  %9314 = vmatmul.mubr.msk.f32.gmra.mrb[16].mxu1 %vm291_vm0, %v11632_v13 }
 0x3dc   : > { %v3886_v17 = vmax.f32 %v3854_v9, 0.0  ;;  %v9274_v6 = vpop.f32.mrb[22].mxu0  ;;  %v11644_v16 = vld [vmem:[#allocation3 + $0xe1] sm:$0xff] }
 0x3dd   : > { %3974 = vst.msk [vmem:[#allocation3 + $0x111] sm:$0xff] %vm291_vm0, %v3887_v15  ;;  %v3857_v11 = vadd.f32 %v9274_v6, %v11528_v38  ;;  %v3746_v12 = vpop.f32.mrb[23].mxu0  ;;  %v11638_v14 = vld [vmem:[#allocation3 + $0xd9] sm:$0xff]  ;;  %v3986_v15 = vld [vmem:[#allocation3 + $0x8] sm:$0xff] }
 0x3de   : > { %3973 = vst.msk [vmem:[#allocation3 + $0x109] sm:$0xff] %vm291_vm0, %v3886_v17  ;;  %v3856_v7 = vadd.f32 %v11528_v38, %v3746_v12  ;;  %9316 = vmatprep.mubr.msk.f32.mxu1 %vm291_vm0, %v11638_v14  ;;  %v11718_v17 = vld [vmem:[%s12467_s3 + $0xc] sm:$0xf]  ;;  %v11733_v12 = vld [vmem:[#allocation3 + $0x30] sm:$0xff] }
 0x3df   : > { %v3889_v18 = vmax.f32 %v3857_v11, 0.0  ;;  %9317 = vmatmul.mubr.msk.f32.gmra.mrb[18].mxu1 %vm291_vm0, %v11644_v16  ;;  %v11721_v6 = vld [vmem:[#allocation3 + $0x18] sm:$0xff]  ;;  %v11729_v11 = vld [vmem:[#allocation3 + $0x20] sm:$0xff] }
 0x3e0   : > { %v3888_v23 = vmax.f32 %v3856_v7, 0.0  ;;  %v9277_v27 = vpop.f32.mrb[24].mxu0  ;;  %v11656_v39 = vld [vmem:[#allocation3 + $0xf9] sm:$0xff] }
 0x3e1   : > { %3976 = vst.msk [vmem:[#allocation3 + $0x129] sm:$0xff] %vm291_vm0, %v3889_v18  ;;  %v3859_v29 = vadd.f32 %v9277_v27, %v11528_v38  ;;  %v3756_v31 = vpop.f32.mrb[25].mxu0  ;;  %v11650_v33 = vld [vmem:[#allocation3 + $0xf1] sm:$0xff]  ;;  %v11753_v27 = vld [vmem:[#allocation3 + $0x68] sm:$0xff] }
 0x3e2   : > { %3975 = vst.msk [vmem:[#allocation3 + $0x121] sm:$0xff] %vm291_vm0, %v3888_v23  ;;  %v3858_v35 = vadd.f32 %v11528_v38, %v3756_v31  ;;  %9319 = vmatprep.mubr.msk.f32.mxu1 %vm291_vm0, %v11650_v33  ;;  %v11737_v7 = vld [vmem:[#allocation3 + $0x38] sm:$0xff]  ;;  %v11745_v18 = vld [vmem:[#allocation3 + $0x50] sm:$0xff]  ;;  %v11749_v23 = vld [vmem:[#allocation3 + $0x60] sm:$0xff] }
 0x3e3   : > { %v3891_v43 = vmax.f32 %v3859_v29, 0.0  ;;  %9320 = vmatmul.mubr.msk.f32.gmra.mrb[20].mxu1 %vm291_vm0, %v11656_v39  ;;  %v11757_v29 = vld [vmem:[#allocation3 + $0x78] sm:$0xff]  ;;  %v11761_v31 = vld [vmem:[#allocation3 + $0x80] sm:$0xff] }
 0x3e4   : > { %v3890_v45 = vmax.f32 %v3858_v35, 0.0  ;;  %v9280_v47 = vpop.f32.mrb[26].mxu0  ;;  %v11668_v61 = vld [vmem:[#allocation3 + $0x111] sm:$0xff] }
 0x3e5   : > { %3978 = vst.msk [vmem:[#allocation3 + $0x141] sm:$0xff] %vm291_vm0, %v3891_v43  ;;  %v3861_v49 = vadd.f32 %v9280_v47, %v11528_v38  ;;  %v3766_v51 = vpop.f32.mrb[27].mxu0  ;;  %v11662_v55 = vld [vmem:[#allocation3 + $0x109] sm:$0xff]  ;;  %v11769_v43 = vld [vmem:[#allocation3 + $0x98] sm:$0xff] }
 0x3e6   : > { %3977 = vst.msk [vmem:[#allocation3 + $0x139] sm:$0xff] %vm291_vm0, %v3890_v45  ;;  %v3860_v59 = vadd.f32 %v11528_v38, %v3766_v51  ;;  %9322 = vmatprep.mubr.msk.f32.mxu1 %vm291_vm0, %v11662_v55  ;;  %v11765_v35 = vld [vmem:[#allocation3 + $0x90] sm:$0xff]  ;;  %v11773_v45 = vld [vmem:[#allocation3 + $0xa8] sm:$0xff] }
 0x3e7   : > { %v3893_v20 = vmax.f32 %v3861_v49, 0.0  ;;  %9323 = vmatmul.mubr.msk.f32.gmra.mrb[22].mxu1 %vm291_vm0, %v11668_v61  ;;  %v11777_v47 = vld [vmem:[#allocation3 + $0xb0] sm:$0xff]  ;;  %v11781_v49 = vld [vmem:[#allocation3 + $0xc0] sm:$0xff]  ;;  %v11785_v51 = vld [vmem:[#allocation3 + $0xc8] sm:$0xff] }
 0x3e8   : > { %v3892_v22 = vmax.f32 %v3860_v59, 0.0  ;;  %v9283_v24 = vpop.f32.mrb[28].mxu0  ;;  %v11680_v2 = vld [vmem:[#allocation3 + $0x129] sm:$0xff]  ;;  %v11789_v59 = vld [vmem:[#allocation3 + $0xd8] sm:$0xff] }
 0x3e9   : > { %3980 = vst.msk [vmem:[#allocation3 + $0x159] sm:$0xff] %vm291_vm0, %v3893_v20  ;;  %v3863_v28 = vadd.f32 %v9283_v24, %v11528_v38  ;;  %v3776_v32 = vpop.f32.mrb[29].mxu0  ;;  %v11674_v4 = vld [vmem:[#allocation3 + $0x121] sm:$0xff]  ;;  %v11801_v24 = vld [vmem:[#allocation3 + $0xf8] sm:$0xff] }
 0x3ea   : > { %3979 = vst.msk [vmem:[#allocation3 + $0x151] sm:$0xff] %vm291_vm0, %v3892_v22  ;;  %v3862_v63 = vadd.f32 %v11528_v38, %v3776_v32  ;;  %9325 = vmatprep.mubr.msk.f32.mxu1 %vm291_vm0, %v11674_v4  ;;  %v11793_v20 = vld [vmem:[#allocation3 + $0xe0] sm:$0xff]  ;;  %v11797_v22 = vld [vmem:[#allocation3 + $0xf0] sm:$0xff] }
 0x3eb   : > { %v3895_v1 = vmax.f32 %v3863_v28, 0.0  ;;  %9326 = vmatmul.mubr.msk.f32.gmra.mrb[24].mxu1 %vm291_vm0, %v11680_v2  ;;  %v11805_v28 = vld [vmem:[#allocation3 + $0x108] sm:$0xff]  ;;  %v11809_v32 = vld [vmem:[#allocation3 + $0x110] sm:$0xff] }
 0x3ec   : > { %v3894_v40 = vmax.f32 %v3862_v63, 0.0  ;;  %v9286_v44 = vpop.f32.mrb[30].mxu0  ;;  %v11692_v60 = vld [vmem:[#allocation3 + $0x141] sm:$0xff] }
 0x3ed   : > { %3982 = vst.msk [vmem:[#allocation3 + $0x171] sm:$0xff] %vm291_vm0, %v3895_v1  ;;  %v3865_v46 = vadd.f32 %v9286_v44, %v11528_v38  ;;  %v3786_v50 = vpop.f32.mrb[31].mxu0  ;;  %v11686_v52 = vld [vmem:[#allocation3 + $0x139] sm:$0xff]  ;;  %v11817_v1 = vld [vmem:[#allocation3 + $0x128] sm:$0xff] }
 0x3ee   : > { %3981 = vst.msk [vmem:[#allocation3 + $0x169] sm:$0xff] %vm291_vm0, %v3894_v40  ;;  %v3864_v56 = vadd.f32 %v11528_v38, %v3786_v50  ;;  %9328 = vmatprep.mubr.msk.f32.mxu1 %vm291_vm0, %v11686_v52  ;;  %v11813_v63 = vld [vmem:[#allocation3 + $0x120] sm:$0xff]  ;;  %v11821_v40 = vld [vmem:[#allocation3 + $0x138] sm:$0xff] }
 0x3ef   : > { %v3897_v0 = vmax.f32 %v3865_v46, 0.0  ;;  %9329 = vmatmul.mubr.msk.f32.gmra.mrb[26].mxu1 %vm291_vm0, %v11692_v60  ;;  %v11825_v44 = vld [vmem:[#allocation3 + $0x140] sm:$0xff] }
 0x3f0   : > { %v3896_v3 = vmax.f32 %v3864_v56, 0.0  ;;  %v11702_v38 = vld [vmem:[#allocation3 + $0x159] sm:$0xff] }
 0x3f1   : > { %3984 = vst.msk [vmem:[#allocation3 + $0x189] sm:$0xff] %vm291_vm0, %v3897_v0  ;;  %v11697_v48 = vld [vmem:[#allocation3 + $0x151] sm:$0xff]  ;;  %v4700_v0 = vld [vmem:[#allocation3 + $0x2] sm:$0xff] }
 0x3f2   : > { %3983 = vst.msk [vmem:[#allocation3 + $0x181] sm:$0xff] %vm291_vm0, %v3896_v3  ;;  %9331 = vmatprep.mubr.msk.f32.mxu1 %vm291_vm0, %v11697_v48  ;;  %v11829_v46 = vld [vmem:[#allocation3 + $0x150] sm:$0xff]  ;;  %v11833_v50 = vld [vmem:[#allocation3 + $0x158] sm:$0xff] }
 0x3f3   : > { %9332 = vmatmul.mubr.msk.f32.gmra.mrb[28].mxu1 %vm291_vm0, %v11702_v38 }
 0x3f4   : > { %v11710_v9 = vld [vmem:[#allocation3 + $0x171] sm:$0xff] }
 0x3f5   : > { %v11706_v54 = vld [vmem:[#allocation3 + $0x169] sm:$0xff]  ;;  %12675 = vst [vmem:[#allocation13_spill] sm:$0xff] %v11710_v9 }
 0x3f6   : > { %12674 = vst [vmem:[#allocation12_spill] sm:$0xff] %v11706_v54  ;;  %9334 = vmatprep.mubr.msk.f32.mxu1 %vm291_vm0, %v11706_v54  ;;  %v11837_v56 = vld [vmem:[#allocation3 + $0x168] sm:$0xff]  ;;  %v11841_v3 = vld [vmem:[#allocation3 + $0x170] sm:$0xff] }
 0x3f7   : > { %9335 = vmatmul.mubr.msk.f32.gmra.mrb[30].mxu1 %vm291_vm0, %v11710_v9  ;;  %v11852_v9 = vld [vmem:[#allocation3 + $0x1a] sm:$0xff]  ;;  %v11864_v54 = vld [vmem:[#allocation3 + $0x32] sm:$0xff] }
 0x3f8   : > { %9339 = vmatprep.mubr.msk.f32.mxu1 %vm291_vm0, %v3985_v8  ;;  %v4701_v8 = vld [vmem:[#allocation3 + $0xa] sm:$0xff]  ;;  %12676 = vst [vmem:[#allocation29_spill] sm:$0xff] %v11852_v9  ;;  %12678 = vst [vmem:[#allocation32_spill] sm:$0xff] %v11864_v54 }
 0x3fb   : > { %9340 = vmatmul.mubr.msk.f32.vlgmr.msra.gmra.mrb[0].mxu1 %vm291_vm0, %v3986_v15  ;;  %v11849_v15 = vld [vmem:[%s12467_s3 + $0x10] sm:$0xf] }
 0x3fc   : > { %9388 = vmatpush3.msk.msra.mxu1 %vm543_vm2, %v11521_v36  ;;  %9342 = vmatprep.mubr.msk.f32.mxu1 %vm291_vm0, %v11721_v6  ;;  %v11741_v36 = vld [vmem:[#allocation3 + $0x48] sm:$0xff] }
 0x3fd   : > { %9437 = vmatprep.subr.msk.mxu1 %vm543_vm2, %v11718_v17 }
 0x3ff   : > { %9343 = vmatmul.mubr.msk.f32.gmra.mrb[2].mxu1 %vm291_vm0, %v11729_v11 }
 0x400   : > { %9345 = vmatprep.mubr.msk.f32.mxu1 %vm291_vm0, %v11733_v12 }
 0x403   : > { %9346 = vmatmul.mubr.msk.f32.gmra.mrb[4].mxu1 %vm291_vm0, %v11737_v7 }
 0x404   : > { %9348 = vmatprep.mubr.msk.f32.mxu1 %vm291_vm0, %v11741_v36 }
 0x407   : > { %9349 = vmatmul.mubr.msk.f32.gmra.mrb[6].mxu1 %vm291_vm0, %v11745_v18 }
 0x408   : > { %9351 = vmatprep.mubr.msk.f32.mxu1 %vm291_vm0, %v11749_v23 }
 0x40b   : > { %9352 = vmatmul.mubr.msk.f32.gmra.mrb[8].mxu1 %vm291_vm0, %v11753_v27 }
 0x40c   : > { %9354 = vmatprep.mubr.msk.f32.mxu1 %vm291_vm0, %v11757_v29 }
 0x40f   : > { %9355 = vmatmul.mubr.msk.f32.gmra.mrb[10].mxu1 %vm291_vm0, %v11761_v31 }
 0x410   : > { %9357 = vmatprep.mubr.msk.f32.mxu1 %vm291_vm0, %v11765_v35 }
 0x413   : > { %9358 = vmatmul.mubr.msk.f32.gmra.mrb[12].mxu1 %vm291_vm0, %v11769_v43 }
 0x414   : > { %9360 = vmatprep.mubr.msk.f32.mxu1 %vm291_vm0, %v11773_v45 }
 0x417   : > { %9361 = vmatmul.mubr.msk.f32.gmra.mrb[14].mxu1 %vm291_vm0, %v11777_v47 }
 0x418   : > { %9363 = vmatprep.mubr.msk.f32.mxu1 %vm291_vm0, %v11781_v49 }
 0x41b   : > { %9364 = vmatmul.mubr.msk.f32.gmra.mrb[16].mxu1 %vm291_vm0, %v11785_v51 }
 0x41c   : > { %9366 = vmatprep.mubr.msk.f32.mxu1 %vm291_vm0, %v11789_v59 }
 0x41f   : > { %9367 = vmatmul.mubr.msk.f32.gmra.mrb[18].mxu1 %vm291_vm0, %v11793_v20 }
 0x420   : > { %9369 = vmatprep.mubr.msk.f32.mxu1 %vm291_vm0, %v11797_v22 }
 0x423   : > { %9370 = vmatmul.mubr.msk.f32.gmra.mrb[20].mxu1 %vm291_vm0, %v11801_v24 }
 0x424   : > { %9372 = vmatprep.mubr.msk.f32.mxu1 %vm291_vm0, %v11805_v28 }
 0x427   : > { %9373 = vmatmul.mubr.msk.f32.gmra.mrb[22].mxu1 %vm291_vm0, %v11809_v32 }
 0x428   : > { %9375 = vmatprep.mubr.msk.f32.mxu1 %vm291_vm0, %v11813_v63 }
 0x42b   : > { %9376 = vmatmul.mubr.msk.f32.gmra.mrb[24].mxu1 %vm291_vm0, %v11817_v1 }
 0x42c   : > { %9378 = vmatprep.mubr.msk.f32.mxu1 %vm291_vm0, %v11821_v40 }
 0x42f   : > { %9379 = vmatmul.mubr.msk.f32.gmra.mrb[26].mxu1 %vm291_vm0, %v11825_v44 }
 0x430   : > { %9381 = vmatprep.mubr.msk.f32.mxu1 %vm291_vm0, %v11829_v46 }
 0x433   : > { %9382 = vmatmul.mubr.msk.f32.gmra.mrb[28].mxu1 %vm291_vm0, %v11833_v50 }
 0x434   : > { %9384 = vmatprep.mubr.msk.f32.mxu1 %vm291_vm0, %v11837_v56 }
 0x437   : > { %9385 = vmatmul.mubr.msk.f32.gmra.mrb[30].mxu1 %vm291_vm0, %v11841_v3 }
 0x438   : > { %9389 = vmatprep.mubr.msk.f32.mxu1 %vm291_vm0, %v4700_v0  ;;  %v11860_v0 = vld [vmem:[#allocation3 + $0x22] sm:$0xff] }
 0x439   : > { %12677 = vst [vmem:[#allocation31_spill] sm:$0xff] %v11860_v0 }
 0x43b   : > { %9390 = vmatmul.mubr.msk.f32.vlgmr.msra.gmra.mrb[0].mxu1 %vm291_vm0, %v4701_v8  ;;  %v11868_v8 = vld [vmem:[#allocation3 + $0x3a] sm:$0xff] }
 0x43c   : > { %9438 = vmatpush3.msk.msra.mxu1 %vm543_vm2, %v11718_v17  ;;  %9392 = vmatprep.mubr.msk.f32.mxu1 %vm291_vm0, %v11852_v9  ;;  %12679 = vst [vmem:[#allocation33_spill] sm:$0xff] %v11868_v8  ;;  %v11872_v17 = vld [vmem:[#allocation3 + $0x4a] sm:$0xff]  ;;  %v11876_v9 = vld [vmem:[#allocation3 + $0x52] sm:$0xff] }
 0x43d   : > { %9487 = vmatprep.subr.msk.mxu1 %vm543_vm2, %v11849_v15  ;;  %12680 = vst [vmem:[#allocation35_spill] sm:$0xff] %v11872_v17  ;;  %12681 = vst [vmem:[#allocation37_spill] sm:$0xff] %v11876_v9 }
 0x43f   : > { %9393 = vmatmul.mubr.msk.f32.gmra.mrb[2].mxu1 %vm291_vm0, %v11860_v0  ;;  %v11880_v0 = vld [vmem:[#allocation3 + $0x62] sm:$0xff] }
 0x440   : > { %9395 = vmatprep.mubr.msk.f32.mxu1 %vm291_vm0, %v11864_v54  ;;  %12682 = vst [vmem:[#allocation8_spill] sm:$0xff] %v11880_v0  ;;  %v11884_v54 = vld [vmem:[#allocation3 + $0x6a] sm:$0xff] }
 0x441   : > { %12683 = vst [vmem:[#allocation9_spill] sm:$0xff] %v11884_v54 }
 0x443   : > { %9396 = vmatmul.mubr.msk.f32.gmra.mrb[4].mxu1 %vm291_vm0, %v11868_v8  ;;  %v11888_v8 = vld [vmem:[#allocation3 + $0x7a] sm:$0xff] }
 0x444   : > { %9398 = vmatprep.mubr.msk.f32.mxu1 %vm291_vm0, %v11872_v17  ;;  %12684 = vst [vmem:[#allocation10_spill] sm:$0xff] %v11888_v8  ;;  %v11892_v17 = vld [vmem:[#allocation3 + $0x82] sm:$0xff] }
 0x445   : > { %12685 = vst [vmem:[#allocation11_spill] sm:$0xff] %v11892_v17 }
 0x447   : > { %9399 = vmatmul.mubr.msk.f32.gmra.mrb[6].mxu1 %vm291_vm0, %v11876_v9  ;;  %v11896_v9 = vld [vmem:[#allocation3 + $0x92] sm:$0xff] }
 0x448   : > { %9401 = vmatprep.mubr.msk.f32.mxu1 %vm291_vm0, %v11880_v0  ;;  %12686 = vst [vmem:[#allocation39_spill] sm:$0xff] %v11896_v9  ;;  %v11900_v0 = vld [vmem:[#allocation3 + $0x9a] sm:$0xff] }
 0x449   : > { %12687 = vst [vmem:[#allocation40_spill] sm:$0xff] %v11900_v0 }
 0x44b   : > { %9402 = vmatmul.mubr.msk.f32.gmra.mrb[8].mxu1 %vm291_vm0, %v11884_v54  ;;  %v11904_v54 = vld [vmem:[#allocation3 + $0xaa] sm:$0xff] }
 0x44c   : > { %9404 = vmatprep.mubr.msk.f32.mxu1 %vm291_vm0, %v11888_v8  ;;  %12688 = vst [vmem:[#allocation14_spill] sm:$0xff] %v11904_v54  ;;  %v11908_v8 = vld [vmem:[#allocation3 + $0xb2] sm:$0xff] }
 0x44d   : > { %12689 = vst [vmem:[#allocation15_spill] sm:$0xff] %v11908_v8 }
 0x44f   : > { %9405 = vmatmul.mubr.msk.f32.gmra.mrb[10].mxu1 %vm291_vm0, %v11892_v17  ;;  %v11912_v17 = vld [vmem:[#allocation3 + $0xc2] sm:$0xff] }
 0x450   : > { %9407 = vmatprep.mubr.msk.f32.mxu1 %vm291_vm0, %v11896_v9  ;;  %12690 = vst [vmem:[#allocation16_spill] sm:$0xff] %v11912_v17  ;;  %v11916_v9 = vld [vmem:[#allocation3 + $0xca] sm:$0xff] }
 0x451   : > { %12691 = vst [vmem:[#allocation17_spill] sm:$0xff] %v11916_v9 }
 0x453   : > { %9408 = vmatmul.mubr.msk.f32.gmra.mrb[12].mxu1 %vm291_vm0, %v11900_v0  ;;  %v11920_v0 = vld [vmem:[#allocation3 + $0xda] sm:$0xff] }
 0x454   : > { %9410 = vmatprep.mubr.msk.f32.mxu1 %vm291_vm0, %v11904_v54  ;;  %12692 = vst [vmem:[#allocation18_spill] sm:$0xff] %v11920_v0  ;;  %v11924_v54 = vld [vmem:[#allocation3 + $0xe2] sm:$0xff] }
 0x455   : > { %12693 = vst [vmem:[#allocation19_spill] sm:$0xff] %v11924_v54 }
 0x457   : > { %9411 = vmatmul.mubr.msk.f32.gmra.mrb[14].mxu1 %vm291_vm0, %v11908_v8  ;;  %v11928_v8 = vld [vmem:[#allocation3 + $0xf2] sm:$0xff] }
 0x458   : > { %9413 = vmatprep.mubr.msk.f32.mxu1 %vm291_vm0, %v11912_v17  ;;  %12694 = vst [vmem:[#allocation20_spill] sm:$0xff] %v11928_v8  ;;  %v11932_v17 = vld [vmem:[#allocation3 + $0xfa] sm:$0xff] }
 0x459   : > { %12695 = vst [vmem:[#allocation21_spill] sm:$0xff] %v11932_v17 }
 0x45b   : > { %9414 = vmatmul.mubr.msk.f32.gmra.mrb[16].mxu1 %vm291_vm0, %v11916_v9  ;;  %v11936_v9 = vld [vmem:[#allocation3 + $0x10a] sm:$0xff] }
 0x45c   : > { %9416 = vmatprep.mubr.msk.f32.mxu1 %vm291_vm0, %v11920_v0  ;;  %12696 = vst [vmem:[#allocation22_spill] sm:$0xff] %v11936_v9  ;;  %v11940_v0 = vld [vmem:[#allocation3 + $0x112] sm:$0xff] }
 0x45d   : > { %12697 = vst [vmem:[#allocation23_spill] sm:$0xff] %v11940_v0 }
 0x45f   : > { %9417 = vmatmul.mubr.msk.f32.gmra.mrb[18].mxu1 %vm291_vm0, %v11924_v54  ;;  %v11944_v54 = vld [vmem:[#allocation3 + $0x122] sm:$0xff] }
 0x460   : > { %9419 = vmatprep.mubr.msk.f32.mxu1 %vm291_vm0, %v11928_v8  ;;  %12698 = vst [vmem:[#allocation24_spill] sm:$0xff] %v11944_v54  ;;  %v11948_v8 = vld [vmem:[#allocation3 + $0x12a] sm:$0xff] }
 0x461   : > { %12699 = vst [vmem:[#allocation25_spill] sm:$0xff] %v11948_v8 }
 0x463   : > { %9420 = vmatmul.mubr.msk.f32.gmra.mrb[20].mxu1 %vm291_vm0, %v11932_v17  ;;  %v11952_v17 = vld [vmem:[#allocation3 + $0x13a] sm:$0xff] }
 0x464   : > { %9422 = vmatprep.mubr.msk.f32.mxu1 %vm291_vm0, %v11936_v9  ;;  %12700 = vst [vmem:[#allocation26_spill] sm:$0xff] %v11952_v17  ;;  %v11956_v9 = vld [vmem:[#allocation3 + $0x142] sm:$0xff] }
 0x467   : > { %9423 = vmatmul.mubr.msk.f32.gmra.mrb[22].mxu1 %vm291_vm0, %v11940_v0  ;;  %v11960_v0 = vld [vmem:[#allocation3 + $0x152] sm:$0xff] }
 0x468   : > { %9425 = vmatprep.mubr.msk.f32.mxu1 %vm291_vm0, %v11944_v54  ;;  %12701 = vst [vmem:[#allocation27_spill] sm:$0xff] %v11960_v0  ;;  %v11964_v54 = vld [vmem:[#allocation3 + $0x15a] sm:$0xff] }
 0x46b   : > { %9426 = vmatmul.mubr.msk.f32.gmra.mrb[24].mxu1 %vm291_vm0, %v11948_v8  ;;  %v11968_v8 = vld [vmem:[#allocation3 + $0x16a] sm:$0xff] }
 0x46c   : > { %9428 = vmatprep.mubr.msk.f32.mxu1 %vm291_vm0, %v11952_v17  ;;  %12702 = vst [vmem:[#allocation28_spill] sm:$0xff] %v11968_v8  ;;  %v11972_v17 = vld [vmem:[#allocation3 + $0x172] sm:$0xff] }
 0x46f   : > { %9429 = vmatmul.mubr.msk.f32.gmra.mrb[26].mxu1 %vm291_vm0, %v11956_v9 }
 0x470   : > { %9431 = vmatprep.mubr.msk.f32.mxu1 %vm291_vm0, %v11960_v0  ;;  %v8099_v0 = vld [vmem:[%s12467_s3 + $0x14] sm:$0xf] }
 0x473   : > { %9432 = vmatmul.mubr.msk.f32.gmra.mrb[28].mxu1 %vm291_vm0, %v11964_v54 }
 0x474   : > { %9434 = vmatprep.mubr.msk.f32.mxu1 %vm291_vm0, %v11968_v8 }
 0x477   : > { %9435 = vmatmul.mubr.msk.f32.gmra.mrb[30].mxu1 %vm291_vm0, %v11972_v17 }
 0x478   : > { %9439 = vmatprep.mubr.msk.f32.mxu1 %vm291_vm0, %v11721_v6  ;;  %v12042_v6 = vld [vmem:[#allocation3 + $0x180] sm:$0xff] }
 0x47b   : > { %9440 = vmatmul.mubr.msk.f32.vlgmr.msra.gmra.mrb[0].mxu1 %vm291_vm0, %v11729_v11  ;;  %v12046_v11 = vld [vmem:[#allocation3 + $0x188] sm:$0xff] }
 0x47c   : > { %9488 = vmatpush3.msk.msra.mxu1 %vm543_vm2, %v11849_v15  ;;  %9442 = vmatprep.mubr.msk.f32.mxu1 %vm291_vm0, %v11733_v12  ;;  %v8133_v15 = vld [vmem:[%s12467_s3 + $0x18] sm:$0xf] }
 0x47d   : > { %9537 = vmatprep.subr.msk.mxu1 %vm543_vm2, %v8099_v0 }
 0x47f   : > { %9443 = vmatmul.mubr.msk.f32.gmra.mrb[2].mxu1 %vm291_vm0, %v11737_v7 }
 0x480   : > { %9445 = vmatprep.mubr.msk.f32.mxu1 %vm291_vm0, %v11741_v36 }
 0x483   : > { %9446 = vmatmul.mubr.msk.f32.gmra.mrb[4].mxu1 %vm291_vm0, %v11745_v18 }
 0x484   : > { %9448 = vmatprep.mubr.msk.f32.mxu1 %vm291_vm0, %v11749_v23 }
 0x487   : > { %9449 = vmatmul.mubr.msk.f32.gmra.mrb[6].mxu1 %vm291_vm0, %v11753_v27 }
 0x488   : > { %9451 = vmatprep.mubr.msk.f32.mxu1 %vm291_vm0, %v11757_v29 }
 0x48b   : > { %9452 = vmatmul.mubr.msk.f32.gmra.mrb[8].mxu1 %vm291_vm0, %v11761_v31 }
 0x48c   : > { %9454 = vmatprep.mubr.msk.f32.mxu1 %vm291_vm0, %v11765_v35 }
 0x48f   : > { %9455 = vmatmul.mubr.msk.f32.gmra.mrb[10].mxu1 %vm291_vm0, %v11769_v43 }
 0x490   : > { %9457 = vmatprep.mubr.msk.f32.mxu1 %vm291_vm0, %v11773_v45 }
 0x493   : > { %9458 = vmatmul.mubr.msk.f32.gmra.mrb[12].mxu1 %vm291_vm0, %v11777_v47 }
 0x494   : > { %9460 = vmatprep.mubr.msk.f32.mxu1 %vm291_vm0, %v11781_v49 }
 0x497   : > { %9461 = vmatmul.mubr.msk.f32.gmra.mrb[14].mxu1 %vm291_vm0, %v11785_v51 }
 0x498   : > { %9463 = vmatprep.mubr.msk.f32.mxu1 %vm291_vm0, %v11789_v59 }
 0x49b   : > { %9464 = vmatmul.mubr.msk.f32.gmra.mrb[16].mxu1 %vm291_vm0, %v11793_v20 }
 0x49c   : > { %9466 = vmatprep.mubr.msk.f32.mxu1 %vm291_vm0, %v11797_v22 }
 0x49f   : > { %9467 = vmatmul.mubr.msk.f32.gmra.mrb[18].mxu1 %vm291_vm0, %v11801_v24 }
 0x4a0   : > { %9469 = vmatprep.mubr.msk.f32.mxu1 %vm291_vm0, %v11805_v28 }
 0x4a3   : > { %9470 = vmatmul.mubr.msk.f32.gmra.mrb[20].mxu1 %vm291_vm0, %v11809_v32 }
 0x4a4   : > { %9472 = vmatprep.mubr.msk.f32.mxu1 %vm291_vm0, %v11813_v63 }
 0x4a7   : > { %9473 = vmatmul.mubr.msk.f32.gmra.mrb[22].mxu1 %vm291_vm0, %v11817_v1 }
 0x4a8   : > { %9475 = vmatprep.mubr.msk.f32.mxu1 %vm291_vm0, %v11821_v40 }
 0x4ab   : > { %9476 = vmatmul.mubr.msk.f32.gmra.mrb[24].mxu1 %vm291_vm0, %v11825_v44 }
 0x4ac   : > { %9478 = vmatprep.mubr.msk.f32.mxu1 %vm291_vm0, %v11829_v46 }
 0x4af   : > { %9479 = vmatmul.mubr.msk.f32.gmra.mrb[26].mxu1 %vm291_vm0, %v11833_v50 }
 0x4b0   : > { %9481 = vmatprep.mubr.msk.f32.mxu1 %vm291_vm0, %v11837_v56 }
 0x4b3   : > { %9482 = vmatmul.mubr.msk.f32.gmra.mrb[28].mxu1 %vm291_vm0, %v11841_v3 }
 0x4b4   : > { %9484 = vmatprep.mubr.msk.f32.mxu1 %vm291_vm0, %v12042_v6 }
 0x4b7   : > { %9485 = vmatmul.mubr.msk.f32.gmra.mrb[30].mxu1 %vm291_vm0, %v12046_v11 }
 0x4b8   : > { %9489 = vmatprep.mubr.msk.f32.mxu1 %vm291_vm0, %v11542_v19  ;;  %v12703_v19 = vld [vmem:[#allocation12_spill] sm:$0xff] }
 0x4bb   : > { %9490 = vmatmul.mubr.msk.f32.vlgmr.msra.gmra.mrb[0].mxu1 %vm291_vm0, %v11548_v10  ;;  %v12704_v10 = vld [vmem:[#allocation13_spill] sm:$0xff] }
 0x4bc   : > { %9538 = vmatpush3.msk.msra.mxu1 %vm543_vm2, %v8099_v0  ;;  %9492 = vmatprep.mubr.msk.f32.mxu1 %vm291_vm0, %v11554_v21  ;;  %v12115_v21 = vld [vmem:[#allocation3 + $0x181] sm:$0xff]  ;;  %v12712_v0 = vld [vmem:[#allocation9_spill] sm:$0xff] }
 0x4bd   : > { %9587 = vmatprep.subr.msk.mxu1 %vm543_vm2, %v8133_v15 }
 0x4bf   : > { %9493 = vmatmul.mubr.msk.f32.gmra.mrb[2].mxu1 %vm291_vm0, %v11560_v25  ;;  %v12119_v25 = vld [vmem:[#allocation3 + $0x189] sm:$0xff] }
 0x4c0   : > { %9495 = vmatprep.mubr.msk.f32.mxu1 %vm291_vm0, %v11566_v37  ;;  %v12705_v37 = vld [vmem:[#allocation29_spill] sm:$0xff] }
 0x4c3   : > { %9496 = vmatmul.mubr.msk.f32.gmra.mrb[4].mxu1 %vm291_vm0, %v11572_v41  ;;  %v8167_v41 = vld [vmem:[%s12467_s3 + $0x1c] sm:$0xf] }
 0x4c4   : > { %9498 = vmatprep.mubr.msk.f32.mxu1 %vm291_vm0, %v11578_v53  ;;  %v12706_v53 = vld [vmem:[#allocation31_spill] sm:$0xff] }
 0x4c7   : > { %9499 = vmatmul.mubr.msk.f32.gmra.mrb[6].mxu1 %vm291_vm0, %v11584_v57  ;;  %v12707_v57 = vld [vmem:[#allocation32_spill] sm:$0xff] }
 0x4c8   : > { %9501 = vmatprep.mubr.msk.f32.mxu1 %vm291_vm0, %v11590_v26  ;;  %v12708_v26 = vld [vmem:[#allocation33_spill] sm:$0xff] }
 0x4cb   : > { %9502 = vmatmul.mubr.msk.f32.gmra.mrb[8].mxu1 %vm291_vm0, %v11596_v30  ;;  %v12709_v30 = vld [vmem:[#allocation35_spill] sm:$0xff] }
 0x4cc   : > { %9504 = vmatprep.mubr.msk.f32.mxu1 %vm291_vm0, %v11602_v34  ;;  %v12710_v34 = vld [vmem:[#allocation37_spill] sm:$0xff] }
 0x4cf   : > { %9505 = vmatmul.mubr.msk.f32.gmra.mrb[10].mxu1 %vm291_vm0, %v11608_v42  ;;  %v12711_v42 = vld [vmem:[#allocation8_spill] sm:$0xff] }
 0x4d0   : > { %9507 = vmatprep.mubr.msk.f32.mxu1 %vm291_vm0, %v11614_v58 }
 0x4d3   : > { %9508 = vmatmul.mubr.msk.f32.gmra.mrb[12].mxu1 %vm291_vm0, %v11620_v62 }
 0x4d4   : > { %9510 = vmatprep.mubr.msk.f32.mxu1 %vm291_vm0, %v11626_v5 }
 0x4d7   : > { %9511 = vmatmul.mubr.msk.f32.gmra.mrb[14].mxu1 %vm291_vm0, %v11632_v13 }
 0x4d8   : > { %9513 = vmatprep.mubr.msk.f32.mxu1 %vm291_vm0, %v11638_v14 }
 0x4db   : > { %9514 = vmatmul.mubr.msk.f32.gmra.mrb[16].mxu1 %vm291_vm0, %v11644_v16 }
 0x4dc   : > { %9516 = vmatprep.mubr.msk.f32.mxu1 %vm291_vm0, %v11650_v33 }
 0x4df   : > { %9517 = vmatmul.mubr.msk.f32.gmra.mrb[18].mxu1 %vm291_vm0, %v11656_v39 }
 0x4e0   : > { %9519 = vmatprep.mubr.msk.f32.mxu1 %vm291_vm0, %v11662_v55 }
 0x4e3   : > { %9520 = vmatmul.mubr.msk.f32.gmra.mrb[20].mxu1 %vm291_vm0, %v11668_v61 }
 0x4e4   : > { %9522 = vmatprep.mubr.msk.f32.mxu1 %vm291_vm0, %v11674_v4 }
 0x4e7   : > { %9523 = vmatmul.mubr.msk.f32.gmra.mrb[22].mxu1 %vm291_vm0, %v11680_v2 }
 0x4e8   : > { %9525 = vmatprep.mubr.msk.f32.mxu1 %vm291_vm0, %v11686_v52 }
 0x4eb   : > { %9526 = vmatmul.mubr.msk.f32.gmra.mrb[24].mxu1 %vm291_vm0, %v11692_v60 }
 0x4ec   : > { %9528 = vmatprep.mubr.msk.f32.mxu1 %vm291_vm0, %v11697_v48 }
 0x4ef   : > { %9529 = vmatmul.mubr.msk.f32.gmra.mrb[26].mxu1 %vm291_vm0, %v11702_v38 }
 0x4f0   : > { %9531 = vmatprep.mubr.msk.f32.mxu1 %vm291_vm0, %v12703_v19 }
 0x4f3   : > { %9532 = vmatmul.mubr.msk.f32.gmra.mrb[28].mxu1 %vm291_vm0, %v12704_v10 }
 0x4f4   : > { %9534 = vmatprep.mubr.msk.f32.mxu1 %vm291_vm0, %v12115_v21 }
 0x4f7   : > { %9535 = vmatmul.mubr.msk.f32.gmra.mrb[30].mxu1 %vm291_vm0, %v12119_v25 }
 0x4f8   : > { %9539 = vmatprep.mubr.msk.f32.mxu1 %vm291_vm0, %v12705_v37  ;;  %v12714_v37 = vld [vmem:[#allocation11_spill] sm:$0xff] }
 0x4fb   : > { %9540 = vmatmul.mubr.msk.f32.vlgmr.msra.gmra.mrb[0].mxu1 %vm291_vm0, %v12706_v53  ;;  %v12715_v53 = vld [vmem:[#allocation39_spill] sm:$0xff] }
 0x4fc   : > { %9588 = vmatpush3.msk.msra.mxu1 %vm543_vm2, %v8133_v15  ;;  %9542 = vmatprep.mubr.msk.f32.mxu1 %vm291_vm0, %v12707_v57  ;;  %v12713_v15 = vld [vmem:[#allocation10_spill] sm:$0xff] }
 0x4fd   : > { %9637 = vmatprep.subr.msk.mxu1 %vm543_vm2, %v8167_v41 }
 0x4ff   : > { %9543 = vmatmul.mubr.msk.f32.gmra.mrb[2].mxu1 %vm291_vm0, %v12708_v26  ;;  %v12716_v26 = vld [vmem:[#allocation40_spill] sm:$0xff] }
 0x500   : > { %9545 = vmatprep.mubr.msk.f32.mxu1 %vm291_vm0, %v12709_v30  ;;  %v12717_v30 = vld [vmem:[#allocation14_spill] sm:$0xff] }
 0x503   : > { %9546 = vmatmul.mubr.msk.f32.gmra.mrb[4].mxu1 %vm291_vm0, %v12710_v34  ;;  %v12718_v34 = vld [vmem:[#allocation15_spill] sm:$0xff] }
 0x504   : > { %9548 = vmatprep.mubr.msk.f32.mxu1 %vm291_vm0, %v12711_v42  ;;  %v12719_v42 = vld [vmem:[#allocation16_spill] sm:$0xff] }
 0x507   : > { %9549 = vmatmul.mubr.msk.f32.gmra.mrb[6].mxu1 %vm291_vm0, %v12712_v0  ;;  %v12720_v0 = vld [vmem:[#allocation17_spill] sm:$0xff] }
 0x508   : > { %9551 = vmatprep.mubr.msk.f32.mxu1 %vm291_vm0, %v12713_v15  ;;  %v12721_v15 = vld [vmem:[#allocation18_spill] sm:$0xff] }
 0x50b   : > { %9552 = vmatmul.mubr.msk.f32.gmra.mrb[8].mxu1 %vm291_vm0, %v12714_v37  ;;  %v12722_v37 = vld [vmem:[#allocation19_spill] sm:$0xff] }
 0x50c   : > { %9554 = vmatprep.mubr.msk.f32.mxu1 %vm291_vm0, %v12715_v53  ;;  %v12723_v53 = vld [vmem:[#allocation20_spill] sm:$0xff] }
 0x50f   : > { %9555 = vmatmul.mubr.msk.f32.gmra.mrb[10].mxu1 %vm291_vm0, %v12716_v26  ;;  %v12724_v26 = vld [vmem:[#allocation21_spill] sm:$0xff] }
 0x510   : > { %9557 = vmatprep.mubr.msk.f32.mxu1 %vm291_vm0, %v12717_v30  ;;  %v12725_v30 = vld [vmem:[#allocation22_spill] sm:$0xff] }
 0x513   : > { %9558 = vmatmul.mubr.msk.f32.gmra.mrb[12].mxu1 %vm291_vm0, %v12718_v34  ;;  %v12726_v34 = vld [vmem:[#allocation23_spill] sm:$0xff] }
 0x514   : > { %9560 = vmatprep.mubr.msk.f32.mxu1 %vm291_vm0, %v12719_v42  ;;  %v12727_v42 = vld [vmem:[#allocation24_spill] sm:$0xff] }
 0x517   : > { %9561 = vmatmul.mubr.msk.f32.gmra.mrb[14].mxu1 %vm291_vm0, %v12720_v0  ;;  %v12728_v0 = vld [vmem:[#allocation25_spill] sm:$0xff] }
 0x518   : > { %9563 = vmatprep.mubr.msk.f32.mxu1 %vm291_vm0, %v12721_v15  ;;  %v12729_v15 = vld [vmem:[#allocation26_spill] sm:$0xff] }
 0x51b   : > { %9564 = vmatmul.mubr.msk.f32.gmra.mrb[16].mxu1 %vm291_vm0, %v12722_v37 }
 0x51c   : > { %9566 = vmatprep.mubr.msk.f32.mxu1 %vm291_vm0, %v12723_v53  ;;  %v12730_v53 = vld [vmem:[#allocation27_spill] sm:$0xff] }
 0x51f   : > { %9567 = vmatmul.mubr.msk.f32.gmra.mrb[18].mxu1 %vm291_vm0, %v12724_v26 }
 0x520   : > { %9569 = vmatprep.mubr.msk.f32.mxu1 %vm291_vm0, %v12725_v30 }
 0x523   : > { %9570 = vmatmul.mubr.msk.f32.gmra.mrb[20].mxu1 %vm291_vm0, %v12726_v34 }
 0x524   : > { %9572 = vmatprep.mubr.msk.f32.mxu1 %vm291_vm0, %v12727_v42  ;;  %v12188_v42 = vld [vmem:[#allocation3 + $0x182] sm:$0xff] }
 0x527   : > { %9573 = vmatmul.mubr.msk.f32.gmra.mrb[22].mxu1 %vm291_vm0, %v12728_v0 }
 0x528   : > { %9575 = vmatprep.mubr.msk.f32.mxu1 %vm291_vm0, %v12729_v15  ;;  %v12192_v15 = vld [vmem:[#allocation3 + $0x18a] sm:$0xff] }
 0x52b   : > { %9576 = vmatmul.mubr.msk.f32.gmra.mrb[24].mxu1 %vm291_vm0, %v11956_v9 }
 0x52c   : > { %9578 = vmatprep.mubr.msk.f32.mxu1 %vm291_vm0, %v12730_v53 }
 0x52f   : > { %9579 = vmatmul.mubr.msk.f32.gmra.mrb[26].mxu1 %vm291_vm0, %v11964_v54 }
 0x530   : > { %9581 = vmatprep.mubr.msk.f32.mxu1 %vm291_vm0, %v11968_v8  ;;  %v8201_v8 = vld [vmem:[%s12467_s3 + $0x20] sm:$0xf] }
 0x533   : > { %9582 = vmatmul.mubr.msk.f32.gmra.mrb[28].mxu1 %vm291_vm0, %v11972_v17 }
 0x534   : > { %9584 = vmatprep.mubr.msk.f32.mxu1 %vm291_vm0, %v12188_v42 }
 0x537   : > { %9585 = vmatmul.mubr.msk.f32.gmra.mrb[30].mxu1 %vm291_vm0, %v12192_v15 }
 0x538   : > { %9589 = vmatprep.mubr.msk.f32.mxu1 %vm291_vm0, %v11733_v12  ;;  %v6291_v12 = vld [vmem:[#allocation3 + $0x198] sm:$0xff] }
 0x53b   : > { %9590 = vmatmul.mubr.msk.f32.vlgmr.msra.gmra.mrb[0].mxu1 %vm291_vm0, %v11737_v7  ;;  %v6292_v7 = vld [vmem:[#allocation3 + $0x1a0] sm:$0xff] }
 0x53c   : > { %9638 = vmatpush3.msk.msra.mxu1 %vm543_vm2, %v8167_v41  ;;  %9592 = vmatprep.mubr.msk.f32.mxu1 %vm291_vm0, %v11741_v36  ;;  %v6651_v36 = vld [vmem:[#allocation3 + $0x31] sm:$0xff] }
 0x53d   : > { %9687 = vmatprep.subr.msk.mxu1 %vm543_vm2, %v8201_v8 }
 0x53f   : > { %9593 = vmatmul.mubr.msk.f32.gmra.mrb[2].mxu1 %vm291_vm0, %v11745_v18  ;;  %v6652_v18 = vld [vmem:[#allocation3 + $0x39] sm:$0xff] }
 0x540   : > { %9595 = vmatprep.mubr.msk.f32.mxu1 %vm291_vm0, %v11749_v23  ;;  %v6653_v23 = vld [vmem:[#allocation3 + $0x49] sm:$0xff] }
 0x543   : > { %9596 = vmatmul.mubr.msk.f32.gmra.mrb[4].mxu1 %vm291_vm0, %v11753_v27  ;;  %v6654_v27 = vld [vmem:[#allocation3 + $0x51] sm:$0xff] }
 0x544   : > { %9598 = vmatprep.mubr.msk.f32.mxu1 %vm291_vm0, %v11757_v29  ;;  %v6655_v29 = vld [vmem:[#allocation3 + $0x61] sm:$0xff] }
 0x547   : > { %9599 = vmatmul.mubr.msk.f32.gmra.mrb[6].mxu1 %vm291_vm0, %v11761_v31  ;;  %v6656_v31 = vld [vmem:[#allocation3 + $0x69] sm:$0xff] }
 0x548   : > { %9601 = vmatprep.mubr.msk.f32.mxu1 %vm291_vm0, %v11765_v35  ;;  %v6657_v35 = vld [vmem:[#allocation3 + $0x79] sm:$0xff] }
 0x54b   : > { %9602 = vmatmul.mubr.msk.f32.gmra.mrb[8].mxu1 %vm291_vm0, %v11769_v43  ;;  %v6658_v43 = vld [vmem:[#allocation3 + $0x81] sm:$0xff] }
 0x54c   : > { %9604 = vmatprep.mubr.msk.f32.mxu1 %vm291_vm0, %v11773_v45  ;;  %v6659_v45 = vld [vmem:[#allocation3 + $0x91] sm:$0xff] }
 0x54f   : > { %9605 = vmatmul.mubr.msk.f32.gmra.mrb[10].mxu1 %vm291_vm0, %v11777_v47  ;;  %v6660_v47 = vld [vmem:[#allocation3 + $0x99] sm:$0xff] }
 0x550   : > { %9607 = vmatprep.mubr.msk.f32.mxu1 %vm291_vm0, %v11781_v49  ;;  %v12745_v49 = vld [vmem:[#allocation20_spill] sm:$0xff] }
 0x553   : > { %9608 = vmatmul.mubr.msk.f32.gmra.mrb[12].mxu1 %vm291_vm0, %v11785_v51  ;;  %v12746_v51 = vld [vmem:[#allocation24_spill] sm:$0xff] }
 0x554   : > { %9610 = vmatprep.mubr.msk.f32.mxu1 %vm291_vm0, %v11789_v59  ;;  %v12747_v59 = vld [vmem:[#allocation26_spill] sm:$0xff] }
 0x557   : > { %9611 = vmatmul.mubr.msk.f32.gmra.mrb[14].mxu1 %vm291_vm0, %v11793_v20  ;;  %v12748_v20 = vld [vmem:[#allocation28_spill] sm:$0xff] }
 0x558   : > { %9613 = vmatprep.mubr.msk.f32.mxu1 %vm291_vm0, %v11797_v22  ;;  %v7071_v22 = vld [vmem:[#allocation3 + $0x19a] sm:$0xff] }
 0x55b   : > { %9614 = vmatmul.mubr.msk.f32.gmra.mrb[16].mxu1 %vm291_vm0, %v11801_v24 }
 0x55c   : > { %9616 = vmatprep.mubr.msk.f32.mxu1 %vm291_vm0, %v11805_v28 }
 0x55f   : > { %9617 = vmatmul.mubr.msk.f32.gmra.mrb[18].mxu1 %vm291_vm0, %v11809_v32 }
 0x560   : > { %9619 = vmatprep.mubr.msk.f32.mxu1 %vm291_vm0, %v11813_v63 }
 0x563   : > { %9620 = vmatmul.mubr.msk.f32.gmra.mrb[20].mxu1 %vm291_vm0, %v11817_v1 }
 0x564   : > { %9622 = vmatprep.mubr.msk.f32.mxu1 %vm291_vm0, %v11821_v40 }
 0x567   : > { %9623 = vmatmul.mubr.msk.f32.gmra.mrb[22].mxu1 %vm291_vm0, %v11825_v44 }
 0x568   : > { %9625 = vmatprep.mubr.msk.f32.mxu1 %vm291_vm0, %v11829_v46 }
 0x56b   : > { %9626 = vmatmul.mubr.msk.f32.gmra.mrb[24].mxu1 %vm291_vm0, %v11833_v50 }
 0x56c   : > { %9628 = vmatprep.mubr.msk.f32.mxu1 %vm291_vm0, %v11837_v56 }
 0x56f   : > { %9629 = vmatmul.mubr.msk.f32.gmra.mrb[26].mxu1 %vm291_vm0, %v11841_v3 }
 0x570   : > { %9631 = vmatprep.mubr.msk.f32.mxu1 %vm291_vm0, %v12042_v6 }
 0x573   : > { %9632 = vmatmul.mubr.msk.f32.gmra.mrb[28].mxu1 %vm291_vm0, %v12046_v11 }
 0x574   : > { %9634 = vmatprep.mubr.msk.f32.mxu1 %vm291_vm0, %v6291_v12 }
 0x577   : > { %9635 = vmatmul.mubr.msk.f32.gmra.mrb[30].mxu1 %vm291_vm0, %v6292_v7 }
 0x578   : > { %9639 = vmatprep.mubr.msk.f32.mxu1 %vm291_vm0, %v6651_v36 }
 0x57b   : > { %9640 = vmatmul.mubr.msk.f32.vlgmr.msra.gmra.mrb[0].mxu1 %vm291_vm0, %v6652_v18 }
 0x57c   : > { %9688 = vmatpush3.msk.msra.mxu1 %vm543_vm2, %v8201_v8  ;;  %9642 = vmatprep.mubr.msk.f32.mxu1 %vm291_vm0, %v6653_v23 }
 0x57f   : > { %9643 = vmatmul.mubr.msk.f32.gmra.mrb[2].mxu1 %vm291_vm0, %v6654_v27 }
 0x580   : > { %9645 = vmatprep.mubr.msk.f32.mxu1 %vm291_vm0, %v6655_v29 }
 0x583   : > { %9646 = vmatmul.mubr.msk.f32.gmra.mrb[4].mxu1 %vm291_vm0, %v6656_v31 }
 0x584   : > { %9648 = vmatprep.mubr.msk.f32.mxu1 %vm291_vm0, %v6657_v35 }
 0x587   : > { %9649 = vmatmul.mubr.msk.f32.gmra.mrb[6].mxu1 %vm291_vm0, %v6658_v43 }
 0x588   : > { %9651 = vmatprep.mubr.msk.f32.mxu1 %vm291_vm0, %v6659_v45 }
 0x58b   : > { %9652 = vmatmul.mubr.msk.f32.gmra.mrb[8].mxu1 %vm291_vm0, %v6660_v47 }
 0x58c   : > { %9654 = vmatprep.mubr.msk.f32.mxu1 %vm291_vm0, %v11614_v58  ;;  %v6681_v58 = vld [vmem:[#allocation3 + $0x199] sm:$0xff] }
 0x58f   : > { %9655 = vmatmul.mubr.msk.f32.gmra.mrb[10].mxu1 %vm291_vm0, %v11620_v62  ;;  %v6682_v62 = vld [vmem:[#allocation3 + $0x1a1] sm:$0xff] }
 0x590   : > { %9657 = vmatprep.mubr.msk.f32.mxu1 %vm291_vm0, %v11626_v5  ;;  %v12731_v5 = vld [vmem:[#allocation33_spill] sm:$0xff] }
 0x593   : > { %9658 = vmatmul.mubr.msk.f32.gmra.mrb[12].mxu1 %vm291_vm0, %v11632_v13  ;;  %v12732_v13 = vld [vmem:[#allocation35_spill] sm:$0xff] }
 0x594   : > { %9660 = vmatprep.mubr.msk.f32.mxu1 %vm291_vm0, %v11638_v14  ;;  %v12733_v14 = vld [vmem:[#allocation37_spill] sm:$0xff] }
 0x597   : > { %9661 = vmatmul.mubr.msk.f32.gmra.mrb[14].mxu1 %vm291_vm0, %v11644_v16  ;;  %v12734_v16 = vld [vmem:[#allocation8_spill] sm:$0xff] }
 0x598   : > { %9663 = vmatprep.mubr.msk.f32.mxu1 %vm291_vm0, %v11650_v33  ;;  %v12735_v33 = vld [vmem:[#allocation9_spill] sm:$0xff] }
 0x59b   : > { %9664 = vmatmul.mubr.msk.f32.gmra.mrb[16].mxu1 %vm291_vm0, %v11656_v39  ;;  %v12736_v39 = vld [vmem:[#allocation10_spill] sm:$0xff] }
 0x59c   : > { %9666 = vmatprep.mubr.msk.f32.mxu1 %vm291_vm0, %v11662_v55  ;;  %v12737_v55 = vld [vmem:[#allocation11_spill] sm:$0xff] }
 0x59f   : > { %9667 = vmatmul.mubr.msk.f32.gmra.mrb[18].mxu1 %vm291_vm0, %v11668_v61  ;;  %v12738_v61 = vld [vmem:[#allocation39_spill] sm:$0xff] }
 0x5a0   : > { %9669 = vmatprep.mubr.msk.f32.mxu1 %vm291_vm0, %v11674_v4  ;;  %v12739_v4 = vld [vmem:[#allocation40_spill] sm:$0xff] }
 0x5a3   : > { %9670 = vmatmul.mubr.msk.f32.gmra.mrb[20].mxu1 %vm291_vm0, %v11680_v2  ;;  %v12740_v2 = vld [vmem:[#allocation14_spill] sm:$0xff] }
 0x5a4   : > { %9672 = vmatprep.mubr.msk.f32.mxu1 %vm291_vm0, %v11686_v52  ;;  %v12741_v52 = vld [vmem:[#allocation15_spill] sm:$0xff] }
 0x5a7   : > { %9673 = vmatmul.mubr.msk.f32.gmra.mrb[22].mxu1 %vm291_vm0, %v11692_v60  ;;  %v12742_v60 = vld [vmem:[#allocation16_spill] sm:$0xff] }
 0x5a8   : > { %9675 = vmatprep.mubr.msk.f32.mxu1 %vm291_vm0, %v11697_v48  ;;  %v12743_v48 = vld [vmem:[#allocation17_spill] sm:$0xff] }
 0x5ab   : > { %9676 = vmatmul.mubr.msk.f32.gmra.mrb[24].mxu1 %vm291_vm0, %v11702_v38  ;;  %v12744_v38 = vld [vmem:[#allocation18_spill] sm:$0xff] }
 0x5ac   : > { %9678 = vmatprep.mubr.msk.f32.mxu1 %vm291_vm0, %v12703_v19 }
 0x5af   : > { %9679 = vmatmul.mubr.msk.f32.gmra.mrb[26].mxu1 %vm291_vm0, %v12704_v10 }
 0x5b0   : > { %9681 = vmatprep.mubr.msk.f32.mxu1 %vm291_vm0, %v12115_v21 }
 0x5b3   : > { %9682 = vmatmul.mubr.msk.f32.gmra.mrb[28].mxu1 %vm291_vm0, %v12119_v25 }
 0x5b4   : > { %9684 = vmatprep.mubr.msk.f32.mxu1 %vm291_vm0, %v6681_v58 }
 0x5b7   : > { %9685 = vmatmul.mubr.msk.f32.gmra.mrb[30].mxu1 %vm291_vm0, %v6682_v62 }
 0x5b8   : > { %9689 = vmatprep.mubr.msk.f32.mxu1 %vm291_vm0, %v12707_v57 }
 0x5bb   : > { %9690 = vmatmul.mubr.msk.f32.vlgmr.msra.gmra.mrb[0].mxu1 %vm291_vm0, %v12731_v5 }
 0x5bc   : > { %9692 = vmatprep.mubr.msk.f32.mxu1 %vm291_vm0, %v12732_v13 }
 0x5bf   : > { %9693 = vmatmul.mubr.msk.f32.gmra.mrb[2].mxu1 %vm291_vm0, %v12733_v14 }
 0x5c0   : > { %9695 = vmatprep.mubr.msk.f32.mxu1 %vm291_vm0, %v12734_v16 }
 0x5c3   : > { %9696 = vmatmul.mubr.msk.f32.gmra.mrb[4].mxu1 %vm291_vm0, %v12735_v33 }
 0x5c4   : > { %9698 = vmatprep.mubr.msk.f32.mxu1 %vm291_vm0, %v12736_v39 }
 0x5c7   : > { %9699 = vmatmul.mubr.msk.f32.gmra.mrb[6].mxu1 %vm291_vm0, %v12737_v55 }
 0x5c8   : > { %9701 = vmatprep.mubr.msk.f32.mxu1 %vm291_vm0, %v12738_v61 }
 0x5cb   : > { %9702 = vmatmul.mubr.msk.f32.gmra.mrb[8].mxu1 %vm291_vm0, %v12739_v4 }
 0x5cc   : > { %9704 = vmatprep.mubr.msk.f32.mxu1 %vm291_vm0, %v12740_v2 }
 0x5cf   : > { %9705 = vmatmul.mubr.msk.f32.gmra.mrb[10].mxu1 %vm291_vm0, %v12741_v52 }
 0x5d0   : > { %9707 = vmatprep.mubr.msk.f32.mxu1 %vm291_vm0, %v12742_v60 }
 0x5d3   : > { %9708 = vmatmul.mubr.msk.f32.gmra.mrb[12].mxu1 %vm291_vm0, %v12743_v48 }
 0x5d4   : > { %9710 = vmatprep.mubr.msk.f32.mxu1 %vm291_vm0, %v12744_v38 }
 0x5d7   : > { %9711 = vmatmul.mubr.msk.f32.gmra.mrb[14].mxu1 %vm291_vm0, %v12722_v37 }
 0x5d8   : > { %9713 = vmatprep.mubr.msk.f32.mxu1 %vm291_vm0, %v12745_v49 }
 0x5db   : > { %9714 = vmatmul.mubr.msk.f32.gmra.mrb[16].mxu1 %vm291_vm0, %v12724_v26 }
 0x5dc   : > { %9716 = vmatprep.mubr.msk.f32.mxu1 %vm291_vm0, %v12725_v30 }
 0x5df   : > { %9717 = vmatmul.mubr.msk.f32.gmra.mrb[18].mxu1 %vm291_vm0, %v12726_v34 }
 0x5e0   : > { %9719 = vmatprep.mubr.msk.f32.mxu1 %vm291_vm0, %v12746_v51 }
 0x5e3   : > { %9720 = vmatmul.mubr.msk.f32.gmra.mrb[20].mxu1 %vm291_vm0, %v12728_v0 }
 0x5e4   : > { %9722 = vmatprep.mubr.msk.f32.mxu1 %vm291_vm0, %v12747_v59 }
 0x5e7   : > { %9723 = vmatmul.mubr.msk.f32.gmra.mrb[22].mxu1 %vm291_vm0, %v11956_v9  ;;  %v7072_v9 = vld [vmem:[#allocation3 + $0x1a2] sm:$0xff] }
 0x5e8   : > { %9725 = vmatprep.mubr.msk.f32.mxu1 %vm291_vm0, %v12730_v53 }
 0x5eb   : > { %9726 = vmatmul.mubr.msk.f32.gmra.mrb[24].mxu1 %vm291_vm0, %v11964_v54  ;;  %v12381_v54 = vld [vmem:[%s12468_s4] ss:$0 sm:$0xff] }
 0x5ec   : > { %9728 = vmatprep.mubr.msk.f32.mxu1 %vm291_vm0, %v12748_v20 }
 0x5ef   : > { %9729 = vmatmul.mubr.msk.f32.gmra.mrb[26].mxu1 %vm291_vm0, %v11972_v17 }
 0x5f0   : > { %9731 = vmatprep.mubr.msk.f32.mxu1 %vm291_vm0, %v12188_v42 }
 0x5f3   : > { %9732 = vmatmul.mubr.msk.f32.gmra.mrb[28].mxu1 %vm291_vm0, %v12192_v15 }
 0x5f4   : > { %9734 = vmatprep.mubr.msk.f32.mxu1 %vm291_vm0, %v7071_v22 }
 0x5f7   : > { %9735 = vmatmul.mubr.msk.f32.gmra.mrb[30].mxu1 %vm291_vm0, %v7072_v9 }
 0x68e   : > { %v9691_v24 = vpop.f32.mrb[0].mxu1 }
 0x68f   : > { %v7240_v28 = vpop.f32.mrb[1].mxu1  ;;  %v7439_v40 = vadd.f32 %v9691_v24, %v12381_v54 }
 0x690   : > { %v7438_v32 = vadd.f32 %v12381_v54, %v7240_v28  ;;  %v10290_v28 = vld [vmem:[%s10586_s9] sm:$0xff]  ;;  %s7544_s9 = scalar_lea.sflag [#allocation5], %s215_s26 }
 0x692   : > { %7470 = vxpose.xlu1.b32.start [1/16] (narrow) %v7438_v32, 8  ;;  %v9694_v63 = vpop.f32.mrb[2].mxu1 }
 0x693   : > { %v7250_v1 = vpop.f32.mrb[3].mxu1  ;;  %v7441_v8 = vadd.f32 %v9694_v63, %v12381_v54 }
 0x694   : > { %v7440_v50 = vadd.f32 %v12381_v54, %v7250_v1  ;;  %v12749_v1 = vld [vmem:[#allocation7_spill] sm:$0xff] }
 0x696   : > { %7471 = vxpose.xlu1.b32.cont [2/16] (narrow) %v7439_v40, 8  ;;  %v9697_v44 = vpop.f32.mrb[4].mxu1 }
 0x697   : > { %v7260_v46 = vpop.f32.mrb[5].mxu1  ;;  %v7443_v21 = vadd.f32 %v9697_v44, %v12381_v54 }
 0x698   : > { %v7442_v11 = vadd.f32 %v12381_v54, %v7260_v46 }
 0x69a   : > { %7472 = vxpose.xlu1.b32.cont [3/16] (narrow) %v7440_v50, 8  ;;  %v9700_v56 = vpop.f32.mrb[6].mxu1 }
 0x69b   : > { %v7270_v3 = vpop.f32.mrb[7].mxu1  ;;  %v7445_v34 = vadd.f32 %v9700_v56, %v12381_v54 }
 0x69c   : > { %v7444_v57 = vadd.f32 %v12381_v54, %v7270_v3 }
 0x69e   : > { %7473 = vxpose.xlu1.b32.cont [4/16] (narrow) %v7441_v8, 8  ;;  %v9703_v17 = vpop.f32.mrb[8].mxu1 }
 0x69f   : > { %v7280_v6 = vpop.f32.mrb[9].mxu1  ;;  %v7447_v18 = vadd.f32 %v9703_v17, %v12381_v54 }
 0x6a0   : > { %v7446_v37 = vadd.f32 %v12381_v54, %v7280_v6 }
 0x6a2   : > { %7474 = vxpose.xlu1.b32.cont [5/16] (narrow) %v7442_v11, 8  ;;  %v9706_v19 = vpop.f32.mrb[10].mxu1 }
 0x6a3   : > { %v7290_v10 = vpop.f32.mrb[11].mxu1  ;;  %v7449_v62 = vadd.f32 %v9706_v19, %v12381_v54 }
 0x6a4   : > { %v7448_v35 = vadd.f32 %v12381_v54, %v7290_v10 }
 0x6a6   : > { %7475 = vxpose.xlu1.b32.cont [6/16] (narrow) %v7443_v21, 8  ;;  %v9709_v25 = vpop.f32.mrb[12].mxu1 }
 0x6a7   : > { %v7300_v41 = vpop.f32.mrb[13].mxu1  ;;  %v7451_v2 = vadd.f32 %v9709_v25, %v12381_v54 }
 0x6a8   : > { %v7450_v33 = vadd.f32 %v12381_v54, %v7300_v41 }
 0x6aa   : > { %7476 = vxpose.xlu1.b32.cont [7/16] (narrow) %v7444_v57, 8  ;;  %v9712_v26 = vpop.f32.mrb[14].mxu1 }
 0x6ab   : > { %v7310_v30 = vpop.f32.mrb[15].mxu1  ;;  %v7453_v9 = vadd.f32 %v9712_v26, %v12381_v54 }
 0x6ac   : > { %v7452_v49 = vadd.f32 %v12381_v54, %v7310_v30 }
 0x6ae   : > { %7477 = vxpose.xlu1.b32.cont [8/16] (narrow) %v7445_v34, 8  ;;  %v9715_v42 = vpop.f32.mrb[16].mxu1 }
 0x6af   : > { %v7455_v0 = vadd.f32 %v9715_v42, %v12381_v54  ;;  %v7320_v15 = vpop.f32.mrb[17].mxu1 }
 0x6b0   : > { %v7454_v53 = vadd.f32 %v12381_v54, %v7320_v15 }
 0x6b2   : > { %7478 = vxpose.xlu1.b32.cont [9/16] (narrow) %v7446_v37, 8  ;;  %v9718_v12 = vpop.f32.mrb[18].mxu1 }
 0x6b3   : > { %v7457_v7 = vadd.f32 %v9718_v12, %v12381_v54  ;;  %v7330_v36 = vpop.f32.mrb[19].mxu1 }
 0x6b4   : > { %v7456_v23 = vadd.f32 %v12381_v54, %v7330_v36 }
 0x6b6   : > { %7479 = vxpose.xlu1.b32.cont [10/16] (narrow) %v7447_v18, 8  ;;  %v9721_v27 = vpop.f32.mrb[20].mxu1 }
 0x6b7   : > { %v7459_v29 = vadd.f32 %v9721_v27, %v12381_v54  ;;  %v7340_v31 = vpop.f32.mrb[21].mxu1 }
 0x6b8   : > { %v7458_v43 = vadd.f32 %v12381_v54, %v7340_v31 }
 0x6ba   : > { %7480 = vxpose.xlu1.b32.cont [11/16] (narrow) %v7448_v35, 8  ;;  %v9724_v45 = vpop.f32.mrb[22].mxu1 }
 0x6bb   : > { %v7461_v47 = vadd.f32 %v9724_v45, %v12381_v54  ;;  %v7350_v58 = vpop.f32.mrb[23].mxu1 }
 0x6bc   : > { %v7460_v5 = vadd.f32 %v12381_v54, %v7350_v58 }
 0x6be   : > { %7481 = vxpose.xlu1.b32.cont [12/16] (narrow) %v7449_v62, 8  ;;  %v9727_v13 = vpop.f32.mrb[24].mxu1 }
 0x6bf   : > { %v7463_v14 = vadd.f32 %v9727_v13, %v12381_v54  ;;  %v7360_v16 = vpop.f32.mrb[25].mxu1 }
 0x6c0   : > { %v7462_v39 = vadd.f32 %v12381_v54, %v7360_v16 }
 0x6c2   : > { %7482 = vxpose.xlu1.b32.cont [13/16] (narrow) %v7450_v33, 8  ;;  %v9730_v55 = vpop.f32.mrb[26].mxu1 }
 0x6c3   : > { %v7465_v61 = vadd.f32 %v9730_v55, %v12381_v54  ;;  %v7370_v4 = vpop.f32.mrb[27].mxu1 }
 0x6c4   : > { %v7464_v52 = vadd.f32 %v12381_v54, %v7370_v4 }
 0x6c6   : > { %7483 = vxpose.xlu1.b32.cont [14/16] (narrow) %v7451_v2, 8  ;;  %v9733_v60 = vpop.f32.mrb[28].mxu1 }
 0x6c7   : > { %v7467_v48 = vadd.f32 %v9733_v60, %v12381_v54  ;;  %v7380_v38 = vpop.f32.mrb[29].mxu1 }
 0x6c8   : > { %v7466_v51 = vadd.f32 %v12381_v54, %v7380_v38 }
 0x6ca   : > { %7484 = vxpose.xlu1.b32.cont [15/16] (narrow) %v7452_v49, 8  ;;  %v9736_v59 = vpop.f32.mrb[30].mxu1 }
 0x6cb   : > { %v7469_v20 = vadd.f32 %v9736_v59, %v12381_v54  ;;  %v7390_v22 = vpop.f32.mrb[31].mxu1 }
 0x6cc   : > { %v7468_v24 = vadd.f32 %v12381_v54, %v7390_v22 }
 0x6ce   : > { %7485 = vxpose.xlu1.b32.end [16/16] (narrow) %v7453_v9, 8 }
 0x6d2   : > { %7502 = vxpose.xlu1.b32.start [1/16] (narrow) %v7454_v53, 8 }
 0x6d6   : > { %7503 = vxpose.xlu1.b32.cont [2/16] (narrow) %v7455_v0, 8 }
 0x6da   : > { %7504 = vxpose.xlu1.b32.cont [3/16] (narrow) %v7456_v23, 8 }
 0x6de   : > { %7505 = vxpose.xlu1.b32.cont [4/16] (narrow) %v7457_v7, 8 }
 0x6e2   : > { %7506 = vxpose.xlu1.b32.cont [5/16] (narrow) %v7458_v43, 8 }
 0x6e6   : > { %7507 = vxpose.xlu1.b32.cont [6/16] (narrow) %v7459_v29, 8 }
 0x6ea   : > { %7508 = vxpose.xlu1.b32.cont [7/16] (narrow) %v7460_v5, 8 }
 0x6ee   : > { %7509 = vxpose.xlu1.b32.cont [8/16] (narrow) %v7461_v47, 8 }
 0x6f2   : > { %7510 = vxpose.xlu1.b32.cont [9/16] (narrow) %v7462_v39, 8 }
 0x6f6   : > { %7511 = vxpose.xlu1.b32.cont [10/16] (narrow) %v7463_v14, 8 }
 0x6fa   : > { %7512 = vxpose.xlu1.b32.cont [11/16] (narrow) %v7464_v52, 8 }
 0x6fe   : > { %7513 = vxpose.xlu1.b32.cont [12/16] (narrow) %v7465_v61, 8 }
 0x702   : > { %7514 = vxpose.xlu1.b32.cont [13/16] (narrow) %v7466_v51, 8 }
 0x706   : > { %7515 = vxpose.xlu1.b32.cont [14/16] (narrow) %v7467_v48, 8 }
 0x70a   : > { %7516 = vxpose.xlu1.b32.cont [15/16] (narrow) %v7468_v24, 8 }
 0x70e   : > { %7517 = vxpose.xlu1.b32.end [16/16] (narrow) %v7469_v20, 8 }
 0x712   : > { %v7486_v54 = vpop.trf.xlu1 }
 0x713   : > { %v7534_v32 = vadd.f32 %v10290_v28, %v7486_v54 }
 0x715   : > { %v7536_v44 = vmax.f32 %v7534_v32, 0.0 }
 0x752   : > { %v7518_v63 = vpop.trf.xlu1 }
 0x753   : > { %v7535_v40 = vadd.f32 %v7518_v63, %v12749_v1 }
 0x755   : > { %v7537_v46 = vmax.f32 %v7535_v40, 0.0 }
 0x757   : > { %v7540_v50 = vcombine.low %v7536_v44, %v7537_v46 }
 0x759   : > { %7542 = vst [vmem:[%s217_s7] sm:$0xff] %v7540_v50 }
 0x75a   : > { %10304 = shalt.err (!%p10301_p3)
}
 0x75b   : > { %s10305_s16 = scalar_lea.hbm %s12422_s12, 128  ;;  %s10309_s25 = scalar_lea.hbm %s12469_s5, 256 }
 0x75c   : > { %p10306_p4 = scmp.ne.s32.totalorder %s12422_s12, %s10305_s16  ;;  %p10310_p9 = scmp.lt.u32.totalorder %s12422_s12, %s12469_s5 }
 0x75d   : > { %p10311_p10 = scmp.lt.u32.totalorder %s10309_s25, %s10305_s16  ;;  %p10313_p12 = scmp.lt.u32.totalorder %s10305_s16, %s12422_s12 }
 0x75e   : > { %p10307_p7 = pnand %p10306_p4, %p10425_p5 }
 0x75f   : > { %p10312_p11 = por %p10311_p10, %p10310_p9 }
 0x760   : > { %p10308_p8 = pneg %p10307_p7 }
 0x761   : > { %p10314_p13 = por %p10313_p12, %p10312_p11 }
 0x763   : > { %p10315_p0 = pnand %p10314_p13, %p10308_p8 }
 0x765   : > { %10318 = shalt.err (!%p10315_p0)
}
 0x766   : > { %10249 = dma.vmem_to_hbm [thread:$0]  (%p10425_p5), %s12424_s8, 128, %s12422_s12, %s7544_s9  }
 0x767 PF: > { %p10255_p1 = scmp.ge.s32.totalorder %s10353_s21, 2  ;;  %s7570_s6 = sand.u32 1, %s10341_s18  }
 0x768   : > { %s7571_s7 = scalar_lea.sflag [#allocation5], %s7570_s6 }
 0x769   : > { %p10252_p2 = pnand %p10255_p1, %p10429_p6 }
 0x76b   : > { %10336 = dma.done.wait (!%p10252_p2), %s7571_s7, 128  }
 0x76c   : > { %10338 = vsyncadd (!%p10252_p2), %s7571_s7, 4294967168  ;;  %p15_p3 = scmp.ge.s32.totalorder %s10412_s24, 4   ;;  %s12750_s18 = smov %s10345_s19 }
 0x76d   : > { %s12751_s19 = smov %s10349_s20  ;;  %s12752_s20 = smov %s10423_s27 }
 0x76e   : > { %s12753_s21 = smov %s10412_s24  ;;  %17 = sbr.rel (!%p15_p3) target bundleno = 3 (0x3), region = 95 }
 0x775   :  { %7576 = vsyncpa [#allocation5], 1 }
 0x776   :  { %7578 = vsyncpa [#allocation5 + $0x1], 1 }

</bundles_post_ra>
